<compile_context>
chip_gen: v5e
topology: v5e:2x2
jax: 0.10.0
libtpu: 0.0.40
codegen_flags: <defaults>
</compile_context>

<pallas_src>
import functools

import jax
import jax.numpy as jnp
from jax.experimental import pallas as pl
from jax.experimental.pallas import tpu as pltpu


def _resnet_block_kernel(x_ref, w0_ref, b0_ref, w1_ref, b1_ref, o_ref, *,
                         H, W, Cin, Cmid, Cout, res_scale):
    HW = H * W
    # Aligned flatten (W is the sublane dim; H*W keeps the same layout).
    x = x_ref[0].reshape(HW, Cin)                      # (H*W, Cin) f32

    def conv3x3(flat, w_ref_, b_ref_, c_in, c_out, relu):
        # flat: (H*W, c_in) f32 activation, zero padding handled here.
        col = jax.lax.broadcasted_iota(jnp.int32, (HW, c_in), 0) % W
        # dw = -1 : source column w-1 -> roll rows down by 1, zero at w == 0.
        s_m1 = jnp.where(col == 0, 0.0, pltpu.roll(flat, shift=1, axis=0))
        # dw = +1 : source column w+1 -> roll rows up by 1, zero at w == W-1.
        s_p1 = jnp.where(col == W - 1, 0.0,
                         pltpu.roll(flat, shift=HW - 1, axis=0))
        shifts = (s_m1, flat, s_p1)                    # index kw = 0, 1, 2

        # Zero-row padding for the kh shifts (aligned sublane offsets).
        zrow = jnp.zeros((W, c_in), jnp.bfloat16)
        slabs = [jnp.concatenate([zrow, s.astype(jnp.bfloat16), zrow], axis=0)
                 for s in shifts]                      # ((H+2)*W, c_in) bf16

        # Accumulator starts from the broadcast bias (f32).
        acc = jnp.broadcast_to(b_ref_[...], (HW, c_out)).astype(jnp.float32)
        for kh in range(3):
            for kw in range(3):
                tap = slabs[kw][kh * W: kh * W + HW, :]     # aligned slice
                acc = acc + jnp.dot(tap, w_ref_[kh, kw],
                                    preferred_element_type=jnp.float32)
        if relu:
            acc = jnp.maximum(acc, 0.0)
        return acc                                      # (H*W, c_out) f32

    # conv0 + bias + ReLU  ->  conv1 + bias  (mode='CNA', norm=None)
    mid = conv3x3(x, w0_ref, b0_ref, Cin, Cmid, relu=True)
    y = conv3x3(mid, w1_ref, b1_ref, Cmid, Cout, relu=False)

    # residual scaling + skip connection, all in f32
    out = x + y * res_scale
    o_ref[0] = out.reshape(H, W, Cout).astype(o_ref.dtype)


def resnet_block_forward(x_nchw, w0, b0, w1, b1, res_scale=1.0):
    """x_nchw: (N, Cin, H, W); w0: (Cmid, Cin, 3, 3); w1: (Cout, Cmid, 3, 3)."""
    N, Cin, H, W = x_nchw.shape
    Cmid = w0.shape[0]
    Cout = w1.shape[0]
    assert Cin == Cout, "residual add requires in_nc == out_nc"

    # NCHW -> NHWC (PyTorch layout at the boundary); NO spatial pre-padding.
    x = jnp.transpose(x_nchw, (0, 2, 3, 1)).astype(jnp.float32)

    # PyTorch OIHW -> (kh, kw, Cin, Cout); bf16 operands for the MXU.
    w0_k = jnp.transpose(w0, (2, 3, 1, 0)).astype(jnp.bfloat16)
    w1_k = jnp.transpose(w1, (2, 3, 1, 0)).astype(jnp.bfloat16)
    b0_k = b0.reshape(1, Cmid).astype(jnp.float32)
    b1_k = b1.reshape(1, Cout).astype(jnp.float32)

    kernel = functools.partial(
        _resnet_block_kernel, H=H, W=W, Cin=Cin, Cmid=Cmid, Cout=Cout,
        res_scale=float(res_scale))

    out_nhwc = pl.pallas_call(
        kernel,
        out_shape=jax.ShapeDtypeStruct((N, H, W, Cout), jnp.float32),
        grid=(N,),
        in_specs=[
            pl.BlockSpec((1, H, W, Cin), lambda n: (n, 0, 0, 0)),
            pl.BlockSpec((3, 3, Cin, Cmid), lambda n: (0, 0, 0, 0)),
            pl.BlockSpec((1, Cmid), lambda n: (0, 0)),
            pl.BlockSpec((3, 3, Cmid, Cout), lambda n: (0, 0, 0, 0)),
            pl.BlockSpec((1, Cout), lambda n: (0, 0)),
        ],
        out_specs=pl.BlockSpec((1, H, W, Cout), lambda n: (n, 0, 0, 0)),
        compiler_params=pltpu.CompilerParams(
            dimension_semantics=("parallel",),
            vmem_limit_bytes=32 * 1024 * 1024),
    )(x, w0_k, b0_k, w1_k, b1_k)

    return jnp.transpose(out_nhwc, (0, 3, 1, 2))  # back to NCHW


def _reference_forward(x, w0, b0, w1, b1, res_scale=1.0):
    """Pure-JAX NCHW f32 reference (mirrors the PyTorch module)."""
    dn = jax.lax.conv_dimension_numbers(x.shape, w0.shape,
                                        ("NCHW", "OIHW", "NCHW"))
    y = jax.lax.conv_general_dilated(x, w0, (1, 1), "SAME",
                                     dimension_numbers=dn)
    y = y + b0[None, :, None, None]
    y = jnp.maximum(y, 0.0)
    y = jax.lax.conv_general_dilated(y, w1, (1, 1), "SAME",
                                     dimension_numbers=dn)
    y = y + b1[None, :, None, None]
    return x + y * res_scale


if __name__ == "__main__":
    # ResNetBlock(in_nc=4, mid_nc=8, out_nc=4, kernel_size=3, ...) defaults
    N, Cin, Cmid, Cout, H, W = 2, 4, 8, 4, 16, 16
    res_scale = 1.0

    key = jax.random.PRNGKey(0)
    kx, kw0, kb0, kw1, kb1 = jax.random.split(key, 5)
    x = jax.random.normal(kx, (N, Cin, H, W), jnp.float32)
    w0 = jax.random.normal(kw0, (Cmid, Cin, 3, 3), jnp.float32) * 0.1
    b0 = jax.random.normal(kb0, (Cmid,), jnp.float32) * 0.1
    w1 = jax.random.normal(kw1, (Cout, Cmid, 3, 3), jnp.float32) * 0.1
    b1 = jax.random.normal(kb1, (Cout,), jnp.float32) * 0.1

    out = resnet_block_forward(x, w0, b0, w1, b1, res_scale)
    out = jax.block_until_ready(out)

    ref = jax.block_until_ready(_reference_forward(x, w0, b0, w1, b1, res_scale))
    assert out.shape == (N, Cout, H, W)
    # bf16 matmul operands (f32 accumulation) -> widened tolerance vs f32 ref.
    assert jnp.allclose(out, ref, atol=2e-2, rtol=2e-2), "mismatch vs reference"

    print("KERNEL_OK")
</pallas_src>

<mosaic_0001>
module attributes {stable_mosaic.version = 11 : i64} {
  func.func @_resnet_block_kernel(%arg0: i32, %arg1: memref<1x16x16x4xf32, #tpu.memory_space<vmem>>, %arg2: memref<3x3x4x8xbf16, #tpu.memory_space<vmem>>, %arg3: memref<1x8xf32, #tpu.memory_space<vmem>>, %arg4: memref<3x3x8x4xbf16, #tpu.memory_space<vmem>>, %arg5: memref<1x4xf32, #tpu.memory_space<vmem>>, %arg6: memref<1x16x16x4xf32, #tpu.memory_space<vmem>>) attributes {dimension_semantics = [#tpu.dimension_semantics<parallel>], iteration_bounds = array<i64: 2>, scalar_prefetch = 0 : i64, scratch_operands = 0 : i64, tpu.core_type = #tpu.core_type<tc>, window_params = [{transform_indices = @transform_0, window_bounds = array<i64: 1, 16, 16, 4>}, {pipeline_mode = #tpu.pipeline_mode<synchronous>, transform_indices = @transform_1, window_bounds = array<i64: 3, 3, 4, 8>}, {pipeline_mode = #tpu.pipeline_mode<synchronous>, transform_indices = @transform_2, window_bounds = array<i64: 1, 8>}, {pipeline_mode = #tpu.pipeline_mode<synchronous>, transform_indices = @transform_3, window_bounds = array<i64: 3, 3, 8, 4>}, {pipeline_mode = #tpu.pipeline_mode<synchronous>, transform_indices = @transform_4, window_bounds = array<i64: 1, 4>}, {transform_indices = @transform_5, window_bounds = array<i64: 1, 16, 16, 4>}]} {
    %c0 = arith.constant 0 : index
    %c0_0 = arith.constant 0 : index
    %c0_1 = arith.constant 0 : index
    %c0_2 = arith.constant 0 : index
    %0 = vector.load %arg1[%c0, %c0_0, %c0_1, %c0_2] : memref<1x16x16x4xf32, #tpu.memory_space<vmem>>, vector<1x16x16x4xf32>
    %1 = vector.shape_cast %0 : vector<1x16x16x4xf32> to vector<16x16x4xf32>
    %2 = vector.shape_cast %1 : vector<16x16x4xf32> to vector<256x4xf32>
    %3 = tpu.iota {dimensions = array<i32: 0>} : vector<256x4xi32>
    %c16_i32 = arith.constant 16 : i32
    %c0_i32 = arith.constant 0 : i32
    %4 = arith.cmpi eq, %c16_i32, %c0_i32 : i32
    %c1_i32 = arith.constant 1 : i32
    %5 = arith.select %4, %c1_i32, %c16_i32 : i32
    %6 = vector.broadcast %5 : i32 to vector<256x4xi32>
    %7 = arith.remsi %3, %6 : vector<256x4xi32>
    %c0_i32_3 = arith.constant 0 : i32
    %8 = vector.broadcast %c0_i32_3 : i32 to vector<256x4xi32>
    %9 = arith.cmpi ne, %7, %8 : vector<256x4xi32>
    %c0_i32_4 = arith.constant 0 : i32
    %10 = vector.broadcast %c0_i32_4 : i32 to vector<256x4xi32>
    %11 = arith.cmpi slt, %7, %10 : vector<256x4xi32>
    %c0_i32_5 = arith.constant 0 : i32
    %12 = arith.cmpi slt, %5, %c0_i32_5 : i32
    %13 = vector.broadcast %12 : i1 to vector<256x4xi1>
    %14 = vector.broadcast %13 : vector<256x4xi1> to vector<256x4xi1>
    %15 = arith.xori %11, %14 : vector<256x4xi1>
    %16 = arith.andi %15, %9 : vector<256x4xi1>
    %17 = vector.broadcast %5 : i32 to vector<256x4xi32>
    %18 = arith.addi %7, %17 : vector<256x4xi32>
    %19 = arith.select %16, %18, %7 : vector<256x4xi1>, vector<256x4xi32>
    %c0_i32_6 = arith.constant 0 : i32
    %20 = vector.broadcast %c0_i32_6 : i32 to vector<256x4xi32>
    %21 = arith.cmpi eq, %19, %20 : vector<256x4xi32>
    %c1_i32_7 = arith.constant 1 : i32
    %22 = tpu.dynamic_rotate %2 by %c1_i32_7 dim 0 : vector<256x4xf32>, i32 -> vector<256x4xf32>
    %cst = arith.constant 0.000000e+00 : f32
    %23 = vector.broadcast %cst : f32 to vector<256x4xf32>
    %24 = arith.select %21, %23, %22 : vector<256x4xi1>, vector<256x4xf32>
    %c15_i32 = arith.constant 15 : i32
    %25 = vector.broadcast %c15_i32 : i32 to vector<256x4xi32>
    %26 = arith.cmpi eq, %19, %25 : vector<256x4xi32>
    %c255_i32 = arith.constant 255 : i32
    %27 = tpu.dynamic_rotate %2 by %c255_i32 dim 0 : vector<256x4xf32>, i32 -> vector<256x4xf32>
    %cst_8 = arith.constant 0.000000e+00 : f32
    %28 = vector.broadcast %cst_8 : f32 to vector<256x4xf32>
    %29 = arith.select %26, %28, %27 : vector<256x4xi1>, vector<256x4xf32>
    %cst_9 = arith.constant 0.000000e+00 : bf16
    %30 = vector.broadcast %cst_9 : bf16 to vector<16x4xbf16>
    %31 = arith.truncf %24 : vector<256x4xf32> to vector<256x4xbf16>
    %32 = tpu.concatenate %30, %31, %30 in 0 : vector<16x4xbf16>, vector<256x4xbf16>, vector<16x4xbf16> -> vector<288x4xbf16>
    %33 = arith.truncf %2 : vector<256x4xf32> to vector<256x4xbf16>
    %34 = tpu.concatenate %30, %33, %30 in 0 : vector<16x4xbf16>, vector<256x4xbf16>, vector<16x4xbf16> -> vector<288x4xbf16>
    %35 = arith.truncf %29 : vector<256x4xf32> to vector<256x4xbf16>
    %36 = tpu.concatenate %30, %35, %30 in 0 : vector<16x4xbf16>, vector<256x4xbf16>, vector<16x4xbf16> -> vector<288x4xbf16>
    %c0_10 = arith.constant 0 : index
    %c0_11 = arith.constant 0 : index
    %37 = vector.load %arg3[%c0_10, %c0_11] : memref<1x8xf32, #tpu.memory_space<vmem>>, vector<1x8xf32>
    %38 = vector.shape_cast %37 : vector<1x8xf32> to vector<1x8xf32>
    %39 = vector.broadcast %38 : vector<1x8xf32> to vector<256x8xf32>
    %40 = vector.extract_strided_slice %32 {offsets = [0, 0], sizes = [256, 4], strides = [1, 1]} : vector<288x4xbf16> to vector<256x4xbf16>
    %c0_12 = arith.constant 0 : index
    %c0_13 = arith.constant 0 : index
    %c0_14 = arith.constant 0 : index
    %c0_15 = arith.constant 0 : index
    %41 = vector.load %arg2[%c0_12, %c0_13, %c0_14, %c0_15] : memref<3x3x4x8xbf16, #tpu.memory_space<vmem>>, vector<1x1x4x8xbf16>
    %42 = vector.shape_cast %41 : vector<1x1x4x8xbf16> to vector<4x8xbf16>
    %cst_16 = arith.constant dense<0.000000e+00> : vector<256x8xf32>
    %43 = tpu.matmul %40, %42, %cst_16 {dimension_numbers = #tpu.dot_dimension_numbers<[1], [0], [0], [1], [0, 0, 1, 1], [], []>} : vector<256x4xbf16>, vector<4x8xbf16>, vector<256x8xf32> -> vector<256x8xf32>
    %44 = arith.addf %39, %43 : vector<256x8xf32>
    %45 = vector.extract_strided_slice %34 {offsets = [0, 0], sizes = [256, 4], strides = [1, 1]} : vector<288x4xbf16> to vector<256x4xbf16>
    %c0_17 = arith.constant 0 : index
    %c1 = arith.constant 1 : index
    %c0_18 = arith.constant 0 : index
    %c0_19 = arith.constant 0 : index
    %46 = vector.load %arg2[%c0_17, %c1, %c0_18, %c0_19] : memref<3x3x4x8xbf16, #tpu.memory_space<vmem>>, vector<1x1x4x8xbf16>
    %47 = vector.shape_cast %46 : vector<1x1x4x8xbf16> to vector<4x8xbf16>
    %cst_20 = arith.constant dense<0.000000e+00> : vector<256x8xf32>
    %48 = tpu.matmul %45, %47, %cst_20 {dimension_numbers = #tpu.dot_dimension_numbers<[1], [0], [0], [1], [0, 0, 1, 1], [], []>} : vector<256x4xbf16>, vector<4x8xbf16>, vector<256x8xf32> -> vector<256x8xf32>
    %49 = arith.addf %44, %48 : vector<256x8xf32>
    %50 = vector.extract_strided_slice %36 {offsets = [0, 0], sizes = [256, 4], strides = [1, 1]} : vector<288x4xbf16> to vector<256x4xbf16>
    %c0_21 = arith.constant 0 : index
    %c2 = arith.constant 2 : index
    %c0_22 = arith.constant 0 : index
    %c0_23 = arith.constant 0 : index
    %51 = vector.load %arg2[%c0_21, %c2, %c0_22, %c0_23] : memref<3x3x4x8xbf16, #tpu.memory_space<vmem>>, vector<1x1x4x8xbf16>
    %52 = vector.shape_cast %51 : vector<1x1x4x8xbf16> to vector<4x8xbf16>
    %cst_24 = arith.constant dense<0.000000e+00> : vector<256x8xf32>
    %53 = tpu.matmul %50, %52, %cst_24 {dimension_numbers = #tpu.dot_dimension_numbers<[1], [0], [0], [1], [0, 0, 1, 1], [], []>} : vector<256x4xbf16>, vector<4x8xbf16>, vector<256x8xf32> -> vector<256x8xf32>
    %54 = arith.addf %49, %53 : vector<256x8xf32>
    %55 = vector.extract_strided_slice %32 {offsets = [16, 0], sizes = [256, 4], strides = [1, 1]} : vector<288x4xbf16> to vector<256x4xbf16>
    %c1_25 = arith.constant 1 : index
    %c0_26 = arith.constant 0 : index
    %c0_27 = arith.constant 0 : index
    %c0_28 = arith.constant 0 : index
    %56 = vector.load %arg2[%c1_25, %c0_26, %c0_27, %c0_28] : memref<3x3x4x8xbf16, #tpu.memory_space<vmem>>, vector<1x1x4x8xbf16>
    %57 = vector.shape_cast %56 : vector<1x1x4x8xbf16> to vector<4x8xbf16>
    %cst_29 = arith.constant dense<0.000000e+00> : vector<256x8xf32>
    %58 = tpu.matmul %55, %57, %cst_29 {dimension_numbers = #tpu.dot_dimension_numbers<[1], [0], [0], [1], [0, 0, 1, 1], [], []>} : vector<256x4xbf16>, vector<4x8xbf16>, vector<256x8xf32> -> vector<256x8xf32>
    %59 = arith.addf %54, %58 : vector<256x8xf32>
    %60 = vector.extract_strided_slice %34 {offsets = [16, 0], sizes = [256, 4], strides = [1, 1]} : vector<288x4xbf16> to vector<256x4xbf16>
    %c1_30 = arith.constant 1 : index
    %c1_31 = arith.constant 1 : index
    %c0_32 = arith.constant 0 : index
    %c0_33 = arith.constant 0 : index
    %61 = vector.load %arg2[%c1_30, %c1_31, %c0_32, %c0_33] : memref<3x3x4x8xbf16, #tpu.memory_space<vmem>>, vector<1x1x4x8xbf16>
    %62 = vector.shape_cast %61 : vector<1x1x4x8xbf16> to vector<4x8xbf16>
    %cst_34 = arith.constant dense<0.000000e+00> : vector<256x8xf32>
    %63 = tpu.matmul %60, %62, %cst_34 {dimension_numbers = #tpu.dot_dimension_numbers<[1], [0], [0], [1], [0, 0, 1, 1], [], []>} : vector<256x4xbf16>, vector<4x8xbf16>, vector<256x8xf32> -> vector<256x8xf32>
    %64 = arith.addf %59, %63 : vector<256x8xf32>
    %65 = vector.extract_strided_slice %36 {offsets = [16, 0], sizes = [256, 4], strides = [1, 1]} : vector<288x4xbf16> to vector<256x4xbf16>
    %c1_35 = arith.constant 1 : index
    %c2_36 = arith.constant 2 : index
    %c0_37 = arith.constant 0 : index
    %c0_38 = arith.constant 0 : index
    %66 = vector.load %arg2[%c1_35, %c2_36, %c0_37, %c0_38] : memref<3x3x4x8xbf16, #tpu.memory_space<vmem>>, vector<1x1x4x8xbf16>
    %67 = vector.shape_cast %66 : vector<1x1x4x8xbf16> to vector<4x8xbf16>
    %cst_39 = arith.constant dense<0.000000e+00> : vector<256x8xf32>
    %68 = tpu.matmul %65, %67, %cst_39 {dimension_numbers = #tpu.dot_dimension_numbers<[1], [0], [0], [1], [0, 0, 1, 1], [], []>} : vector<256x4xbf16>, vector<4x8xbf16>, vector<256x8xf32> -> vector<256x8xf32>
    %69 = arith.addf %64, %68 : vector<256x8xf32>
    %70 = vector.extract_strided_slice %32 {offsets = [32, 0], sizes = [256, 4], strides = [1, 1]} : vector<288x4xbf16> to vector<256x4xbf16>
    %c2_40 = arith.constant 2 : index
    %c0_41 = arith.constant 0 : index
    %c0_42 = arith.constant 0 : index
    %c0_43 = arith.constant 0 : index
    %71 = vector.load %arg2[%c2_40, %c0_41, %c0_42, %c0_43] : memref<3x3x4x8xbf16, #tpu.memory_space<vmem>>, vector<1x1x4x8xbf16>
    %72 = vector.shape_cast %71 : vector<1x1x4x8xbf16> to vector<4x8xbf16>
    %cst_44 = arith.constant dense<0.000000e+00> : vector<256x8xf32>
    %73 = tpu.matmul %70, %72, %cst_44 {dimension_numbers = #tpu.dot_dimension_numbers<[1], [0], [0], [1], [0, 0, 1, 1], [], []>} : vector<256x4xbf16>, vector<4x8xbf16>, vector<256x8xf32> -> vector<256x8xf32>
    %74 = arith.addf %69, %73 : vector<256x8xf32>
    %75 = vector.extract_strided_slice %34 {offsets = [32, 0], sizes = [256, 4], strides = [1, 1]} : vector<288x4xbf16> to vector<256x4xbf16>
    %c2_45 = arith.constant 2 : index
    %c1_46 = arith.constant 1 : index
    %c0_47 = arith.constant 0 : index
    %c0_48 = arith.constant 0 : index
    %76 = vector.load %arg2[%c2_45, %c1_46, %c0_47, %c0_48] : memref<3x3x4x8xbf16, #tpu.memory_space<vmem>>, vector<1x1x4x8xbf16>
    %77 = vector.shape_cast %76 : vector<1x1x4x8xbf16> to vector<4x8xbf16>
    %cst_49 = arith.constant dense<0.000000e+00> : vector<256x8xf32>
    %78 = tpu.matmul %75, %77, %cst_49 {dimension_numbers = #tpu.dot_dimension_numbers<[1], [0], [0], [1], [0, 0, 1, 1], [], []>} : vector<256x4xbf16>, vector<4x8xbf16>, vector<256x8xf32> -> vector<256x8xf32>
    %79 = arith.addf %74, %78 : vector<256x8xf32>
    %80 = vector.extract_strided_slice %36 {offsets = [32, 0], sizes = [256, 4], strides = [1, 1]} : vector<288x4xbf16> to vector<256x4xbf16>
    %c2_50 = arith.constant 2 : index
    %c2_51 = arith.constant 2 : index
    %c0_52 = arith.constant 0 : index
    %c0_53 = arith.constant 0 : index
    %81 = vector.load %arg2[%c2_50, %c2_51, %c0_52, %c0_53] : memref<3x3x4x8xbf16, #tpu.memory_space<vmem>>, vector<1x1x4x8xbf16>
    %82 = vector.shape_cast %81 : vector<1x1x4x8xbf16> to vector<4x8xbf16>
    %cst_54 = arith.constant dense<0.000000e+00> : vector<256x8xf32>
    %83 = tpu.matmul %80, %82, %cst_54 {dimension_numbers = #tpu.dot_dimension_numbers<[1], [0], [0], [1], [0, 0, 1, 1], [], []>} : vector<256x4xbf16>, vector<4x8xbf16>, vector<256x8xf32> -> vector<256x8xf32>
    %84 = arith.addf %79, %83 : vector<256x8xf32>
    %cst_55 = arith.constant 0.000000e+00 : f32
    %85 = vector.broadcast %cst_55 : f32 to vector<256x8xf32>
    %86 = arith.maximumf %84, %85 : vector<256x8xf32>
    %87 = tpu.iota {dimensions = array<i32: 0>} : vector<256x8xi32>
    %c16_i32_56 = arith.constant 16 : i32
    %c0_i32_57 = arith.constant 0 : i32
    %88 = arith.cmpi eq, %c16_i32_56, %c0_i32_57 : i32
    %c1_i32_58 = arith.constant 1 : i32
    %89 = arith.select %88, %c1_i32_58, %c16_i32_56 : i32
    %90 = vector.broadcast %89 : i32 to vector<256x8xi32>
    %91 = arith.remsi %87, %90 : vector<256x8xi32>
    %c0_i32_59 = arith.constant 0 : i32
    %92 = vector.broadcast %c0_i32_59 : i32 to vector<256x8xi32>
    %93 = arith.cmpi ne, %91, %92 : vector<256x8xi32>
    %c0_i32_60 = arith.constant 0 : i32
    %94 = vector.broadcast %c0_i32_60 : i32 to vector<256x8xi32>
    %95 = arith.cmpi slt, %91, %94 : vector<256x8xi32>
    %c0_i32_61 = arith.constant 0 : i32
    %96 = arith.cmpi slt, %89, %c0_i32_61 : i32
    %97 = vector.broadcast %96 : i1 to vector<256x8xi1>
    %98 = vector.broadcast %97 : vector<256x8xi1> to vector<256x8xi1>
    %99 = arith.xori %95, %98 : vector<256x8xi1>
    %100 = arith.andi %99, %93 : vector<256x8xi1>
    %101 = vector.broadcast %89 : i32 to vector<256x8xi32>
    %102 = arith.addi %91, %101 : vector<256x8xi32>
    %103 = arith.select %100, %102, %91 : vector<256x8xi1>, vector<256x8xi32>
    %c0_i32_62 = arith.constant 0 : i32
    %104 = vector.broadcast %c0_i32_62 : i32 to vector<256x8xi32>
    %105 = arith.cmpi eq, %103, %104 : vector<256x8xi32>
    %c1_i32_63 = arith.constant 1 : i32
    %106 = tpu.dynamic_rotate %86 by %c1_i32_63 dim 0 : vector<256x8xf32>, i32 -> vector<256x8xf32>
    %cst_64 = arith.constant 0.000000e+00 : f32
    %107 = vector.broadcast %cst_64 : f32 to vector<256x8xf32>
    %108 = arith.select %105, %107, %106 : vector<256x8xi1>, vector<256x8xf32>
    %c15_i32_65 = arith.constant 15 : i32
    %109 = vector.broadcast %c15_i32_65 : i32 to vector<256x8xi32>
    %110 = arith.cmpi eq, %103, %109 : vector<256x8xi32>
    %c255_i32_66 = arith.constant 255 : i32
    %111 = tpu.dynamic_rotate %86 by %c255_i32_66 dim 0 : vector<256x8xf32>, i32 -> vector<256x8xf32>
    %cst_67 = arith.constant 0.000000e+00 : f32
    %112 = vector.broadcast %cst_67 : f32 to vector<256x8xf32>
    %113 = arith.select %110, %112, %111 : vector<256x8xi1>, vector<256x8xf32>
    %cst_68 = arith.constant 0.000000e+00 : bf16
    %114 = vector.broadcast %cst_68 : bf16 to vector<16x8xbf16>
    %115 = arith.truncf %108 : vector<256x8xf32> to vector<256x8xbf16>
    %116 = tpu.concatenate %114, %115, %114 in 0 : vector<16x8xbf16>, vector<256x8xbf16>, vector<16x8xbf16> -> vector<288x8xbf16>
    %117 = arith.truncf %86 : vector<256x8xf32> to vector<256x8xbf16>
    %118 = tpu.concatenate %114, %117, %114 in 0 : vector<16x8xbf16>, vector<256x8xbf16>, vector<16x8xbf16> -> vector<288x8xbf16>
    %119 = arith.truncf %113 : vector<256x8xf32> to vector<256x8xbf16>
    %120 = tpu.concatenate %114, %119, %114 in 0 : vector<16x8xbf16>, vector<256x8xbf16>, vector<16x8xbf16> -> vector<288x8xbf16>
    %c0_69 = arith.constant 0 : index
    %c0_70 = arith.constant 0 : index
    %121 = vector.load %arg5[%c0_69, %c0_70] : memref<1x4xf32, #tpu.memory_space<vmem>>, vector<1x4xf32>
    %122 = vector.shape_cast %121 : vector<1x4xf32> to vector<1x4xf32>
    %123 = vector.broadcast %122 : vector<1x4xf32> to vector<256x4xf32>
    %124 = vector.extract_strided_slice %116 {offsets = [0, 0], sizes = [256, 8], strides = [1, 1]} : vector<288x8xbf16> to vector<256x8xbf16>
    %c0_71 = arith.constant 0 : index
    %c0_72 = arith.constant 0 : index
    %c0_73 = arith.constant 0 : index
    %c0_74 = arith.constant 0 : index
    %125 = vector.load %arg4[%c0_71, %c0_72, %c0_73, %c0_74] : memref<3x3x8x4xbf16, #tpu.memory_space<vmem>>, vector<1x1x8x4xbf16>
    %126 = vector.shape_cast %125 : vector<1x1x8x4xbf16> to vector<8x4xbf16>
    %cst_75 = arith.constant dense<0.000000e+00> : vector<256x4xf32>
    %127 = tpu.matmul %124, %126, %cst_75 {dimension_numbers = #tpu.dot_dimension_numbers<[1], [0], [0], [1], [0, 0, 1, 1], [], []>} : vector<256x8xbf16>, vector<8x4xbf16>, vector<256x4xf32> -> vector<256x4xf32>
    %128 = arith.addf %123, %127 : vector<256x4xf32>
    %129 = vector.extract_strided_slice %118 {offsets = [0, 0], sizes = [256, 8], strides = [1, 1]} : vector<288x8xbf16> to vector<256x8xbf16>
    %c0_76 = arith.constant 0 : index
    %c1_77 = arith.constant 1 : index
    %c0_78 = arith.constant 0 : index
    %c0_79 = arith.constant 0 : index
    %130 = vector.load %arg4[%c0_76, %c1_77, %c0_78, %c0_79] : memref<3x3x8x4xbf16, #tpu.memory_space<vmem>>, vector<1x1x8x4xbf16>
    %131 = vector.shape_cast %130 : vector<1x1x8x4xbf16> to vector<8x4xbf16>
    %cst_80 = arith.constant dense<0.000000e+00> : vector<256x4xf32>
    %132 = tpu.matmul %129, %131, %cst_80 {dimension_numbers = #tpu.dot_dimension_numbers<[1], [0], [0], [1], [0, 0, 1, 1], [], []>} : vector<256x8xbf16>, vector<8x4xbf16>, vector<256x4xf32> -> vector<256x4xf32>
    %133 = arith.addf %128, %132 : vector<256x4xf32>
    %134 = vector.extract_strided_slice %120 {offsets = [0, 0], sizes = [256, 8], strides = [1, 1]} : vector<288x8xbf16> to vector<256x8xbf16>
    %c0_81 = arith.constant 0 : index
    %c2_82 = arith.constant 2 : index
    %c0_83 = arith.constant 0 : index
    %c0_84 = arith.constant 0 : index
    %135 = vector.load %arg4[%c0_81, %c2_82, %c0_83, %c0_84] : memref<3x3x8x4xbf16, #tpu.memory_space<vmem>>, vector<1x1x8x4xbf16>
    %136 = vector.shape_cast %135 : vector<1x1x8x4xbf16> to vector<8x4xbf16>
    %cst_85 = arith.constant dense<0.000000e+00> : vector<256x4xf32>
    %137 = tpu.matmul %134, %136, %cst_85 {dimension_numbers = #tpu.dot_dimension_numbers<[1], [0], [0], [1], [0, 0, 1, 1], [], []>} : vector<256x8xbf16>, vector<8x4xbf16>, vector<256x4xf32> -> vector<256x4xf32>
    %138 = arith.addf %133, %137 : vector<256x4xf32>
    %139 = vector.extract_strided_slice %116 {offsets = [16, 0], sizes = [256, 8], strides = [1, 1]} : vector<288x8xbf16> to vector<256x8xbf16>
    %c1_86 = arith.constant 1 : index
    %c0_87 = arith.constant 0 : index
    %c0_88 = arith.constant 0 : index
    %c0_89 = arith.constant 0 : index
    %140 = vector.load %arg4[%c1_86, %c0_87, %c0_88, %c0_89] : memref<3x3x8x4xbf16, #tpu.memory_space<vmem>>, vector<1x1x8x4xbf16>
    %141 = vector.shape_cast %140 : vector<1x1x8x4xbf16> to vector<8x4xbf16>
    %cst_90 = arith.constant dense<0.000000e+00> : vector<256x4xf32>
    %142 = tpu.matmul %139, %141, %cst_90 {dimension_numbers = #tpu.dot_dimension_numbers<[1], [0], [0], [1], [0, 0, 1, 1], [], []>} : vector<256x8xbf16>, vector<8x4xbf16>, vector<256x4xf32> -> vector<256x4xf32>
    %143 = arith.addf %138, %142 : vector<256x4xf32>
    %144 = vector.extract_strided_slice %118 {offsets = [16, 0], sizes = [256, 8], strides = [1, 1]} : vector<288x8xbf16> to vector<256x8xbf16>
    %c1_91 = arith.constant 1 : index
    %c1_92 = arith.constant 1 : index
    %c0_93 = arith.constant 0 : index
    %c0_94 = arith.constant 0 : index
    %145 = vector.load %arg4[%c1_91, %c1_92, %c0_93, %c0_94] : memref<3x3x8x4xbf16, #tpu.memory_space<vmem>>, vector<1x1x8x4xbf16>
    %146 = vector.shape_cast %145 : vector<1x1x8x4xbf16> to vector<8x4xbf16>
    %cst_95 = arith.constant dense<0.000000e+00> : vector<256x4xf32>
    %147 = tpu.matmul %144, %146, %cst_95 {dimension_numbers = #tpu.dot_dimension_numbers<[1], [0], [0], [1], [0, 0, 1, 1], [], []>} : vector<256x8xbf16>, vector<8x4xbf16>, vector<256x4xf32> -> vector<256x4xf32>
    %148 = arith.addf %143, %147 : vector<256x4xf32>
    %149 = vector.extract_strided_slice %120 {offsets = [16, 0], sizes = [256, 8], strides = [1, 1]} : vector<288x8xbf16> to vector<256x8xbf16>
    %c1_96 = arith.constant 1 : index
    %c2_97 = arith.constant 2 : index
    %c0_98 = arith.constant 0 : index
    %c0_99 = arith.constant 0 : index
    %150 = vector.load %arg4[%c1_96, %c2_97, %c0_98, %c0_99] : memref<3x3x8x4xbf16, #tpu.memory_space<vmem>>, vector<1x1x8x4xbf16>
    %151 = vector.shape_cast %150 : vector<1x1x8x4xbf16> to vector<8x4xbf16>
    %cst_100 = arith.constant dense<0.000000e+00> : vector<256x4xf32>
    %152 = tpu.matmul %149, %151, %cst_100 {dimension_numbers = #tpu.dot_dimension_numbers<[1], [0], [0], [1], [0, 0, 1, 1], [], []>} : vector<256x8xbf16>, vector<8x4xbf16>, vector<256x4xf32> -> vector<256x4xf32>
    %153 = arith.addf %148, %152 : vector<256x4xf32>
    %154 = vector.extract_strided_slice %116 {offsets = [32, 0], sizes = [256, 8], strides = [1, 1]} : vector<288x8xbf16> to vector<256x8xbf16>
    %c2_101 = arith.constant 2 : index
    %c0_102 = arith.constant 0 : index
    %c0_103 = arith.constant 0 : index
    %c0_104 = arith.constant 0 : index
    %155 = vector.load %arg4[%c2_101, %c0_102, %c0_103, %c0_104] : memref<3x3x8x4xbf16, #tpu.memory_space<vmem>>, vector<1x1x8x4xbf16>
    %156 = vector.shape_cast %155 : vector<1x1x8x4xbf16> to vector<8x4xbf16>
    %cst_105 = arith.constant dense<0.000000e+00> : vector<256x4xf32>
    %157 = tpu.matmul %154, %156, %cst_105 {dimension_numbers = #tpu.dot_dimension_numbers<[1], [0], [0], [1], [0, 0, 1, 1], [], []>} : vector<256x8xbf16>, vector<8x4xbf16>, vector<256x4xf32> -> vector<256x4xf32>
    %158 = arith.addf %153, %157 : vector<256x4xf32>
    %159 = vector.extract_strided_slice %118 {offsets = [32, 0], sizes = [256, 8], strides = [1, 1]} : vector<288x8xbf16> to vector<256x8xbf16>
    %c2_106 = arith.constant 2 : index
    %c1_107 = arith.constant 1 : index
    %c0_108 = arith.constant 0 : index
    %c0_109 = arith.constant 0 : index
    %160 = vector.load %arg4[%c2_106, %c1_107, %c0_108, %c0_109] : memref<3x3x8x4xbf16, #tpu.memory_space<vmem>>, vector<1x1x8x4xbf16>
    %161 = vector.shape_cast %160 : vector<1x1x8x4xbf16> to vector<8x4xbf16>
    %cst_110 = arith.constant dense<0.000000e+00> : vector<256x4xf32>
    %162 = tpu.matmul %159, %161, %cst_110 {dimension_numbers = #tpu.dot_dimension_numbers<[1], [0], [0], [1], [0, 0, 1, 1], [], []>} : vector<256x8xbf16>, vector<8x4xbf16>, vector<256x4xf32> -> vector<256x4xf32>
    %163 = arith.addf %158, %162 : vector<256x4xf32>
    %164 = vector.extract_strided_slice %120 {offsets = [32, 0], sizes = [256, 8], strides = [1, 1]} : vector<288x8xbf16> to vector<256x8xbf16>
    %c2_111 = arith.constant 2 : index
    %c2_112 = arith.constant 2 : index
    %c0_113 = arith.constant 0 : index
    %c0_114 = arith.constant 0 : index
    %165 = vector.load %arg4[%c2_111, %c2_112, %c0_113, %c0_114] : memref<3x3x8x4xbf16, #tpu.memory_space<vmem>>, vector<1x1x8x4xbf16>
    %166 = vector.shape_cast %165 : vector<1x1x8x4xbf16> to vector<8x4xbf16>
    %cst_115 = arith.constant dense<0.000000e+00> : vector<256x4xf32>
    %167 = tpu.matmul %164, %166, %cst_115 {dimension_numbers = #tpu.dot_dimension_numbers<[1], [0], [0], [1], [0, 0, 1, 1], [], []>} : vector<256x8xbf16>, vector<8x4xbf16>, vector<256x4xf32> -> vector<256x4xf32>
    %168 = arith.addf %163, %167 : vector<256x4xf32>
    %cst_116 = arith.constant 1.000000e+00 : f32
    %169 = vector.broadcast %cst_116 : f32 to vector<256x4xf32>
    %170 = arith.mulf %168, %169 : vector<256x4xf32>
    %171 = arith.addf %2, %170 : vector<256x4xf32>
    %172 = vector.shape_cast %171 : vector<256x4xf32> to vector<16x16x4xf32>
    %c0_117 = arith.constant 0 : index
    %c0_118 = arith.constant 0 : index
    %c0_119 = arith.constant 0 : index
    %c0_120 = arith.constant 0 : index
    %173 = vector.load %arg6[%c0_117, %c0_118, %c0_119, %c0_120] : memref<1x16x16x4xf32, #tpu.memory_space<vmem>>, vector<1x16x16x4xf32>
    %174 = vector.shape_cast %173 : vector<1x16x16x4xf32> to vector<16x16x4xf32>
    %175 = vector.shape_cast %172 : vector<16x16x4xf32> to vector<1x16x16x4xf32>
    tpu.vector_store %arg6[%c0_117, %c0_118, %c0_119, %c0_120], %175 {strides = array<i32>} : memref<1x16x16x4xf32, #tpu.memory_space<vmem>>, vector<1x16x16x4xf32>,
    return
  }
  func.func @transform_0(%arg0: i32) -> (i32, i32, i32, i32) {
    %c0_i32 = arith.constant 0 : i32
    %c0_i32_0 = arith.constant 0 : i32
    %c0_i32_1 = arith.constant 0 : i32
    %c0_i32_2 = arith.constant 0 : i32
    return %arg0, %c0_i32, %c0_i32_0, %c0_i32_1 : i32, i32, i32, i32
  }
  func.func @transform_1(%arg0: i32) -> (i32, i32, i32, i32) {
    %c0_i32 = arith.constant 0 : i32
    %c0_i32_0 = arith.constant 0 : i32
    %c0_i32_1 = arith.constant 0 : i32
    %c0_i32_2 = arith.constant 0 : i32
    %c0_i32_3 = arith.constant 0 : i32
    return %c0_i32, %c0_i32_0, %c0_i32_1, %c0_i32_2 : i32, i32, i32, i32
  }
  func.func @transform_2(%arg0: i32) -> (i32, i32) {
    %c0_i32 = arith.constant 0 : i32
    %c0_i32_0 = arith.constant 0 : i32
    %c0_i32_1 = arith.constant 0 : i32
    return %c0_i32, %c0_i32_0 : i32, i32
  }
  func.func @transform_3(%arg0: i32) -> (i32, i32, i32, i32) {
    %c0_i32 = arith.constant 0 : i32
    %c0_i32_0 = arith.constant 0 : i32
    %c0_i32_1 = arith.constant 0 : i32
    %c0_i32_2 = arith.constant 0 : i32
    %c0_i32_3 = arith.constant 0 : i32
    return %c0_i32, %c0_i32_0, %c0_i32_1, %c0_i32_2 : i32, i32, i32, i32
  }
  func.func @transform_4(%arg0: i32) -> (i32, i32) {
    %c0_i32 = arith.constant 0 : i32
    %c0_i32_0 = arith.constant 0 : i32
    %c0_i32_1 = arith.constant 0 : i32
    return %c0_i32, %c0_i32_0 : i32, i32
  }
  func.func @transform_5(%arg0: i32) -> (i32, i32, i32, i32) {
    %c0_i32 = arith.constant 0 : i32
    %c0_i32_0 = arith.constant 0 : i32
    %c0_i32_1 = arith.constant 0 : i32
    %c0_i32_2 = arith.constant 0 : i32
    return %arg0, %c0_i32, %c0_i32_0, %c0_i32_1 : i32, i32, i32, i32
  }
}

</mosaic_0001>

<bundles_post_ra>
// kernel: tpu_custom_call.1
= control target key start
LH: loop header
LB: loop body
LE: loop exit
PB: predicated region body
PF: predicated region fallthrough
CT: control target
= control target key end

     0   :  { %s4917_s18 = smov 0   ;;  %s7369_s0 = inlined_call_operand.vmem [shape: f32[2,16,16,4], index: 0, kind: input, shape index: {}]   ;;  %s7370_s1 = inlined_call_operand.vmem [shape: bf16[3,3,4,8], index: 1, kind: input, shape index: {}]   ;;  %s7371_s2 = inlined_call_operand.vmem [shape: f32[1,8], index: 2, kind: input, shape index: {}]   ;;  %s7372_s3 = inlined_call_operand.vmem [shape: bf16[3,3,8,4], index: 3, kind: input, shape index: {}]   ;;  %s7373_s4 = inlined_call_operand.vmem [shape: f32[1,4], index: 4, kind: input, shape index: {}]   ;;  %s7374_s5 = inlined_call_operand.vmem [shape: f32[2,16,16,4], index: 5, kind: output, shape index: {}]  }
   0x1 LB: > { %s4519_s19 = sadd.s32 4294967295, %s4884_s18   ;;  %p4523_p0 = scmp.ge.s32.totalorder %s4884_s18, 1  ;;  %s4884_s18 = sphi %s4917_s18, %s15_s18  }
   0x2   : > { %p187_p1 = scmp.lt.s32.totalorder %s4884_s18, 3 }
   0x4   : > { %p188_p2 = pnand %p4523_p0, %p187_p1 }
   0x6   : > { %191 = sbr.rel (%p188_p2) target bundleno = 1685 (0x695), region = 40 }
   0xb   : > { %vm7395_vm0 = vcmask 1041408   ;;  %v4543_v0 = vld [vmem:[%s7370_s1 + $0x2] sm:$0x3]  ;;  %p215_p3 = scmp.lt.s32.totalorder %s4519_s19, 1  ;;  %v258_v1 = vlaneseq  ;;  %v1273_v3 = vld [vmem:[%s7370_s1] sm:$0x3] }
   0xc   : > { %v1496_v2 = vsel %vm7395_vm0, %v4543_v0, 0  ;;  %v4559_v4 = vld [vmem:[%s7370_s1 + $0x4] sm:$0x3]  ;;  %v1325_v5 = vsel %vm7395_vm0, %v1273_v3, 0  ;;  %v4575_v8 = vld [vmem:[%s7370_s1 + $0x6] sm:$0x3] }
   0xd   : > { %4825 = vmatpush.bf16.msra.mxu3 %v1496_v2  ;;  %s8106_s19 = smov (!%p215_p3, %s4519_s19), 1  ;;  %v4938_v6 = vshrl.u32 %v258_v1, 7  ;;  %v1667_v7 = vsel %vm7395_vm0, %v4559_v4, 0  ;;  %1505 = vmatpush.bf16.msra.mxu1 %v1496_v2  ;;  %v1796_v9 = vsel %vm7395_vm0, %v4575_v8, 0  ;;  %v4592_v10 = vld [vmem:[%s7370_s1 + $0x8] sm:$0x3] }
   0xe   : > { %4824 = vmatpush.bf16.msra.mxu2 %v1325_v5  ;;  %1334 = vmatpush.bf16.msra.mxu0 %v1325_v5  ;;  %s4822_s30 = sshll.u32 %s8106_s19, 8  ;;  %v1925_v12 = vsel %vm7395_vm0, %v4592_v10, 0  ;;  %v7376_v13 = vmov 0   ;;  %v7524_v21 = vmov 0  ;;  %vm7403_vm3 = vcmask 31744  }
   0xf   : > { %v273_v11 = vadd.s32 112, %v4938_v6  ;;  %s4956_s8 = scalar_lea.vmem %s7369_s0, %s4822_s30  ;;  %vm7398_vm1 = vcmp.lt.s32.totalorder %v4938_v6, 1  ;;  %v275_v20 = vadd.s32 128, %v4938_v6  ;;  %v295_v36 = vand.u32 15, %v4938_v6  ;;  %s7222_s22 = scalar_lea.vmem %s7374_s5, %s4822_s30 }
  0x10   : > { %1506 = vmatmul.bf16.vlgmr.msra.gmra.mxu1 %v7376_v13  ;;  %v240_v14 = vld [vmem:[%s4956_s8 + $0x70] sm:$0xff]  ;;  %v241_v15 = vld [vmem:[%s4956_s8 + $0x78] sm:$0xff]  ;;  %v4962_v16 = vld [vmem:[%s4956_s8 + $0x68] sm:$0xff]  ;;  %v7529_v48 = vmov 0  ;;  %v7533_v52 = vmov 0  ;;  %v261_v10 = vadd.s32 16, %v4938_v6 }
  0x11   : > { %1805 = vmatpush.bf16.msrb.mxu3 %v1796_v9  ;;  %v393_v17 = vand.u32 15, %v273_v11  ;;  %1335 = vmatmul.bf16.vlgmr.msra.gmra.mxu0 %v7376_v13  ;;  %v1059_v18 = vpack.c.bf16 %v240_v14, %v240_v14  ;;  %v1060_v19 = vpack.c.bf16 %v241_v15, %v241_v15  ;;  %v7378_v22 = vrot.slane %v4962_v16, 7  ;;  %v242_v27 = vld [vmem:[%s4956_s8 + $0x80] sm:$0xff]  ;;  %v4987_v34 = vld [vmem:[%s4956_s8 + $0x88] sm:$0xff]  ;;  %v4994_v40 = vld [vmem:[%s4956_s8 + $0xf8] sm:$0xff] }
  0x12   : > { %1676 = vmatpush.bf16.msrb.mxu2 %v1667_v7  ;;  %1934 = vmatpush.bf16.msrb.mxu0 %v1925_v12  ;;  %v721_v23 = vrot.slane %v240_v14, 7  ;;  %v722_v24 = vrot.slane %v241_v15, 7  ;;  %v4980_v30 = vld [vmem:[%s4956_s8] sm:$0xff]  ;;  %v4990_v35 = vld [vmem:[%s4956_s8 + $0x8] sm:$0xff]  ;;  %v407_v38 = vand.u32 15, %v275_v20  ;;  %v723_v39 = vrot.slane %v242_v27, 7 }
  0x13   : > { %vm4967_vm2 = vcmp.eq.s32.totalorder %v393_v17, 0  ;;  %v1123_v25 = vunpack.c.l.b16 %v1059_v18  ;;  %v1124_v26 = vunpack.c.l.b16 %v1060_v19  ;;  %7528 = vst [vmem:[#allocation4_spill] sm:$0xff] %v4994_v40  ;;  %v707_v42 = vrot.slane %v4980_v30, 7  ;;  %v5035_v1 = vld [vmem:[%s4956_s8 + $0x10] sm:$0xff]  ;;  %v5040_v9 = vld [vmem:[%s4956_s8 + $0x18] sm:$0xff] }
  0x14   : > { %v7525_v21 = vsel %vm4967_vm2, 4294967295, %v7524_v21  ;;  %v756_v28 = vsel %vm7398_vm1, %v721_v23, %v722_v24  ;;  %v757_v29 = vsel %vm7398_vm1, %v7378_v22, %v721_v23  ;;  %v1061_v44 = vpack.c.bf16 %v242_v27, %v242_v27  ;;  %v244_v18 = vld [vmem:[%s4956_s8 + $0x90] sm:$0xff] }
  0x15   : > { %7526 = vst [vmem:[#allocation2_spill] sm:$0xff] %v7525_v21  ;;  %v4982_v31 = vpack.c.b16 %v1124_v26, %v1123_v25  ;;  %v786_v32 = vsel %vm4967_vm2, 0.0, %v757_v29  ;;  %v948_v33 = vpack.c.bf16 %v756_v28, %v756_v28  ;;  %v724_v45 = vrot.slane %v4987_v34, 7  ;;  %v245_v26 = vld [vmem:[%s4956_s8 + $0x98] sm:$0xff] }
  0x16   : > { %v947_v37 = vpack.c.bf16 %v786_v32, %v786_v32  ;;  %v708_v46 = vrot.slane %v4990_v35, 7  ;;  %v1062_v47 = vpack.c.bf16 %v4987_v34, %v4987_v34  ;;  %vm5003_vm4 = vcmp.eq.s32.totalorder %v295_v36, 0 }
  0x17   : > { %7527 = vst [vmem:[#allocation3_spill] sm:$0xff] %v4982_v31  ;;  %4551 = vmatmul.msk.bf16.vlgmr.msra.gmra.mxu3 %vm7403_vm3, %v4982_v31  ;;  %v1012_v41 = vunpack.c.l.b16 %v948_v33  ;;  %v7530_v48 = vsel %vm5003_vm4, 4294967295, %v7529_v48  ;;  %v7375_v49 = vrot.slane %v4994_v40, 7  ;;  %v1045_v50 = vpack.c.bf16 %v4980_v30, %v4980_v30 }
  0x18   : > { %v1011_v43 = vunpack.c.l.b16 %v947_v37  ;;  %7531 = vst [vmem:[#allocation5_spill] sm:$0xff] %v7530_v48  ;;  %vm5012_vm5 = vcmp.eq.s32.totalorder %v407_v38, 0  ;;  %v755_v53 = vsel %vm7398_vm1, %v722_v24, %v723_v39  ;;  %v770_v54 = vsel %vm7398_vm1, %v707_v42, %v708_v46  ;;  %v5259_v48 = vld [vmem:[%s4956_s8 + $0x50] sm:$0xff] }
  0x19   : > { %v7534_v52 = vsel %vm5012_vm5, 4294967295, %v7533_v52  ;;  %v771_v55 = vsel %vm7398_vm1, %v7375_v49, %v707_v42  ;;  %v934_v56 = vpack.c.bf16 %v770_v54, %v770_v54  ;;  %v1046_v57 = vpack.c.bf16 %v4990_v35, %v4990_v35 }
  0x1a   : > { %v5010_v51 = vpack.c.b16 %v1012_v41, %v1011_v43  ;;  %7535 = vst [vmem:[#allocation7_spill] sm:$0xff] %v7534_v52  ;;  %v1109_v58 = vunpack.c.l.b16 %v1045_v50  ;;  %v754_v59 = vsel %vm7398_vm1, %v723_v39, %v724_v45  ;;  %v772_v60 = vsel %vm5003_vm4, 0.0, %v771_v55 }
  0x1b   : > { %v788_v61 = vsel %vm5012_vm5, 0.0, %v755_v53  ;;  %v933_v62 = vpack.c.bf16 %v772_v60, %v772_v60  ;;  %v998_v63 = vunpack.c.l.b16 %v934_v56  ;;  %v1110_v0 = vunpack.c.l.b16 %v1046_v57 }
  0x1c   : > { %7532 = vst [vmem:[#allocation6_spill] sm:$0xff] %v5010_v51  ;;  %4535 = vmatmul.msk.bf16.vlgmr.msra.gmra.mxu2 %vm7403_vm3, %v5010_v51  ;;  %v1125_v2 = vunpack.c.l.b16 %v1061_v44  ;;  %v1126_v3 = vunpack.c.l.b16 %v1062_v47  ;;  %v949_v7 = vpack.c.bf16 %v788_v61, %v788_v61  ;;  %v950_v8 = vpack.c.bf16 %v754_v59, %v754_v59 }
  0x1d   : > { %v997_v4 = vunpack.c.l.b16 %v933_v62  ;;  %v5037_v5 = vpack.c.b16 %v1110_v0, %v1109_v58  ;;  %v709_v12 = vrot.slane %v5035_v1, 7  ;;  %v277_v14 = vadd.s32 144, %v4938_v6 }
  0x1e   : > { %v309_v15 = vand.u32 15, %v261_v10  ;;  %v5049_v17 = vpack.c.b16 %v1126_v3, %v1125_v2  ;;  %v710_v19 = vrot.slane %v5040_v9, 7  ;;  %v1013_v23 = vunpack.c.l.b16 %v949_v7 }
  0x1f   : > { %v5043_v11 = vpack.c.b16 %v998_v63, %v997_v4  ;;  %v769_v20 = vsel %vm7398_vm1, %v708_v46, %v709_v12  ;;  %v1014_v24 = vunpack.c.l.b16 %v950_v8  ;;  %v7537_v25 = vmov 0  ;;  %v5081_v46 = vld [vmem:[%s4956_s8 + $0x20] sm:$0xff] }
  0x20   : > { %4544 = vmatmul.msk.bf16.gmra.mxu1 %vm7403_vm3, %v5037_v5  ;;  %7536 = vst [vmem:[#allocation8_spill] sm:$0xff] %v5049_v17  ;;  %vm5057_vm6 = vcmp.eq.s32.totalorder %v309_v15, 0  ;;  %v768_v27 = vsel %vm7398_vm1, %v709_v12, %v710_v19  ;;  %v1047_v29 = vpack.c.bf16 %v5035_v1, %v5035_v1  ;;  %v1048_v32 = vpack.c.bf16 %v5040_v9, %v5040_v9  ;;  %v5113_v12 = vld [vmem:[%s4956_s8 + $0xa0] sm:$0xff] }
  0x21   : > { %4528 = vmatmul.msk.bf16.gmra.mxu0 %vm7403_vm3, %v5043_v11  ;;  %v7538_v25 = vsel %vm5057_vm6, 4294967295, %v7537_v25  ;;  %v774_v28 = vsel %vm5057_vm6, 0.0, %v769_v20  ;;  %v421_v33 = vand.u32 15, %v277_v14  ;;  %v725_v34 = vrot.slane %v244_v18, 7 }
  0x22   : > { %7539 = vst [vmem:[#allocation9_spill] sm:$0xff] %v7538_v25  ;;  %v935_v36 = vpack.c.bf16 %v774_v28, %v774_v28  ;;  %v936_v37 = vpack.c.bf16 %v768_v27, %v768_v27  ;;  %v5072_v38 = vpack.c.b16 %v1014_v24, %v1013_v23  ;;  %v726_v39 = vrot.slane %v245_v26, 7  ;;  %v247_v23 = vld [vmem:[%s4956_s8 + $0xa8] sm:$0xff] }
  0x23   : > { %v1111_v41 = vunpack.c.l.b16 %v1047_v29  ;;  %v1112_v42 = vunpack.c.l.b16 %v1048_v32  ;;  %vm5074_vm7 = vcmp.eq.s32.totalorder %v421_v33, 0  ;;  %v7541_v43 = vmov 0 }
  0x24   : > { %7540 = vst [vmem:[#allocation10_spill] sm:$0xff] %v5072_v38  ;;  %v7542_v43 = vsel %vm5074_vm7, 4294967295, %v7541_v43  ;;  %v753_v44 = vsel %vm7398_vm1, %v724_v45, %v725_v34  ;;  %v263_v47 = vadd.s32 32, %v4938_v6  ;;  %v1063_v50 = vpack.c.bf16 %v244_v18, %v244_v18  ;;  %v5093_v45 = vld [vmem:[%s4956_s8 + $0x28] sm:$0xff] }
  0x25   : > { %7543 = vst [vmem:[#allocation11_spill] sm:$0xff] %v7542_v43  ;;  %v1064_v53 = vpack.c.bf16 %v245_v26, %v245_v26  ;;  %v999_v54 = vunpack.c.l.b16 %v935_v36  ;;  %v1000_v55 = vunpack.c.l.b16 %v936_v37  ;;  %v752_v56 = vsel %vm7398_vm1, %v725_v34, %v726_v39 }
  0x26   : > { %v790_v57 = vsel %vm5074_vm7, 0.0, %v753_v44  ;;  %v5090_v58 = vpack.c.b16 %v1112_v42, %v1111_v41  ;;  %v323_v59 = vand.u32 15, %v263_v47  ;;  %v711_v60 = vrot.slane %v5081_v46, 7  ;;  %v5137_v44 = vld [vmem:[%s4956_s8 + $0x30] sm:$0xff] }
  0x27   : > { %4552 = vmatmul.msk.bf16.gmra.mxu3 %vm7403_vm3, %v5049_v17  ;;  %v1127_v61 = vunpack.c.l.b16 %v1063_v50  ;;  %v1128_v62 = vunpack.c.l.b16 %v1064_v53  ;;  %v5096_v63 = vpack.c.b16 %v1000_v55, %v999_v54  ;;  %v951_v0 = vpack.c.bf16 %v790_v57, %v790_v57 }
  0x28   : > { %v952_v2 = vpack.c.bf16 %v752_v56, %v752_v56  ;;  %v712_v3 = vrot.slane %v5093_v45, 7  ;;  %vm5101_vm8 = vcmp.eq.s32.totalorder %v323_v59, 0  ;;  %v7544_v4 = vmov 0 }
  0x29   : > { %v7545_v4 = vsel %vm5101_vm8, 4294967295, %v7544_v4  ;;  %v767_v7 = vsel %vm7398_vm1, %v710_v19, %v711_v60  ;;  %v279_v8 = vadd.s32 160, %v4938_v6  ;;  %v5108_v10 = vpack.c.b16 %v1128_v62, %v1127_v61 }
  0x2a   : > { %7546 = vst [vmem:[#allocation12_spill] sm:$0xff] %v7545_v4  ;;  %v1015_v14 = vunpack.c.l.b16 %v951_v0  ;;  %v1016_v15 = vunpack.c.l.b16 %v952_v2  ;;  %v766_v18 = vsel %vm7398_vm1, %v711_v60, %v712_v3  ;;  %v776_v20 = vsel %vm5101_vm8, 0.0, %v767_v7  ;;  %v5321_v4 = vld [vmem:[%s4956_s8 + $0x60] sm:$0xff] }
  0x2b   : > { %v1049_v19 = vpack.c.bf16 %v5081_v46, %v5081_v46  ;;  %v1050_v24 = vpack.c.bf16 %v5093_v45, %v5093_v45  ;;  %v435_v26 = vand.u32 15, %v279_v8  ;;  %v727_v27 = vrot.slane %v5113_v12, 7 }
  0x2c   : > { %4536 = vmatmul.msk.bf16.gmra.mxu2 %vm7403_vm3, %v5072_v38  ;;  %v937_v28 = vpack.c.bf16 %v776_v20, %v776_v20  ;;  %v938_v29 = vpack.c.bf16 %v766_v18, %v766_v18  ;;  %v5127_v32 = vpack.c.b16 %v1016_v15, %v1015_v14  ;;  %v728_v33 = vrot.slane %v247_v23, 7 }
  0x2d   : > { %v1113_v34 = vunpack.c.l.b16 %v1049_v19  ;;  %v1114_v36 = vunpack.c.l.b16 %v1050_v24  ;;  %v265_v37 = vadd.s32 48, %v4938_v6  ;;  %vm5130_vm9 = vcmp.eq.s32.totalorder %v435_v26, 0 }
  0x2e   : > { %v7547_v41 = vmov 0  ;;  %v751_v42 = vsel %vm7398_vm1, %v726_v39, %v727_v27  ;;  %v1065_v47 = vpack.c.bf16 %v5113_v12, %v5113_v12  ;;  %v1066_v50 = vpack.c.bf16 %v247_v23, %v247_v23  ;;  %v5150_v39 = vld [vmem:[%s4956_s8 + $0x38] sm:$0xff]  ;;  %v5170_v23 = vld [vmem:[%s4956_s8 + $0xb0] sm:$0xff] }
  0x2f   : > { %v7548_v41 = vsel %vm5130_vm9, 4294967295, %v7547_v41  ;;  %v1001_v53 = vunpack.c.l.b16 %v937_v28  ;;  %v1002_v54 = vunpack.c.l.b16 %v938_v29  ;;  %v750_v55 = vsel %vm7398_vm1, %v727_v27, %v728_v33  ;;  %v5177_v28 = vld [vmem:[%s4956_s8 + $0xb8] sm:$0xff] }
  0x30   : > { %4545 = vmatmul.msk.bf16.gmra.mxu1 %vm7403_vm3, %v5090_v58  ;;  %7549 = vst [vmem:[#allocation13_spill] sm:$0xff] %v7548_v41  ;;  %v792_v56 = vsel %vm5130_vm9, 0.0, %v751_v42  ;;  %v5147_v57 = vpack.c.b16 %v1114_v36, %v1113_v34  ;;  %v337_v59 = vand.u32 15, %v265_v37  ;;  %v713_v60 = vrot.slane %v5137_v44, 7 }
  0x31   : > { %4529 = vmatmul.msk.bf16.gmra.mxu0 %vm7403_vm3, %v5096_v63  ;;  %v1129_v61 = vunpack.c.l.b16 %v1065_v47  ;;  %v1130_v62 = vunpack.c.l.b16 %v1066_v50  ;;  %v5153_v0 = vpack.c.b16 %v1002_v54, %v1001_v53  ;;  %v953_v2 = vpack.c.bf16 %v792_v56, %v792_v56 }
  0x32   : > { %v954_v7 = vpack.c.bf16 %v750_v55, %v750_v55  ;;  %v714_v8 = vrot.slane %v5150_v39, 7  ;;  %vm5158_vm10 = vcmp.eq.s32.totalorder %v337_v59, 0  ;;  %v7551_v14 = vmov 0 }
  0x33   : > { %7550 = vst [vmem:[#allocation14_spill] sm:$0xff] %v5153_v0  ;;  %v7552_v14 = vsel %vm5158_vm10, 4294967295, %v7551_v14  ;;  %v765_v15 = vsel %vm7398_vm1, %v712_v3, %v713_v60  ;;  %v281_v18 = vadd.s32 176, %v4938_v6  ;;  %v5165_v20 = vpack.c.b16 %v1130_v62, %v1129_v61 }
  0x34   : > { %7553 = vst [vmem:[#allocation15_spill] sm:$0xff] %v7552_v14  ;;  %v1017_v19 = vunpack.c.l.b16 %v953_v2  ;;  %v1018_v24 = vunpack.c.l.b16 %v954_v7  ;;  %v764_v26 = vsel %vm7398_vm1, %v713_v60, %v714_v8  ;;  %v778_v27 = vsel %vm5158_vm10, 0.0, %v765_v15  ;;  %v5197_v60 = vld [vmem:[%s4956_s8 + $0x40] sm:$0xff] }
  0x35   : > { %v1051_v3 = vpack.c.bf16 %v5137_v44, %v5137_v44  ;;  %v1052_v29 = vpack.c.bf16 %v5150_v39, %v5150_v39  ;;  %v449_v34 = vand.u32 15, %v281_v18  ;;  %v729_v36 = vrot.slane %v5170_v23, 7 }
  0x36   : > { %v939_v37 = vpack.c.bf16 %v778_v27, %v778_v27  ;;  %v940_v42 = vpack.c.bf16 %v764_v26, %v764_v26  ;;  %v5186_v47 = vpack.c.b16 %v1018_v24, %v1017_v19  ;;  %v730_v50 = vrot.slane %v5177_v28, 7  ;;  %v5212_v19 = vld [vmem:[%s4956_s8 + $0x48] sm:$0xff] }
  0x37   : > { %4553 = vmatmul.msk.bf16.gmra.mxu3 %vm7403_vm3, %v5108_v10  ;;  %v1115_v53 = vunpack.c.l.b16 %v1051_v3  ;;  %v1116_v54 = vunpack.c.l.b16 %v1052_v29  ;;  %v267_v55 = vadd.s32 64, %v4938_v6  ;;  %vm5190_vm11 = vcmp.eq.s32.totalorder %v449_v34, 0 }
  0x38   : > { %v7554_v56 = vmov 0  ;;  %v749_v59 = vsel %vm7398_vm1, %v728_v33, %v729_v36  ;;  %v1067_v61 = vpack.c.bf16 %v5170_v23, %v5170_v23  ;;  %v1068_v62 = vpack.c.bf16 %v5177_v28, %v5177_v28 }
  0x39   : > { %v7555_v56 = vsel %vm5190_vm11, 4294967295, %v7554_v56  ;;  %v1003_v2 = vunpack.c.l.b16 %v939_v37  ;;  %v1004_v7 = vunpack.c.l.b16 %v940_v42  ;;  %v748_v15 = vsel %vm7398_vm1, %v729_v36, %v730_v50 }
  0x3a   : > { %7556 = vst [vmem:[#allocation16_spill] sm:$0xff] %v7555_v56  ;;  %v794_v18 = vsel %vm5190_vm11, 0.0, %v749_v59  ;;  %v5209_v33 = vpack.c.b16 %v1116_v54, %v1115_v53  ;;  %v351_v24 = vand.u32 15, %v267_v55  ;;  %v715_v26 = vrot.slane %v5197_v60, 7  ;;  %v5232_v59 = vld [vmem:[%s4956_s8 + $0xc0] sm:$0xff] }
  0x3b   : > { %v1131_v27 = vunpack.c.l.b16 %v1067_v61  ;;  %v1132_v3 = vunpack.c.l.b16 %v1068_v62  ;;  %v5215_v29 = vpack.c.b16 %v1004_v7, %v1003_v2  ;;  %v955_v34 = vpack.c.bf16 %v794_v18, %v794_v18 }
  0x3c   : > { %4537 = vmatmul.msk.bf16.gmra.mxu2 %vm7403_vm3, %v5127_v32  ;;  %7557 = vst [vmem:[#allocation17_spill] sm:$0xff] %v5209_v33  ;;  %v956_v37 = vpack.c.bf16 %v748_v15, %v748_v15  ;;  %v716_v36 = vrot.slane %v5212_v19, 7  ;;  %vm5220_vm12 = vcmp.eq.s32.totalorder %v351_v24, 0  ;;  %v7559_v42 = vmov 0  ;;  %v5239_v15 = vld [vmem:[%s4956_s8 + $0xc8] sm:$0xff] }
  0x3d   : > { %7558 = vst [vmem:[#allocation18_spill] sm:$0xff] %v5215_v29  ;;  %v7560_v42 = vsel %vm5220_vm12, 4294967295, %v7559_v42  ;;  %v763_v53 = vsel %vm7398_vm1, %v714_v8, %v715_v26  ;;  %v283_v54 = vadd.s32 192, %v4938_v6  ;;  %v5227_v55 = vpack.c.b16 %v1132_v3, %v1131_v27 }
  0x3e   : > { %7561 = vst [vmem:[#allocation19_spill] sm:$0xff] %v7560_v42  ;;  %v1019_v61 = vunpack.c.l.b16 %v955_v34  ;;  %v1020_v62 = vunpack.c.l.b16 %v956_v37  ;;  %v762_v2 = vsel %vm7398_vm1, %v715_v26, %v716_v36  ;;  %v780_v7 = vsel %vm5220_vm12, 0.0, %v763_v53 }
  0x3f   : > { %v1053_v8 = vpack.c.bf16 %v5197_v60, %v5197_v60  ;;  %v1054_v18 = vpack.c.bf16 %v5212_v19, %v5212_v19  ;;  %v463_v24 = vand.u32 15, %v283_v54  ;;  %v731_v27 = vrot.slane %v5232_v59, 7 }
  0x40   : > { %4546 = vmatmul.msk.bf16.gmra.mxu1 %vm7403_vm3, %v5147_v57  ;;  %v941_v3 = vpack.c.bf16 %v780_v7, %v780_v7  ;;  %v942_v26 = vpack.c.bf16 %v762_v2, %v762_v2  ;;  %v5248_v34 = vpack.c.b16 %v1020_v62, %v1019_v61  ;;  %v732_v37 = vrot.slane %v5239_v15, 7 }
  0x41   : > { %4530 = vmatmul.msk.bf16.gmra.mxu0 %vm7403_vm3, %v5153_v0  ;;  %v1117_v53 = vunpack.c.l.b16 %v1053_v8  ;;  %v1118_v49 = vunpack.c.l.b16 %v1054_v18  ;;  %v269_v13 = vadd.s32 80, %v4938_v6  ;;  %vm5252_vm13 = vcmp.eq.s32.totalorder %v463_v24, 0  ;;  %v5274_v24 = vld [vmem:[%s4956_s8 + $0x58] sm:$0xff] }
  0x42   : > { %v7562_v22 = vmov 0  ;;  %v747_v54 = vsel %vm7398_vm1, %v730_v50, %v731_v27  ;;  %v1069_v61 = vpack.c.bf16 %v5232_v59, %v5232_v59  ;;  %v1070_v62 = vpack.c.bf16 %v5239_v15, %v5239_v15 }
  0x43   : > { %v7563_v22 = vsel %vm5252_vm13, 4294967295, %v7562_v22  ;;  %v1005_v2 = vunpack.c.l.b16 %v941_v3  ;;  %v1006_v7 = vunpack.c.l.b16 %v942_v26  ;;  %v746_v8 = vsel %vm7398_vm1, %v731_v27, %v732_v37 }
  0x44   : > { %7564 = vst [vmem:[#allocation20_spill] sm:$0xff] %v7563_v22  ;;  %v796_v18 = vsel %vm5252_vm13, 0.0, %v747_v54  ;;  %v5271_v50 = vpack.c.b16 %v1118_v49, %v1117_v53  ;;  %v365_v56 = vand.u32 15, %v269_v13  ;;  %v717_v41 = vrot.slane %v5259_v48, 7 }
  0x45   : > { %v1133_v43 = vunpack.c.l.b16 %v1069_v61  ;;  %v1134_v3 = vunpack.c.l.b16 %v1070_v62  ;;  %v5277_v26 = vpack.c.b16 %v1006_v7, %v1005_v2  ;;  %v957_v52 = vpack.c.bf16 %v796_v18, %v796_v18  ;;  %v5294_v61 = vld [vmem:[%s4956_s8 + $0xd0] sm:$0xff] }
  0x46   : > { %7565 = vst [vmem:[#allocation21_spill] sm:$0xff] %v5271_v50  ;;  %v958_v21 = vpack.c.bf16 %v746_v8, %v746_v8  ;;  %v718_v27 = vrot.slane %v5274_v24, 7  ;;  %vm5282_vm14 = vcmp.eq.s32.totalorder %v365_v56, 0  ;;  %v7567_v49 = vmov 0  ;;  %v5301_v8 = vld [vmem:[%s4956_s8 + $0xd8] sm:$0xff] }
  0x47   : > { %4554 = vmatmul.msk.bf16.gmra.mxu3 %vm7403_vm3, %v5165_v20  ;;  %7566 = vst [vmem:[#allocation22_spill] sm:$0xff] %v5277_v26  ;;  %v7568_v49 = vsel %vm5282_vm14, 4294967295, %v7567_v49  ;;  %v761_v13 = vsel %vm7398_vm1, %v716_v36, %v717_v41  ;;  %v285_v53 = vadd.s32 208, %v4938_v6  ;;  %v5289_v54 = vpack.c.b16 %v1134_v3, %v1133_v43 }
  0x48   : > { %7569 = vst [vmem:[#allocation23_spill] sm:$0xff] %v7568_v49  ;;  %v1021_v62 = vunpack.c.l.b16 %v957_v52  ;;  %v1022_v2 = vunpack.c.l.b16 %v958_v21  ;;  %v760_v56 = vsel %vm7398_vm1, %v717_v41, %v718_v27  ;;  %v782_v7 = vsel %vm5282_vm14, 0.0, %v761_v13 }
  0x49   : > { %7570 = vst [vmem:[#allocation24_spill] sm:$0xff] %v5289_v54  ;;  %v1055_v43 = vpack.c.bf16 %v5259_v48, %v5259_v48  ;;  %v1056_v36 = vpack.c.bf16 %v5274_v24, %v5274_v24  ;;  %v477_v18 = vand.u32 15, %v285_v53  ;;  %v733_v3 = vrot.slane %v5294_v61, 7 }
  0x4a   : > { %7571 = vst [vmem:[#allocation25_spill] sm:$0xff] %v5301_v8  ;;  %v943_v21 = vpack.c.bf16 %v782_v7, %v782_v7  ;;  %v944_v52 = vpack.c.bf16 %v760_v56, %v760_v56  ;;  %v5310_v41 = vpack.c.b16 %v1022_v2, %v1021_v62  ;;  %v734_v13 = vrot.slane %v5301_v8, 7 }
  0x4b   : > { %v1119_v22 = vunpack.c.l.b16 %v1055_v43  ;;  %v1120_v49 = vunpack.c.l.b16 %v1056_v36  ;;  %v271_v42 = vadd.s32 96, %v4938_v6  ;;  %vm5314_vm15 = vcmp.eq.s32.totalorder %v477_v18, 0 }
  0x4c   : > { %4538 = vmatmul.msk.bf16.gmra.mxu2 %vm7403_vm3, %v5186_v47  ;;  %7572 = vst [vmem:[#allocation26_spill] sm:$0xff] %v5310_v41  ;;  %v7573_v14 = vmov 0  ;;  %v745_v53 = vsel %vm7398_vm1, %v732_v37, %v733_v3  ;;  %v1071_v56 = vpack.c.bf16 %v5294_v61, %v5294_v61  ;;  %v1072_v62 = vpack.c.bf16 %v5301_v8, %v5301_v8 }
  0x4d   : > { %v7574_v14 = vsel %vm5314_vm15, 4294967295, %v7573_v14  ;;  %v1007_v2 = vunpack.c.l.b16 %v943_v21  ;;  %v1008_v7 = vunpack.c.l.b16 %v944_v52  ;;  %v744_v43 = vsel %vm7398_vm1, %v733_v3, %v734_v13 }
  0x4e   : > { %7575 = vst [vmem:[#allocation27_spill] sm:$0xff] %v7574_v14  ;;  %v798_v37 = vsel %vm5314_vm15, 0.0, %v745_v53  ;;  %v5333_v36 = vpack.c.b16 %v1120_v49, %v1119_v22  ;;  %v379_v18 = vand.u32 15, %v271_v42  ;;  %v719_v25 = vrot.slane %v5321_v4, 7  ;;  %v5352_v53 = vld [vmem:[%s4956_s8 + $0xe0] sm:$0xff] }
  0x4f   : > { %v1135_v40 = vunpack.c.l.b16 %v1071_v56  ;;  %v5336_v21 = vpack.c.b16 %v1008_v7, %v1007_v2  ;;  %v959_v52 = vpack.c.bf16 %v798_v37, %v798_v37  ;;  %v960_v8 = vpack.c.bf16 %v744_v43, %v744_v43  ;;  %7582 = vst [vmem:[#allocation32_spill] sm:$0xff] %v5352_v53 }
  0x50   : > { %4547 = vmatmul.msk.bf16.gmra.mxu1 %vm7403_vm3, %v5209_v33  ;;  %7576 = vst [vmem:[#allocation28_spill] sm:$0xff] %v5333_v36  ;;  %vm5340_vm0 = vcmp.eq.s32.totalorder %v379_v18, 0  ;;  %v7578_v3 = vmov 0  ;;  %v759_v22 = vsel %vm7398_vm1, %v718_v27, %v719_v25  ;;  %v287_v42 = vadd.s32 224, %v4938_v6  ;;  %v5361_v27 = vld [vmem:[%s4956_s8 + $0xe8] sm:$0xff] }
  0x51   : > { %4531 = vmatmul.msk.bf16.gmra.mxu0 %vm7403_vm3, %v5215_v29  ;;  %7577 = vst [vmem:[#allocation29_spill] sm:$0xff] %v5336_v21  ;;  %v7579_v3 = vsel %vm5340_vm0, 4294967295, %v7578_v3  ;;  %v1023_v56 = vunpack.c.l.b16 %v959_v52  ;;  %v7583_v2 = vrot.slane %v4962_v16, 7  ;;  %v784_v43 = vsel %vm5340_vm0, 0.0, %v759_v22 }
  0x52   : > { %7580 = vst [vmem:[#allocation30_spill] sm:$0xff] %v7579_v3  ;;  %v491_v37 = vand.u32 15, %v287_v42  ;;  %v735_v18 = vrot.slane %v5352_v53, 7  ;;  %v7404_v22 = vrot.slane %v5361_v27, 7  ;;  %v1073_v3 = vpack.c.bf16 %v5352_v53, %v5352_v53 }
  0x53   : > { %v758_v7 = vsel %vm7398_vm1, %v719_v25, %v7583_v2  ;;  %7584 = vst [vmem:[#allocation33_spill] sm:$0xff] %v5361_v27  ;;  %vm7589_vm4 = vcmp.lt.s32.totalorder %v4938_v6, 1  ;;  %v1074_v42 = vpack.c.bf16 %v5361_v27, %v5361_v27 }
  0x54   : > { %v946_v52 = vpack.c.bf16 %v758_v7, %v758_v7  ;;  %vm5375_vm1 = vcmp.eq.s32.totalorder %v491_v37, 0  ;;  %vm7590_vm15 = vmmov %vm7589_vm4 }
  0x55   : > { %v1138_v27 = vunpack.c.l.b16 %v1074_v42 }
  0x57   : > { %4555 = vmatmul.msk.bf16.gmra.mxu3 %vm7403_vm3, %v5227_v55 }
  0x5c   : > { %4539 = vmatmul.msk.bf16.gmra.mxu2 %vm7403_vm3, %v5248_v34 }
  0x60   : > { %4548 = vmatmul.msk.bf16.gmra.mxu1 %vm7403_vm3, %v5271_v50 }
  0x61   : > { %4532 = vmatmul.msk.bf16.gmra.mxu0 %vm7403_vm3, %v5277_v26 }
  0x67   : > { %4556 = vmatmul.msk.bf16.gmra.mxu3 %vm7403_vm3, %v5289_v54  ;;  %v1136_v54 = vunpack.c.l.b16 %v1072_v62  ;;  %v1024_v62 = vunpack.c.l.b16 %v960_v8  ;;  %v945_v8 = vpack.c.bf16 %v784_v43, %v784_v43  ;;  %v4626_v43 = vld [vmem:[%s7370_s1 + $0xc] sm:$0x3] }
  0x69   : > { %v5347_v49 = vpack.c.b16 %v1136_v54, %v1135_v40  ;;  %v1057_v40 = vpack.c.bf16 %v5321_v4, %v5321_v4  ;;  %v1058_v54 = vpack.c.bf16 %v4962_v16, %v4962_v16  ;;  %v5370_v25 = vpack.c.b16 %v1024_v62, %v1023_v56 }
  0x6a   : > { %v743_v16 = vsel %vm7589_vm4, %v734_v13, %v735_v18  ;;  %v1009_v7 = vunpack.c.l.b16 %v945_v8  ;;  %v1010_v56 = vunpack.c.l.b16 %v946_v52  ;;  %v742_v62 = vsel %vm7590_vm15, %v735_v18, %v7404_v22  ;;  %v4642_v13 = vld [vmem:[%s7370_s1 + $0xe] sm:$0x3] }
  0x6b   : > { %7581 = vst [vmem:[#allocation31_spill] sm:$0xff] %v5347_v49  ;;  %v1121_v2 = vunpack.c.l.b16 %v1057_v40  ;;  %v1122_v14 = vunpack.c.l.b16 %v1058_v54  ;;  %v260_v40 = vadd.s32 8, %v4938_v6  ;;  %v800_v54 = vsel %vm5375_vm1, 0.0, %v743_v16 }
  0x6c   : > { %4540 = vmatmul.msk.bf16.gmra.mxu2 %vm7403_vm3, %v5310_v41  ;;  %7585 = vst [vmem:[#allocation34_spill] sm:$0xff] %v5370_v25  ;;  %v7586_v41 = vmov 0  ;;  %vm7592_vm4 = vcmask 1041408   ;;  %v1137_v18 = vunpack.c.l.b16 %v1073_v3  ;;  %v5404_v53 = vpack.c.b16 %v1010_v56, %v1009_v7 }
  0x6d   : > { %v7587_v41 = vsel %vm5375_vm1, 4294967295, %v7586_v41  ;;  %v5398_v37 = vpack.c.b16 %v1122_v14, %v1121_v2  ;;  %v2180_v8 = vsel %vm7592_vm4, %v4626_v43, 0  ;;  %v302_v22 = vand.u32 15, %v260_v40 }
  0x6e   : > { %7588 = vst [vmem:[#allocation35_spill] sm:$0xff] %v7587_v41  ;;  %2189 = vmatpush.bf16.msra.mxu2 %v2180_v8  ;;  %v7418_v41 = vrot.slane %v4980_v30, 1  ;;  %vm7415_vm15 = vcmp.lt.s32.totalorder %v4938_v6, 7  ;;  %v961_v14 = vpack.c.bf16 %v800_v54, %v800_v54  ;;  %v962_v2 = vpack.c.bf16 %v742_v62, %v742_v62 }
  0x6f   : > { %7591 = vst [vmem:[#allocation36_spill] sm:$0xff] %v5398_v37  ;;  %v7595_v16 = vmov 0  ;;  %v5428_v7 = vpack.c.b16 %v1138_v27, %v1137_v18  ;;  %vm7600_vm1 = vcmask 1041408  }
  0x70   : > { %4549 = vmatmul.msk.bf16.gmra.mxu1 %vm7403_vm3, %v5333_v36  ;;  %7594 = vst [vmem:[#allocation37_spill] sm:$0xff] %v5404_v53  ;;  %vm7601_vm13 = vmmov %vm7600_vm1  ;;  %v1025_v43 = vunpack.c.l.b16 %v961_v14  ;;  %v262_v14 = vadd.s32 24, %v4938_v6 }
  0x71   : > { %4533 = vmatmul.msk.bf16.gmra.mxu0 %vm7403_vm3, %v5336_v21  ;;  %7599 = vst [vmem:[#allocation39_spill] sm:$0xff] %v5428_v7 }
  0x77   : > { %4557 = vmatmul.msk.bf16.gmra.mxu3 %vm7403_vm3, %v5347_v49  ;;  %v838_v49 = vrot.slane %v5035_v1, 1  ;;  %v4658_v1 = vld [vmem:[%s7370_s1 + $0x10] sm:$0x3] }
  0x78   : > { %v2432_v62 = vsel %vm7601_vm13, %v4658_v1, 0  ;;  %v316_v1 = vand.u32 15, %v262_v14 }
  0x79   : > { %2441 = vmatpush.bf16.msra.mxu0 %v2432_v62  ;;  %v7605_v62 = vmov 0 }
  0x7c   : > { %4541 = vmatmul.msk.bf16.gmra.mxu2 %vm7403_vm3, %v5370_v25  ;;  %vm7593_vm3 = vmmov %vm7592_vm4  ;;  %v837_v25 = vrot.slane %v4990_v35, 1  ;;  %vm5408_vm4 = vcmp.eq.s32.totalorder %v302_v22, 15  ;;  %v4609_v35 = vld [vmem:[%s7370_s1 + $0xa] sm:$0x3] }
  0x7d   : > { %v2306_v52 = vsel %vm7593_vm3, %v4642_v13, 0  ;;  %v7596_v16 = vsel %vm5408_vm4, 4294967295, %v7595_v16  ;;  %vm7598_vm3 = vcmask 31744   ;;  %v2054_v56 = vsel %vm7600_vm1, %v4609_v35, 0 }
  0x7e   : > { %2315 = vmatpush.bf16.msra.mxu3 %v2306_v52  ;;  %7597 = vst [vmem:[#allocation38_spill] sm:$0xff] %v7596_v16  ;;  %v898_v3 = vsel %vm7415_vm15, %v837_v25, %v838_v49  ;;  %v899_v22 = vsel %vm7415_vm15, %v7418_v41, %v837_v25  ;;  %v1026_v13 = vunpack.c.l.b16 %v962_v2  ;;  %2063 = vmatpush.bf16.msrb.mxu1 %v2054_v56  ;;  %vm7602_vm15 = vmmov %vm7598_vm3  ;;  %v5443_v52 = vld [vmem:[%s7371_s2] ss:$0 sm:$0xff]  ;;  %vm5451_vm1 = vcmp.eq.s32.totalorder %v316_v1, 15 }
  0x7f   : > { %v902_v42 = vsel %vm5408_vm4, 0.0, %v898_v3  ;;  %v1157_v40 = vpack.c.bf16 %v899_v22, %v899_v22  ;;  %vm7604_vm11 = vmmov %vm7598_vm3  ;;  %v839_v22 = vrot.slane %v5040_v9, 1  ;;  %v7606_v62 = vsel %vm5451_vm1, 4294967295, %v7605_v62 }
  0x80   : > { %4550 = vmatmul.msk.bf16.gmra.mxu1 %vm7598_vm3, %v5398_v37  ;;  %v1158_v54 = vpack.c.bf16 %v902_v42, %v902_v42  ;;  %v5436_v25 = vpack.c.b16 %v1026_v13, %v1025_v43  ;;  %v840_v42 = vrot.slane %v5081_v46, 1  ;;  %7607 = vst [vmem:[#allocation41_spill] sm:$0xff] %v7606_v62  ;;  %vm7609_vm13 = vmmov %vm7598_vm3  ;;  %v264_v1 = vadd.s32 40, %v4938_v6 }
  0x81   : > { %4534 = vmatmul.msk.bf16.gmra.mxu0 %vm7598_vm3, %v5404_v53  ;;  %v1221_v27 = vunpack.c.l.b16 %v1157_v40  ;;  %vm7611_vm9 = vmmov %vm7598_vm3 }
  0x82   : > { %7603 = vst [vmem:[#allocation40_spill] sm:$0xff] %v5436_v25  ;;  %v1222_v8 = vunpack.c.l.b16 %v1158_v54 }
  0x84   : > { %v1253_v3 = vpack.c.b16 %v1222_v8, %v1221_v27 }
  0x87   : > { %4558 = vmatmul.msk.bf16.gmra.mxu3 %vm7602_vm15, %v5428_v7 }
  0x8c   : > { %4542 = vmatmul.msk.bf16.gmra.mxu2 %vm7604_vm11, %v5436_v25  ;;  %vm7608_vm11 = vcmp.lt.s32.totalorder %v4938_v6, 7 }
  0x8d   : > { %v1507_v18 = vpop.f32.mrf.mxu1  ;;  %v896_v43 = vsel %vm7608_vm11, %v839_v22, %v840_v42  ;;  %vm7610_vm15 = vmmov %vm7608_vm11 }
  0x8e   : > { %v1336_v2 = vpop.f32.mrf.mxu0  ;;  %v897_v13 = vsel %vm7610_vm15, %v838_v49, %v839_v22  ;;  %v904_v40 = vsel %vm5451_vm1, 0.0, %v896_v43  ;;  %v330_v43 = vand.u32 15, %v264_v1  ;;  %vm7617_vm15 = vmmov %vm7608_vm11 }
  0x8f   : > { %v1416_v35 = vadd.f32 %v5443_v52, %v1336_v2  ;;  %v1159_v54 = vpack.c.bf16 %v897_v13, %v897_v13  ;;  %v1160_v27 = vpack.c.bf16 %v904_v40, %v904_v40  ;;  %v841_v13 = vrot.slane %v5093_v45, 1 }
  0x90   : > { %4610 = vmatmul.msk.bf16.vlgmr.msrb.gmra.mxu1 %vm7609_vm13, %v1253_v3  ;;  %v842_v40 = vrot.slane %v5137_v44, 1  ;;  %vm7616_vm13 = vmmov %vm7598_vm3 }
  0x91   : > { %v5449_v56 = vadd.f32 %v1507_v18, %v1416_v35  ;;  %4593 = vmatmul.msk.bf16.vlgmr.msrb.gmra.mxu0 %vm7598_vm3, %v5037_v5  ;;  %v1223_v14 = vunpack.c.l.b16 %v1159_v54  ;;  %v1224_v2 = vunpack.c.l.b16 %v1160_v27  ;;  %v7612_v35 = vmov 0  }
  0x92   : > { %v7613_v54 = vmov 0  ;;  %v894_v27 = vsel %vm7608_vm11, %v841_v13, %v842_v40  ;;  %v895_v45 = vsel %vm7617_vm15, %v840_v42, %v841_v13  ;;  %vm7618_vm11 = vmmov %vm7598_vm3 }
  0x93   : > { %v5471_v22 = vpack.c.b16 %v1224_v2, %v1223_v14  ;;  %vm7626_vm7 = vmmov %vm7618_vm11 }
  0x95   : > { %v1509_v9 = vpop.f32.mrf.mxu1 }
  0x96   : > { %v1338_v46 = vpop.f32.mrf.mxu0 }
  0x97   : > { %v1417_v8 = vadd.f32 %v5443_v52, %v1338_v46  ;;  %4576 = vmatmul.msk.bf16.vlgmr.msrb.gmra.mxu3 %vm7611_vm9, %v5043_v11  ;;  %vm5476_vm9 = vcmp.eq.s32.totalorder %v330_v43, 15  ;;  %v1161_v43 = vpack.c.bf16 %v895_v45, %v895_v45  ;;  %v266_v45 = vadd.s32 56, %v4938_v6 }
  0x98   : > { %v7614_v54 = vsel %vm5476_vm9, 4294967295, %v7613_v54  ;;  %v906_v44 = vsel %vm5476_vm9, 0.0, %v894_v27 }
  0x99   : > { %v5467_v18 = vadd.f32 %v1509_v9, %v1417_v8  ;;  %7615 = vst [vmem:[#allocation42_spill] sm:$0xff] %v7614_v54  ;;  %v1225_v27 = vunpack.c.l.b16 %v1161_v43  ;;  %v344_v16 = vand.u32 15, %v266_v45 }
  0x9a   : > { %v1547_v49 = vpop.f32.mrf.mxu3 }
  0x9b   : > { %vm5510_vm15 = vcmp.eq.s32.totalorder %v344_v16, 15 }
  0x9c   : > { %1677 = vmatmul.bf16.vlgmr.msrb.gmra.mxu2 %v7612_v35  ;;  %v844_v35 = vrot.slane %v5197_v60, 1 }
  0x9d   : > { %v1512_v5 = vpop.f32.mrf.mxu1 }
  0x9e   : > { %v1341_v9 = vpop.f32.mrf.mxu0 }
  0x9f   : > { %v1376_v46 = vpop.f32.mrf.mxu2  ;;  %v1418_v8 = vadd.f32 %v5443_v52, %v1341_v9 }
  0xa0   : > { %v1432_v11 = vadd.f32 %v5443_v52, %v1376_v46  ;;  %4611 = vmatmul.msk.bf16.gmra.mxu1 %vm7616_vm13, %v5471_v22  ;;  %v1162_v46 = vpack.c.bf16 %v906_v44, %v906_v44  ;;  %vm7619_vm13 = vmmov %vm7598_vm3 }
  0xa1   : > { %v5491_v1 = vadd.f32 %v1512_v5, %v1418_v8  ;;  %4594 = vmatmul.msk.bf16.gmra.mxu0 %vm7598_vm3, %v5090_v58  ;;  %vm7623_vm3 = vcmp.lt.s32.totalorder %v4938_v6, 7 }
  0xa2   : > { %v1549_v14 = vpop.f32.mrf.mxu3  ;;  %v5489_v2 = vadd.f32 %v1547_v49, %v1432_v11  ;;  %v1226_v49 = vunpack.c.l.b16 %v1162_v46 }
  0xa4   : > { %v5505_v44 = vpack.c.b16 %v1226_v49, %v1225_v27 }
  0xa5   : > { %v1514_v9 = vpop.f32.mrf.mxu1 }
  0xa6   : > { %v1343_v42 = vpop.f32.mrf.mxu0 }
  0xa7   : > { %v1378_v41 = vpop.f32.mrf.mxu2  ;;  %4577 = vmatmul.msk.bf16.gmra.mxu3 %vm7618_vm11, %v5096_v63  ;;  %v1419_v13 = vadd.f32 %v5443_v52, %v1343_v42 }
  0xa8   : > { %v1433_v62 = vadd.f32 %v5443_v52, %v1378_v41  ;;  %v843_v41 = vrot.slane %v5150_v39, 1 }
  0xa9   : > { %v5501_v8 = vadd.f32 %v1514_v9, %v1419_v13 }
  0xaa   : > { %v1552_v11 = vpop.f32.mrf.mxu3  ;;  %v5499_v5 = vadd.f32 %v1549_v14, %v1433_v62  ;;  %v7620_v62 = vmov 0 }
  0xab   : > { %v7621_v62 = vsel %vm5510_vm15, 4294967295, %v7620_v62 }
  0xac   : > { %4560 = vmatmul.msk.bf16.gmra.mxu2 %vm7619_vm13, %v1253_v3  ;;  %7622 = vst [vmem:[#allocation43_spill] sm:$0xff] %v7621_v62  ;;  %v892_v3 = vsel %vm7623_vm3, %v843_v41, %v844_v35  ;;  %vm7624_vm13 = vmmov %vm7623_vm3 }
  0xad   : > { %v1517_v54 = vpop.f32.mrf.mxu1  ;;  %v893_v39 = vsel %vm7624_vm13, %v842_v40, %v843_v41  ;;  %v908_v60 = vsel %vm5510_vm15, 0.0, %v892_v3  ;;  %vm7627_vm3 = vmmov %vm7626_vm7 }
  0xae   : > { %v1346_v46 = vpop.f32.mrf.mxu0  ;;  %v1163_v27 = vpack.c.bf16 %v893_v39, %v893_v39  ;;  %v1164_v49 = vpack.c.bf16 %v908_v60, %v908_v60  ;;  %v268_v39 = vadd.s32 72, %v4938_v6  ;;  %vm7635_vm5 = vmmov %vm7627_vm3 }
  0xaf   : > { %v1381_v42 = vpop.f32.mrf.mxu2  ;;  %v1420_v14 = vadd.f32 %v5443_v52, %v1346_v46 }
  0xb0   : > { %v1434_v43 = vadd.f32 %v5443_v52, %v1381_v42  ;;  %4612 = vmatmul.msk.bf16.gmra.mxu1 %vm7618_vm11, %v5505_v44  ;;  %v1227_v3 = vunpack.c.l.b16 %v1163_v27 }
  0xb1   : > { %v5525_v16 = vadd.f32 %v1517_v54, %v1420_v14  ;;  %4595 = vmatmul.msk.bf16.gmra.mxu0 %vm7626_vm7, %v5147_v57  ;;  %vm7629_vm7 = vmmov %vm7627_vm3 }
  0xb2   : > { %v1554_v9 = vpop.f32.mrf.mxu3  ;;  %v5523_v13 = vadd.f32 %v1552_v11, %v1434_v43  ;;  %v1228_v11 = vunpack.c.l.b16 %v1164_v49 }
  0xb4   : > { %7625 = vst [vmem:[#allocation44_spill] sm:$0xff] %v5523_v13  ;;  %v5540_v60 = vpack.c.b16 %v1228_v11, %v1227_v3  ;;  %v358_v13 = vand.u32 15, %v268_v39 }
  0xb5   : > { %v1519_v45 = vpop.f32.mrf.mxu1 }
  0xb6   : > { %v1348_v40 = vpop.f32.mrf.mxu0  ;;  %vm5545_vm11 = vcmp.eq.s32.totalorder %v358_v13, 15 }
  0xb7   : > { %v1383_v42 = vpop.f32.mrf.mxu2  ;;  %4578 = vmatmul.msk.bf16.gmra.mxu3 %vm7627_vm3, %v5153_v0  ;;  %v1421_v41 = vadd.f32 %v5443_v52, %v1348_v40  ;;  %v846_v40 = vrot.slane %v5259_v48, 1 }
  0xb8   : > { %v1435_v46 = vadd.f32 %v5443_v52, %v1383_v42  ;;  %v845_v42 = vrot.slane %v5212_v19, 1 }
  0xb9   : > { %v5535_v14 = vadd.f32 %v1519_v45, %v1421_v41  ;;  %v7630_v45 = vmov 0 }
  0xba   : > { %v1557_v43 = vpop.f32.mrf.mxu3  ;;  %v5533_v54 = vadd.f32 %v1554_v9, %v1435_v46  ;;  %v7631_v45 = vsel %vm5545_vm11, 4294967295, %v7630_v45  ;;  %v890_v46 = vsel %vm7624_vm13, %v845_v42, %v846_v40 }
  0xbb   : > { %7632 = vst [vmem:[#allocation46_spill] sm:$0xff] %v7631_v45  ;;  %v910_v19 = vsel %vm5545_vm11, 0.0, %v890_v46 }
  0xbc   : > { %7628 = vst [vmem:[#allocation45_spill] sm:$0xff] %v5533_v54  ;;  %4561 = vmatmul.msk.bf16.gmra.mxu2 %vm7629_vm7, %v5471_v22  ;;  %vm7633_vm7 = vmmov %vm7624_vm13 }
  0xbd   : > { %v1522_v62 = vpop.f32.mrf.mxu1  ;;  %v891_v48 = vsel %vm7633_vm7, %v844_v35, %v845_v42  ;;  %vm7636_vm13 = vmmov %vm7627_vm3 }
  0xbe   : > { %v1351_v9 = vpop.f32.mrf.mxu0  ;;  %v1165_v39 = vpack.c.bf16 %v891_v48, %v891_v48  ;;  %v270_v48 = vadd.s32 88, %v4938_v6 }
  0xbf   : > { %v1386_v27 = vpop.f32.mrf.mxu2  ;;  %v1422_v41 = vadd.f32 %v5443_v52, %v1351_v9 }
  0xc0   : > { %v1436_v49 = vadd.f32 %v5443_v52, %v1386_v27  ;;  %4613 = vmatmul.msk.bf16.gmra.mxu1 %vm7627_vm3, %v5540_v60  ;;  %v1166_v27 = vpack.c.bf16 %v910_v19, %v910_v19  ;;  %v1229_v46 = vunpack.c.l.b16 %v1165_v39 }
  0xc1   : > { %v5560_v13 = vadd.f32 %v1522_v62, %v1422_v41  ;;  %4596 = vmatmul.msk.bf16.gmra.mxu0 %vm7635_vm5, %v5209_v33  ;;  %vm7638_vm5 = vmmov %vm7627_vm3 }
  0xc2   : > { %v1559_v3 = vpop.f32.mrf.mxu3  ;;  %v5558_v11 = vadd.f32 %v1557_v43, %v1436_v49  ;;  %v1230_v43 = vunpack.c.l.b16 %v1166_v27 }
  0xc4   : > { %7634 = vst [vmem:[#allocation47_spill] sm:$0xff] %v5558_v11  ;;  %v5575_v19 = vpack.c.b16 %v1230_v43, %v1229_v46  ;;  %v372_v11 = vand.u32 15, %v270_v48 }
  0xc5   : > { %v1524_v9 = vpop.f32.mrf.mxu1 }
  0xc6   : > { %v1353_v35 = vpop.f32.mrf.mxu0  ;;  %7639 = vst [vmem:[#allocation49_spill] sm:$0xff] %v5575_v19  ;;  %vm5580_vm3 = vcmp.eq.s32.totalorder %v372_v11, 15 }
  0xc7   : > { %v1388_v54 = vpop.f32.mrf.mxu2  ;;  %4579 = vmatmul.msk.bf16.gmra.mxu3 %vm7636_vm13, %v5215_v29  ;;  %v1423_v42 = vadd.f32 %v5443_v52, %v1353_v35  ;;  %v848_v35 = vrot.slane %v5321_v4, 1  ;;  %vm7643_vm13 = vmmov %vm7638_vm5  ;;  %v4838_v29 = vld [vmem:[%s4956_s8 + $0x68] sm:$0xff] }
  0xc8   : > { %v1437_v0 = vadd.f32 %v5443_v52, %v1388_v54  ;;  %v847_v54 = vrot.slane %v5274_v24, 1  ;;  %vm7646_vm2 = vmmov %vm7643_vm13 }
  0xc9   : > { %v5570_v41 = vadd.f32 %v1524_v9, %v1423_v42 }
  0xca   : > { %v1562_v49 = vpop.f32.mrf.mxu3  ;;  %v5568_v62 = vadd.f32 %v1559_v3, %v1437_v0  ;;  %v7640_v3 = vmov 0  ;;  %v888_v9 = vsel %vm7633_vm7, %v847_v54, %v848_v35 }
  0xcb   : > { %v7641_v3 = vsel %vm5580_vm3, 4294967295, %v7640_v3  ;;  %v912_v24 = vsel %vm5580_vm3, 0.0, %v888_v9 }
  0xcc   : > { %7637 = vst [vmem:[#allocation48_spill] sm:$0xff] %v5568_v62  ;;  %4562 = vmatmul.msk.bf16.gmra.mxu2 %vm7638_vm5, %v5505_v44  ;;  %vm7644_vm5 = vmmov %vm7633_vm7 }
  0xcd   : > { %v1527_v45 = vpop.f32.mrf.mxu1  ;;  %7642 = vst [vmem:[#allocation50_spill] sm:$0xff] %v7641_v3  ;;  %v889_v4 = vsel %vm7644_vm5, %v846_v40, %v847_v54  ;;  %vm7647_vm7 = vmmov %vm7646_vm2 }
  0xce   : > { %v1356_v0 = vpop.f32.mrf.mxu0  ;;  %v1167_v48 = vpack.c.bf16 %v889_v4, %v889_v4  ;;  %v4837_v4 = vld [vmem:[%s4956_s8 + $0x70] sm:$0xff] }
  0xcf   : > { %v1391_v39 = vpop.f32.mrf.mxu2  ;;  %v1424_v42 = vadd.f32 %v5443_v52, %v1356_v0 }
  0xd0   : > { %v1438_v27 = vadd.f32 %v5443_v52, %v1391_v39  ;;  %4614 = vmatmul.msk.bf16.gmra.mxu1 %vm7643_vm13, %v5575_v19  ;;  %v1168_v39 = vpack.c.bf16 %v912_v24, %v912_v24  ;;  %v850_v24 = vrot.slane %v4837_v4, 1 }
  0xd1   : > { %v5595_v11 = vadd.f32 %v1527_v45, %v1424_v42  ;;  %4597 = vmatmul.msk.bf16.gmra.mxu0 %vm7646_vm2, %v5271_v50 }
  0xd2   : > { %v1564_v46 = vpop.f32.mrf.mxu3  ;;  %v5593_v43 = vadd.f32 %v1562_v49, %v1438_v27  ;;  %v1231_v27 = vunpack.c.l.b16 %v1167_v48  ;;  %v1232_v9 = vunpack.c.l.b16 %v1168_v39 }
  0xd4   : > { %7645 = vst [vmem:[#allocation51_spill] sm:$0xff] %v5593_v43  ;;  %v272_v43 = vadd.s32 104, %v4938_v6 }
  0xd5   : > { %v1529_v0 = vpop.f32.mrf.mxu1 }
  0xd6   : > { %v1358_v54 = vpop.f32.mrf.mxu0  ;;  %v386_v50 = vand.u32 15, %v272_v43 }
  0xd7   : > { %v1393_v62 = vpop.f32.mrf.mxu2  ;;  %4580 = vmatmul.msk.bf16.gmra.mxu3 %vm7647_vm7, %v5277_v26  ;;  %v1425_v49 = vadd.f32 %v5443_v52, %v1358_v54  ;;  %v5611_v26 = vpack.c.b16 %v1232_v9, %v1231_v27  ;;  %v849_v54 = vrot.slane %v4838_v29, 1  ;;  %vm7653_vm7 = vmmov %vm7646_vm2 }
  0xd8   : > { %v1439_v40 = vadd.f32 %v5443_v52, %v1393_v62  ;;  %vm5615_vm13 = vcmp.eq.s32.totalorder %v386_v50, 15  ;;  %vm7656_vm0 = vmmov %vm7653_vm7 }
  0xd9   : > { %v5605_v3 = vadd.f32 %v1529_v0, %v1425_v49  ;;  %7649 = vst [vmem:[#allocation53_spill] sm:$0xff] %v5611_v26  ;;  %v7650_v0 = vmov 0 }
  0xda   : > { %v1567_v45 = vpop.f32.mrf.mxu3  ;;  %v5603_v42 = vadd.f32 %v1564_v46, %v1439_v40  ;;  %v7651_v0 = vsel %vm5615_vm13, 4294967295, %v7650_v0  ;;  %v886_v40 = vsel %vm7644_vm5, %v849_v54, %v850_v24 }
  0xdb   : > { %7652 = vst [vmem:[#allocation54_spill] sm:$0xff] %v7651_v0  ;;  %v914_v43 = vsel %vm5615_vm13, 0.0, %v886_v40 }
  0xdc   : > { %7648 = vst [vmem:[#allocation52_spill] sm:$0xff] %v5603_v42  ;;  %4563 = vmatmul.msk.bf16.gmra.mxu2 %vm7646_vm2, %v5540_v60  ;;  %vm7654_vm2 = vmmov %vm7644_vm5 }
  0xdd   : > { %v1532_v62 = vpop.f32.mrf.mxu1  ;;  %v887_v29 = vsel %vm7654_vm2, %v848_v35, %v849_v54  ;;  %vm7657_vm5 = vmmov %vm7656_vm0 }
  0xde   : > { %v1361_v46 = vpop.f32.mrf.mxu0  ;;  %v1169_v4 = vpack.c.bf16 %v887_v29, %v887_v29 }
  0xdf   : > { %v1396_v48 = vpop.f32.mrf.mxu2  ;;  %v1426_v49 = vadd.f32 %v5443_v52, %v1361_v46 }
  0xe0   : > { %v1440_v39 = vadd.f32 %v5443_v52, %v1396_v48  ;;  %4615 = vmatmul.msk.bf16.gmra.mxu1 %vm7653_vm7, %v5611_v26  ;;  %v1170_v48 = vpack.c.bf16 %v914_v43, %v914_v43  ;;  %v4840_v43 = vld [vmem:[%s4956_s8 + $0x80] sm:$0xff] }
  0xe1   : > { %v5630_v50 = vadd.f32 %v1532_v62, %v1426_v49  ;;  %4598 = vmatmul.msk.bf16.gmra.mxu0 %vm7656_vm0, %v5333_v36  ;;  %v852_v36 = vrot.slane %v4840_v43, 1 }
  0xe2   : > { %v1569_v27 = vpop.f32.mrf.mxu3  ;;  %v5628_v9 = vadd.f32 %v1567_v45, %v1440_v39  ;;  %v1233_v39 = vunpack.c.l.b16 %v1169_v4  ;;  %v1234_v40 = vunpack.c.l.b16 %v1170_v48 }
  0xe4   : > { %7655 = vst [vmem:[#allocation55_spill] sm:$0xff] %v5628_v9  ;;  %v4839_v9 = vld [vmem:[%s4956_s8 + $0x78] sm:$0xff] }
  0xe5   : > { %v1534_v46 = vpop.f32.mrf.mxu1  ;;  %v851_v29 = vrot.slane %v4839_v9, 1 }
  0xe6   : > { %v1363_v54 = vpop.f32.mrf.mxu0 }
  0xe7   : > { %v1398_v42 = vpop.f32.mrf.mxu2  ;;  %4581 = vmatmul.msk.bf16.gmra.mxu3 %vm7657_vm5, %v5336_v21  ;;  %v1427_v45 = vadd.f32 %v5443_v52, %v1363_v54  ;;  %v274_v21 = vadd.s32 120, %v4938_v6  ;;  %v884_v9 = vsel %vm7654_vm2, %v851_v29, %v852_v36  ;;  %vm7663_vm5 = vmmov %vm7656_vm0 }
  0xe8   : > { %v1441_v35 = vadd.f32 %v5443_v52, %v1398_v42  ;;  %v5647_v42 = vpack.c.b16 %v1234_v40, %v1233_v39  ;;  %vm7666_vm13 = vmmov %vm7663_vm5 }
  0xe9   : > { %v5640_v0 = vadd.f32 %v1534_v46, %v1427_v45  ;;  %v400_v54 = vand.u32 15, %v274_v21  ;;  %v7660_v46 = vmov 0 }
  0xea   : > { %v1572_v62 = vpop.f32.mrf.mxu3  ;;  %v5638_v49 = vadd.f32 %v1569_v27, %v1441_v35  ;;  %7659 = vst [vmem:[#allocation57_spill] sm:$0xff] %v5647_v42 }
  0xeb   : > { %vm5650_vm7 = vcmp.eq.s32.totalorder %v400_v54, 15 }
  0xec   : > { %7658 = vst [vmem:[#allocation56_spill] sm:$0xff] %v5638_v49  ;;  %4564 = vmatmul.msk.bf16.gmra.mxu2 %vm7656_vm0, %v5575_v19  ;;  %v7661_v46 = vsel %vm5650_vm7, 4294967295, %v7660_v46  ;;  %vm7664_vm0 = vmmov %vm7654_vm2  ;;  %v916_v39 = vsel %vm5650_vm7, 0.0, %v884_v9 }
  0xed   : > { %v1537_v33 = vpop.f32.mrf.mxu1  ;;  %7662 = vst [vmem:[#allocation58_spill] sm:$0xff] %v7661_v46  ;;  %v885_v21 = vsel %vm7664_vm0, %v850_v24, %v851_v29  ;;  %vm7667_vm2 = vmmov %vm7663_vm5 }
  0xee   : > { %v1366_v27 = vpop.f32.mrf.mxu0  ;;  %v1171_v54 = vpack.c.bf16 %v885_v21, %v885_v21  ;;  %vm7675_vm7 = vmmov %vm7667_vm2 }
  0xef   : > { %v1401_v4 = vpop.f32.mrf.mxu2  ;;  %v1428_v35 = vadd.f32 %v5443_v52, %v1366_v27 }
  0xf0   : > { %v1442_v48 = vadd.f32 %v5443_v52, %v1401_v4  ;;  %4616 = vmatmul.msk.bf16.gmra.mxu1 %vm7663_vm5, %v5647_v42  ;;  %v1172_v4 = vpack.c.bf16 %v916_v39, %v916_v39  ;;  %v4842_v39 = vld [vmem:[%s4956_s8 + $0x90] sm:$0xff] }
  0xf1   : > { %v5665_v43 = vadd.f32 %v1537_v33, %v1428_v35  ;;  %4599 = vmatmul.msk.bf16.gmra.mxu0 %vm7666_vm13, %v5398_v37  ;;  %v854_v37 = vrot.slane %v4842_v39, 1  ;;  %vm7669_vm13 = vmmov %vm7667_vm2 }
  0xf2   : > { %v1574_v45 = vpop.f32.mrf.mxu3  ;;  %v5663_v40 = vadd.f32 %v1572_v62, %v1442_v48  ;;  %v1235_v48 = vunpack.c.l.b16 %v1171_v54  ;;  %v1236_v9 = vunpack.c.l.b16 %v1172_v4 }
  0xf4   : > { %7665 = vst [vmem:[#allocation59_spill] sm:$0xff] %v5663_v40  ;;  %v4841_v40 = vld [vmem:[%s4956_s8 + $0x88] sm:$0xff] }
  0xf5   : > { %v1539_v27 = vpop.f32.mrf.mxu1  ;;  %v853_v21 = vrot.slane %v4841_v40, 1 }
  0xf6   : > { %v1368_v29 = vpop.f32.mrf.mxu0 }
  0xf7   : > { %v1403_v49 = vpop.f32.mrf.mxu2  ;;  %4582 = vmatmul.msk.bf16.gmra.mxu3 %vm7667_vm2, %v5404_v53  ;;  %v1429_v62 = vadd.f32 %v5443_v52, %v1368_v29  ;;  %v276_v53 = vadd.s32 136, %v4938_v6  ;;  %v882_v40 = vsel %vm7664_vm0, %v853_v21, %v854_v37 }
  0xf8   : > { %v1443_v24 = vadd.f32 %v5443_v52, %v1403_v49  ;;  %v5682_v49 = vpack.c.b16 %v1236_v9, %v1235_v48 }
  0xf9   : > { %v5675_v46 = vadd.f32 %v1539_v27, %v1429_v62  ;;  %v414_v29 = vand.u32 15, %v276_v53  ;;  %v7670_v27 = vmov 0 }
  0xfa   : > { %v1577_v33 = vpop.f32.mrf.mxu3  ;;  %v5673_v35 = vadd.f32 %v1574_v45, %v1443_v24 }
  0xfb   : > { %vm5685_vm5 = vcmp.eq.s32.totalorder %v414_v29, 15 }
  0xfc   : > { %7668 = vst [vmem:[#allocation60_spill] sm:$0xff] %v5673_v35  ;;  %4565 = vmatmul.msk.bf16.gmra.mxu2 %vm7669_vm13, %v5611_v26  ;;  %v7671_v27 = vsel %vm5685_vm5, 4294967295, %v7670_v27  ;;  %vm7673_vm13 = vmmov %vm7664_vm0  ;;  %v918_v48 = vsel %vm5685_vm5, 0.0, %v882_v40 }
  0xfd   : > { %v1542_v19 = vpop.f32.mrf.mxu1  ;;  %7672 = vst [vmem:[#allocation61_spill] sm:$0xff] %v7671_v27  ;;  %v883_v53 = vsel %vm7673_vm13, %v852_v36, %v853_v21  ;;  %vm7676_vm0 = vmmov %vm7667_vm2 }
  0xfe   : > { %v1371_v45 = vpop.f32.mrf.mxu0  ;;  %v1173_v29 = vpack.c.bf16 %v883_v53, %v883_v53  ;;  %vm7684_vm5 = vmmov %vm7676_vm0 }
  0xff   : > { %v1406_v54 = vpop.f32.mrf.mxu2  ;;  %v1430_v24 = vadd.f32 %v5443_v52, %v1371_v45 }
 0x100   : > { %v1444_v4 = vadd.f32 %v5443_v52, %v1406_v54  ;;  %4617 = vmatmul.msk.bf16.gmra.mxu1 %vm7667_vm2, %v5682_v49  ;;  %v1174_v54 = vpack.c.bf16 %v918_v48, %v918_v48  ;;  %v856_v48 = vrot.slane %v5113_v12, 1 }
 0x101   : > { %v5700_v39 = vadd.f32 %v1542_v19, %v1430_v24  ;;  %4600 = vmatmul.msk.bf16.gmra.mxu0 %vm7675_vm7, %v4982_v31  ;;  %vm7678_vm7 = vmmov %vm7676_vm0 }
 0x102   : > { %v1579_v62 = vpop.f32.mrf.mxu3  ;;  %v5698_v9 = vadd.f32 %v1577_v33, %v1444_v4  ;;  %v1237_v33 = vunpack.c.l.b16 %v1173_v29  ;;  %v1238_v4 = vunpack.c.l.b16 %v1174_v54 }
 0x104   : > { %7674 = vst [vmem:[#allocation62_spill] sm:$0xff] %v5698_v9  ;;  %v4843_v9 = vld [vmem:[%s4956_s8 + $0x98] sm:$0xff] }
 0x105   : > { %v1544_v45 = vpop.f32.mrf.mxu1  ;;  %v855_v53 = vrot.slane %v4843_v9, 1 }
 0x106   : > { %v1373_v21 = vpop.f32.mrf.mxu0 }
 0x107   : > { %v1408_v35 = vpop.f32.mrf.mxu2  ;;  %4583 = vmatmul.msk.bf16.gmra.mxu3 %vm7676_vm0, %v5010_v51  ;;  %v1431_v40 = vadd.f32 %v5443_v52, %v1373_v21  ;;  %v278_v51 = vadd.s32 152, %v4938_v6  ;;  %v880_v12 = vsel %vm7673_vm13, %v855_v53, %v856_v48 }
 0x108   : > { %v1445_v36 = vadd.f32 %v5443_v52, %v1408_v35  ;;  %v5717_v35 = vpack.c.b16 %v1238_v4, %v1237_v33 }
 0x109   : > { %v5710_v24 = vadd.f32 %v1544_v45, %v1431_v40  ;;  %v428_v21 = vand.u32 15, %v278_v51  ;;  %v7679_v45 = vmov 0 }
 0x10a   : > { %v1582_v27 = vpop.f32.mrf.mxu3  ;;  %v5708_v19 = vadd.f32 %v1579_v62, %v1445_v36 }
 0x10b   : > { %vm5720_vm2 = vcmp.eq.s32.totalorder %v428_v21, 15 }
 0x10c   : > { %7677 = vst [vmem:[#allocation63_spill] sm:$0xff] %v5708_v19  ;;  %4566 = vmatmul.msk.bf16.gmra.mxu2 %vm7678_vm7, %v5647_v42  ;;  %v7680_v45 = vsel %vm5720_vm2, 4294967295, %v7679_v45  ;;  %vm7682_vm7 = vmmov %vm7673_vm13  ;;  %v920_v51 = vsel %vm5720_vm2, 0.0, %v880_v12  ;;  %v858_v12 = vrot.slane %v5170_v23, 1 }
 0x10d   : > { %v2065_v31 = vpop.f32.mrf.mxu1  ;;  %7681 = vst [vmem:[#allocation64_spill] sm:$0xff] %v7680_v45  ;;  %v881_v36 = vsel %vm7682_vm7, %v854_v37, %v855_v53  ;;  %v1176_v4 = vpack.c.bf16 %v920_v51, %v920_v51  ;;  %vm7685_vm13 = vmmov %vm7676_vm0 }
 0x10e   : > { %v1936_v62 = vpop.f32.mrf.mxu0  ;;  %v1175_v33 = vpack.c.bf16 %v881_v36, %v881_v36  ;;  %v280_v36 = vadd.s32 168, %v4938_v6 }
 0x10f   : > { %v1411_v29 = vpop.f32.mrf.mxu2  ;;  %v1240_v37 = vunpack.c.l.b16 %v1176_v4 }
 0x110   : > { %v1446_v54 = vadd.f32 %v5443_v52, %v1411_v29  ;;  %4618 = vmatmul.msk.bf16.gmra.mxu1 %vm7676_vm0, %v5717_v35  ;;  %v1239_v26 = vunpack.c.l.b16 %v1175_v33 }
 0x111   : > { %4601 = vmatmul.msk.bf16.gmra.mxu0 %vm7684_vm5, %v5049_v17  ;;  %vm7687_vm5 = vmmov %vm7676_vm0  ;;  %v859_v17 = vrot.slane %v5177_v28, 1  ;;  %v7695_v28 = vmov 0 }
 0x112   : > { %v1584_v9 = vpop.f32.mrf.mxu3  ;;  %v5732_v40 = vadd.f32 %v1582_v27, %v1446_v54  ;;  %v4844_v27 = vld [vmem:[%s4956_s8 + $0xa8] sm:$0xff]  ;;  %v5746_v51 = vpack.c.b16 %v1240_v37, %v1239_v26 }
 0x113   : > { %v857_v54 = vrot.slane %v4844_v27, 1 }
 0x114   : > { %7683 = vst [vmem:[#allocation65_spill] sm:$0xff] %v5732_v40 }
 0x115   : > { %v2067_v21 = vpop.f32.mrf.mxu1  ;;  %v878_v23 = vsel %vm7682_vm7, %v857_v54, %v858_v12 }
 0x116   : > { %v1938_v42 = vpop.f32.mrf.mxu0 }
 0x117   : > { %v1413_v29 = vpop.f32.mrf.mxu2  ;;  %4584 = vmatmul.msk.bf16.gmra.mxu3 %vm7685_vm13, %v5072_v38  ;;  %v442_v38 = vand.u32 15, %v280_v36  ;;  %vm7691_vm13 = vmmov %vm7687_vm5 }
 0x118   : > { %v1447_v19 = vadd.f32 %v5443_v52, %v1413_v29  ;;  %vm7693_vm2 = vmmov %vm7691_vm13 }
 0x119   : > { %vm5749_vm0 = vcmp.eq.s32.totalorder %v442_v38, 15 }
 0x11a   : > { %v1807_v53 = vpop.f32.mrf.mxu3  ;;  %v5739_v45 = vadd.f32 %v1584_v9, %v1447_v19  ;;  %v7688_v19 = vmov 0  ;;  %v922_v37 = vsel %vm5749_vm0, 0.0, %v878_v23 }
 0x11b   : > { %v7689_v19 = vsel %vm5749_vm0, 4294967295, %v7688_v19  ;;  %v1178_v27 = vpack.c.bf16 %v922_v37, %v922_v37 }
 0x11c   : > { %7686 = vst [vmem:[#allocation66_spill] sm:$0xff] %v5739_v45  ;;  %4567 = vmatmul.msk.bf16.gmra.mxu2 %vm7687_vm5, %v5682_v49  ;;  %vm7692_vm5 = vmmov %vm7682_vm7 }
 0x11d   : > { %v2070_v40 = vpop.f32.mrf.mxu1  ;;  %7690 = vst [vmem:[#allocation67_spill] sm:$0xff] %v7689_v19  ;;  %v879_v26 = vsel %vm7692_vm5, %v856_v48, %v857_v54  ;;  %vm7694_vm7 = vmmov %vm7693_vm2  ;;  %v1242_v54 = vunpack.c.l.b16 %v1178_v27 }
 0x11e   : > { %v1941_v4 = vpop.f32.mrf.mxu0 }
 0x11f   : > { %v1678_v52 = vpop.f32.mrf.mxu2 }
 0x120   : > { %v1758_v33 = vadd.f32 %v1678_v52, %v5449_v56  ;;  %4619 = vmatmul.msk.bf16.gmra.mxu1 %vm7691_vm13, %v5746_v51  ;;  %v1177_v56 = vpack.c.bf16 %v879_v26, %v879_v26 }
 0x121   : > { %4602 = vmatmul.msk.bf16.gmra.mxu0 %vm7693_vm2, %v5108_v10 }
 0x122   : > { %v1887_v9 = vadd.f32 %v1807_v53, %v1758_v33  ;;  %v1809_v29 = vpop.f32.mrf.mxu3  ;;  %v1241_v48 = vunpack.c.l.b16 %v1177_v56 }
 0x124   : > { %v2016_v38 = vadd.f32 %v1936_v62, %v1887_v9  ;;  %v860_v62 = vrot.slane %v5232_v59, 1  ;;  %v282_v9 = vadd.s32 184, %v4938_v6  ;;  %v5773_v26 = vpack.c.b16 %v1242_v54, %v1241_v48 }
 0x125   : > { %v2072_v52 = vpop.f32.mrf.mxu1 }
 0x126   : > { %v5763_v36 = vadd.f32 %v2065_v31, %v2016_v38  ;;  %v1943_v33 = vpop.f32.mrf.mxu0  ;;  %v876_v59 = vsel %vm7692_vm5, %v859_v17, %v860_v62 }
 0x127   : > { %v1680_v45 = vpop.f32.mrf.mxu2  ;;  %4585 = vmatmul.msk.bf16.gmra.mxu3 %vm7694_vm7, %v5127_v32  ;;  %vm7698_vm7 = vmmov %vm7693_vm2 }
 0x128   : > { %v1759_v53 = vadd.f32 %v1680_v45, %v5467_v18  ;;  %v456_v45 = vand.u32 15, %v282_v9  ;;  %vm7700_vm0 = vmmov %vm7698_vm7 }
 0x12a   : > { %v1888_v19 = vadd.f32 %v1809_v29, %v1759_v53  ;;  %v1812_v23 = vpop.f32.mrf.mxu3  ;;  %vm5778_vm13 = vcmp.eq.s32.totalorder %v456_v45, 15 }
 0x12b   : > { %v7696_v28 = vsel %vm5778_vm13, 4294967295, %v7695_v28  ;;  %v924_v27 = vsel %vm5778_vm13, 0.0, %v876_v59  ;;  %v861_v59 = vrot.slane %v5239_v15, 1  ;;  %v7702_v15 = vmov 0 }
 0x12c   : > { %4568 = vmatmul.msk.bf16.gmra.mxu2 %vm7693_vm2, %v5717_v35  ;;  %v2017_v31 = vadd.f32 %v1938_v42, %v1888_v19  ;;  %7697 = vst [vmem:[#allocation68_spill] sm:$0xff] %v7696_v28  ;;  %vm7699_vm2 = vmmov %vm7692_vm5  ;;  %v1180_v48 = vpack.c.bf16 %v924_v27, %v924_v27  ;;  %v7710_v28 = vld [vmem:[#allocation32_spill] sm:$0xff] }
 0x12d   : > { %v2075_v18 = vpop.f32.mrf.mxu1  ;;  %vm7701_vm5 = vmmov %vm7700_vm0 }
 0x12e   : > { %v5775_v37 = vadd.f32 %v2067_v21, %v2017_v31  ;;  %v1946_v56 = vpop.f32.mrf.mxu0  ;;  %v877_v21 = vsel %vm7699_vm2, %v858_v12, %v859_v17  ;;  %v1244_v12 = vunpack.c.l.b16 %v1180_v48 }
 0x12f   : > { %v1683_v38 = vpop.f32.mrf.mxu2  ;;  %v1179_v53 = vpack.c.bf16 %v877_v21, %v877_v21 }
 0x130   : > { %v1760_v29 = vadd.f32 %v1683_v38, %v5491_v1  ;;  %4620 = vmatmul.msk.bf16.gmra.mxu1 %vm7698_vm7, %v5773_v26 }
 0x131   : > { %4603 = vmatmul.msk.bf16.gmra.mxu0 %vm7700_vm0, %v5165_v20  ;;  %v1243_v17 = vunpack.c.l.b16 %v1179_v53 }
 0x132   : > { %v1889_v42 = vadd.f32 %v1812_v23, %v1760_v29  ;;  %v1814_v19 = vpop.f32.mrf.mxu3 }
 0x133   : > { %v5802_v21 = vpack.c.b16 %v1244_v12, %v1243_v17 }
 0x134   : > { %v2018_v1 = vadd.f32 %v1941_v4, %v1889_v42  ;;  %v862_v4 = vrot.slane %v5294_v61, 1  ;;  %v284_v42 = vadd.s32 200, %v4938_v6 }
 0x135   : > { %v2077_v31 = vpop.f32.mrf.mxu1 }
 0x136   : > { %v5792_v54 = vadd.f32 %v2070_v40, %v2018_v1  ;;  %v1948_v45 = vpop.f32.mrf.mxu0  ;;  %v470_v1 = vand.u32 15, %v284_v42  ;;  %v874_v61 = vsel %vm7699_vm2, %v861_v59, %v862_v4 }
 0x137   : > { %v1685_v9 = vpop.f32.mrf.mxu2  ;;  %4586 = vmatmul.msk.bf16.gmra.mxu3 %vm7701_vm5, %v5186_v47  ;;  %vm7705_vm5 = vmmov %vm7700_vm0 }
 0x138   : > { %v1761_v23 = vadd.f32 %v1685_v9, %v5501_v8  ;;  %vm5807_vm7 = vcmp.eq.s32.totalorder %v470_v1, 15  ;;  %vm7707_vm13 = vmmov %vm7705_vm5 }
 0x139   : > { %v7703_v15 = vsel %vm5807_vm7, 4294967295, %v7702_v15 }
 0x13a   : > { %v1890_v38 = vadd.f32 %v1814_v19, %v1761_v23  ;;  %v1817_v29 = vpop.f32.mrf.mxu3  ;;  %7704 = vst [vmem:[#allocation69_spill] sm:$0xff] %v7703_v15  ;;  %v926_v23 = vsel %vm5807_vm7, 0.0, %v874_v61  ;;  %v7709_v61 = vld [vmem:[#allocation25_spill] sm:$0xff] }
 0x13b   : > { %v1182_v12 = vpack.c.bf16 %v926_v23, %v926_v23  ;;  %v863_v15 = vrot.slane %v7709_v61, 1 }
 0x13c   : > { %4569 = vmatmul.msk.bf16.gmra.mxu2 %vm7700_vm0, %v5746_v51  ;;  %v2019_v40 = vadd.f32 %v1943_v33, %v1890_v38  ;;  %vm7706_vm0 = vmmov %vm7699_vm2 }
 0x13d   : > { %v2080_v8 = vpop.f32.mrf.mxu1  ;;  %vm7708_vm2 = vmmov %vm7705_vm5 }
 0x13e   : > { %v5804_v27 = vadd.f32 %v2072_v52, %v2019_v40  ;;  %v1951_v48 = vpop.f32.mrf.mxu0  ;;  %v875_v52 = vsel %vm7706_vm0, %v860_v62, %v861_v59  ;;  %v1246_v59 = vunpack.c.l.b16 %v1182_v12  ;;  %vm7718_vm7 = vmmov %vm7708_vm2 }
 0x13f   : > { %v1688_v53 = vpop.f32.mrf.mxu2  ;;  %v1181_v17 = vpack.c.bf16 %v875_v52, %v875_v52 }
 0x140   : > { %v1762_v19 = vadd.f32 %v1688_v53, %v5525_v16  ;;  %4621 = vmatmul.msk.bf16.gmra.mxu1 %vm7705_vm5, %v5802_v21 }
 0x141   : > { %4604 = vmatmul.msk.bf16.gmra.mxu0 %vm7707_vm13, %v5227_v55  ;;  %v1245_v62 = vunpack.c.l.b16 %v1181_v17  ;;  %vm7711_vm13 = vmmov %vm7708_vm2 }
 0x142   : > { %v1891_v33 = vadd.f32 %v1817_v29, %v1762_v19  ;;  %v1819_v9 = vpop.f32.mrf.mxu3 }
 0x143   : > { %v5831_v52 = vpack.c.b16 %v1246_v59, %v1245_v62 }
 0x144   : > { %v2020_v16 = vadd.f32 %v1946_v56, %v1891_v33  ;;  %v864_v56 = vrot.slane %v7710_v28, 1  ;;  %v286_v33 = vadd.s32 216, %v4938_v6 }
 0x145   : > { %v2082_v40 = vpop.f32.mrf.mxu1 }
 0x146   : > { %v5821_v38 = vadd.f32 %v2075_v18, %v2020_v16  ;;  %v1953_v1 = vpop.f32.mrf.mxu0  ;;  %v484_v16 = vand.u32 15, %v286_v33  ;;  %v872_v28 = vsel %vm7706_vm0, %v863_v15, %v864_v56 }
 0x147   : > { %v1690_v42 = vpop.f32.mrf.mxu2  ;;  %4587 = vmatmul.msk.bf16.gmra.mxu3 %vm7708_vm2, %v5248_v34 }
 0x148   : > { %v1763_v29 = vadd.f32 %v1690_v42, %v5535_v14  ;;  %vm5836_vm5 = vcmp.eq.s32.totalorder %v484_v16, 15  ;;  %v7713_v42 = vmov 0 }
 0x149   : > { %v7714_v42 = vsel %vm5836_vm5, 4294967295, %v7713_v42  ;;  %v928_v62 = vsel %vm5836_vm5, 0.0, %v872_v28 }
 0x14a   : > { %v1892_v53 = vadd.f32 %v1819_v9, %v1763_v29  ;;  %v1822_v19 = vpop.f32.mrf.mxu3  ;;  %7715 = vst [vmem:[#allocation32_spill] sm:$0xff] %v7714_v42  ;;  %v1184_v61 = vpack.c.bf16 %v928_v62, %v928_v62 }
 0x14c   : > { %4570 = vmatmul.msk.bf16.gmra.mxu2 %vm7711_vm13, %v5773_v26  ;;  %v2021_v18 = vadd.f32 %v1948_v45, %v1892_v53  ;;  %vm7716_vm13 = vmmov %vm7706_vm0 }
 0x14d   : > { %v2085_v14 = vpop.f32.mrf.mxu1  ;;  %vm7722_vm0 = vmmov %vm7708_vm2 }
 0x14e   : > { %v5833_v23 = vadd.f32 %v2077_v31, %v2021_v18  ;;  %v1956_v12 = vpop.f32.mrf.mxu0  ;;  %v873_v31 = vsel %vm7716_vm13, %v862_v4, %v863_v15  ;;  %vm7729_vm13 = vmmov %vm7722_vm0 }
 0x14f   : > { %v1693_v17 = vpop.f32.mrf.mxu2  ;;  %v1183_v53 = vpack.c.bf16 %v873_v31, %v873_v31  ;;  %vm7733_vm5 = vmmov %vm7729_vm13 }
 0x150   : > { %7712 = vst [vmem:[#allocation25_spill] sm:$0xff] %v5833_v23  ;;  %v1764_v9 = vadd.f32 %v1693_v17, %v5560_v13  ;;  %4622 = vmatmul.msk.bf16.gmra.mxu1 %vm7708_vm2, %v5831_v52  ;;  %v7717_v13 = vld [vmem:[#allocation24_spill] sm:$0xff] }
 0x151   : > { %4605 = vmatmul.msk.bf16.gmra.mxu0 %vm7718_vm7, %v7717_v13  ;;  %v1247_v17 = vunpack.c.l.b16 %v1183_v53  ;;  %vm7723_vm7 = vmmov %vm7722_vm0 }
 0x152   : > { %v1893_v45 = vadd.f32 %v1822_v19, %v1764_v9  ;;  %v1824_v29 = vpop.f32.mrf.mxu3  ;;  %v7721_v19 = vld [vmem:[#allocation26_spill] sm:$0xff]  ;;  %v1248_v9 = vunpack.c.l.b16 %v1184_v61 }
 0x154   : > { %v2022_v59 = vadd.f32 %v1951_v48, %v1893_v45  ;;  %v7724_v45 = vld [vmem:[#allocation33_spill] sm:$0xff]  ;;  %v5861_v62 = vpack.c.b16 %v1248_v9, %v1247_v17 }
 0x155   : > { %v5852_v33 = vpop.f32.mrf.mxu1  ;;  %v865_v31 = vrot.slane %v7724_v45, 1 }
 0x156   : > { %v5850_v18 = vadd.f32 %v2080_v8, %v2022_v59  ;;  %7720 = vst [vmem:[#allocation70_spill] sm:$0xff] %v5852_v33  ;;  %v1958_v15 = vpop.f32.mrf.mxu0  ;;  %v288_v8 = vadd.s32 232, %v4938_v6  ;;  %v5864_v59 = vld [vmem:[%s4956_s8 + $0xf0] sm:$0xff] }
 0x157   : > { %v1695_v16 = vpop.f32.mrf.mxu2  ;;  %4588 = vmatmul.msk.bf16.gmra.mxu3 %vm7722_vm0, %v7721_v19  ;;  %vm7730_vm0 = vcmp.lt.s32.totalorder %v4938_v6, 7 }
 0x158   : > { %7719 = vst [vmem:[#allocation24_spill] sm:$0xff] %v5850_v18  ;;  %v1765_v4 = vadd.f32 %v1695_v16, %v5570_v41  ;;  %v498_v16 = vand.u32 15, %v288_v8 }
 0x15a   : > { %v1894_v28 = vadd.f32 %v1824_v29, %v1765_v4  ;;  %v1827_v42 = vpop.f32.mrf.mxu3  ;;  %v866_v29 = vrot.slane %v5864_v59, 1  ;;  %vm5870_vm2 = vcmp.eq.s32.totalorder %v498_v16, 15 }
 0x15c   : > { %4571 = vmatmul.msk.bf16.gmra.mxu2 %vm7723_vm7, %v5802_v21  ;;  %v2023_v48 = vadd.f32 %v1953_v1, %v1894_v28  ;;  %v7726_v1 = vmov 0  ;;  %v870_v17 = vsel %vm7730_vm0, %v865_v31, %v866_v29  ;;  %vm7731_vm7 = vmmov %vm7730_vm0 }
 0x15d   : > { %v2090_v41 = vpop.f32.mrf.mxu1  ;;  %v7727_v1 = vsel %vm5870_vm2, 4294967295, %v7726_v1  ;;  %v871_v28 = vsel %vm7731_vm7, %v864_v56, %v865_v31 }
 0x15e   : > { %v5866_v33 = vadd.f32 %v2082_v40, %v2023_v48  ;;  %v1961_v4 = vpop.f32.mrf.mxu0  ;;  %7728 = vst [vmem:[#allocation71_spill] sm:$0xff] %v7727_v1  ;;  %v930_v48 = vsel %vm5870_vm2, 0.0, %v870_v17  ;;  %v1185_v16 = vpack.c.bf16 %v871_v28, %v871_v28 }
 0x15f   : > { %v1698_v53 = vpop.f32.mrf.mxu2 }
 0x160   : > { %7725 = vst [vmem:[#allocation33_spill] sm:$0xff] %v5866_v33  ;;  %v1766_v61 = vadd.f32 %v1698_v53, %v5595_v11  ;;  %4623 = vmatmul.msk.bf16.gmra.mxu1 %vm7729_vm13, %v5861_v62  ;;  %v7732_v11 = vld [vmem:[#allocation31_spill] sm:$0xff]  ;;  %v1186_v53 = vpack.c.bf16 %v930_v48, %v930_v48  ;;  %vm7736_vm13 = vmmov %vm7733_vm5 }
 0x161   : > { %4606 = vmatmul.msk.bf16.gmra.mxu0 %vm7733_vm5, %v7732_v11 }
 0x162   : > { %v1895_v40 = vadd.f32 %v1827_v42, %v1766_v61  ;;  %v1829_v9 = vpop.f32.mrf.mxu3  ;;  %v7735_v42 = vld [vmem:[#allocation34_spill] sm:$0xff]  ;;  %v1249_v61 = vunpack.c.l.b16 %v1185_v16  ;;  %v1250_v17 = vunpack.c.l.b16 %v1186_v53  ;;  %v7738_v53 = vmov 0 }
 0x164   : > { %v2024_v8 = vadd.f32 %v1956_v12, %v1895_v40  ;;  %v289_v40 = vadd.s32 240, %v4938_v6  ;;  %v5897_v28 = vpack.c.b16 %v1250_v17, %v1249_v61  ;;  %v737_v61 = vrot.slane %v5864_v59, 7 }
 0x165   : > { %v5886_v18 = vpop.f32.mrf.mxu1 }
 0x166   : > { %v5884_v33 = vadd.f32 %v2085_v14, %v2024_v8  ;;  %7734 = vst [vmem:[#allocation31_spill] sm:$0xff] %v5886_v18  ;;  %v1963_v31 = vpop.f32.mrf.mxu0  ;;  %v290_v14 = vadd.s32 248, %v4938_v6  ;;  %v4845_v18 = vld [vmem:[%s4956_s8 + $0xf8] sm:$0xff] }
 0x167   : > { %v1700_v19 = vpop.f32.mrf.mxu2  ;;  %4589 = vmatmul.msk.bf16.gmra.mxu3 %vm7736_vm13, %v7735_v42  ;;  %vm7742_vm13 = vmmov %vm7733_vm5 }
 0x168   : > { %v1767_v56 = vadd.f32 %v1700_v19, %v5605_v3  ;;  %v512_v8 = vand.u32 15, %v290_v14  ;;  %v867_v3 = vrot.slane %v4845_v18, 1  ;;  %vm7744_vm2 = vmmov %vm7742_vm13 }
 0x16a   : > { %v1896_v1 = vadd.f32 %v1829_v9, %v1767_v56  ;;  %v1832_v23 = vpop.f32.mrf.mxu3  ;;  %vm5901_vm0 = vcmp.eq.s32.totalorder %v512_v8, 15  ;;  %v505_v56 = vand.u32 15, %v289_v40  ;;  %v7748_v40 = vrot.slane %v7724_v45, 7 }
 0x16b   : > { %v7739_v53 = vsel %vm5901_vm0, 4294967295, %v7738_v53 }
 0x16c   : > { %4572 = vmatmul.msk.bf16.gmra.mxu2 %vm7733_vm5, %v5831_v52  ;;  %v5893_v12 = vadd.f32 %v1958_v15, %v1896_v1  ;;  %7740 = vst [vmem:[#allocation72_spill] sm:$0xff] %v7739_v53  ;;  %v7741_v15 = vrot.slane %v4980_v30, 1  ;;  %vm7743_vm5 = vmmov %vm7731_vm7  ;;  %vm5918_vm3 = vcmp.eq.s32.totalorder %v505_v56, 0 }
 0x16d   : > { %v2095_v48 = vpop.f32.mrf.mxu1 }
 0x16e   : > { %7737 = vst [vmem:[#allocation34_spill] sm:$0xff] %v5893_v12  ;;  %v1966_v9 = vpop.f32.mrf.mxu0  ;;  %v900_v1 = vsel %vm7731_vm7, %v867_v3, %v7741_v15  ;;  %vm7749_vm7 = vcmp.lt.s32.totalorder %v4938_v6, 1 }
 0x16f   : > { %v1703_v19 = vpop.f32.mrf.mxu2  ;;  %v932_v8 = vsel %vm5901_vm0, 0.0, %v900_v1  ;;  %v1076_v1 = vpack.c.bf16 %v4845_v18, %v4845_v18 }
 0x170   : > { %v1768_v16 = vadd.f32 %v1703_v19, %v5630_v50  ;;  %4624 = vmatmul.msk.bf16.gmra.mxu1 %vm7742_vm13, %v5897_v28  ;;  %v869_v50 = vsel %vm7743_vm5, %v866_v29, %v867_v3  ;;  %v7745_v19 = vmov 0  ;;  %v1188_v15 = vpack.c.bf16 %v932_v8, %v932_v8  ;;  %vm7752_vm13 = vmmov %vm7744_vm2 }
 0x171   : > { %4607 = vmatmul.msk.bf16.gmra.mxu0 %vm7744_vm2, %v5428_v7  ;;  %v7746_v19 = vsel %vm5918_vm3, 4294967295, %v7745_v19  ;;  %vm7755_vm2 = vmmov %vm7749_vm7 }
 0x172   : > { %v1897_v17 = vadd.f32 %v1832_v23, %v1768_v16  ;;  %v1834_v14 = vpop.f32.mrf.mxu3  ;;  %7747 = vst [vmem:[#allocation73_spill] sm:$0xff] %v7746_v19  ;;  %v741_v23 = vsel %vm7749_vm7, %v7748_v40, %v737_v61  ;;  %v1187_v16 = vpack.c.bf16 %v869_v50, %v869_v50  ;;  %vm7756_vm5 = vmmov %vm7752_vm13 }
 0x173   : > { %vm7757_vm7 = vmmov %vm7756_vm5 }
 0x174   : > { %v2026_v30 = vadd.f32 %v1961_v4, %v1897_v17  ;;  %v1075_v4 = vpack.c.bf16 %v5864_v59, %v5864_v59  ;;  %v7753_v17 = vld [vmem:[#allocation4_spill] sm:$0xff]  ;;  %v1251_v8 = vunpack.c.l.b16 %v1187_v16  ;;  %v1140_v59 = vunpack.c.l.b16 %v1076_v1 }
 0x175   : > { %v5928_v29 = vpop.f32.mrf.mxu1  ;;  %v7754_v53 = vrot.slane %v7753_v17, 7 }
 0x176   : > { %v5926_v12 = vadd.f32 %v2090_v41, %v2026_v30  ;;  %7751 = vst [vmem:[#allocation75_spill] sm:$0xff] %v5928_v29  ;;  %v1968_v45 = vpop.f32.mrf.mxu0  ;;  %v802_v41 = vsel %vm5918_vm3, 0.0, %v741_v23  ;;  %v1252_v30 = vunpack.c.l.b16 %v1188_v15  ;;  %v1139_v7 = vunpack.c.l.b16 %v1075_v4 }
 0x177   : > { %v1705_v3 = vpop.f32.mrf.mxu2  ;;  %4590 = vmatmul.msk.bf16.gmra.mxu3 %vm7752_vm13, %v5436_v25  ;;  %v740_v50 = vsel %vm7755_vm2, %v737_v61, %v7754_v53  ;;  %vm7758_vm13 = vmmov %vm7756_vm5 }
 0x178   : > { %7750 = vst [vmem:[#allocation74_spill] sm:$0xff] %v5926_v12  ;;  %v1769_v56 = vadd.f32 %v1705_v3, %v5640_v0  ;;  %v963_v12 = vpack.c.bf16 %v802_v41, %v802_v41  ;;  %v964_v25 = vpack.c.bf16 %v740_v50, %v740_v50  ;;  %v5945_v18 = vpack.c.b16 %v1252_v30, %v1251_v8  ;;  %vm7759_vm2 = vmmov %vm7756_vm5 }
 0x179   : > { %v5947_v23 = vpack.c.b16 %v1140_v59, %v1139_v7 }
 0x17a   : > { %v1898_v40 = vadd.f32 %v1834_v14, %v1769_v56  ;;  %v1837_v29 = vpop.f32.mrf.mxu3  ;;  %v1027_v61 = vunpack.c.l.b16 %v963_v12  ;;  %v1028_v17 = vunpack.c.l.b16 %v964_v25 }
 0x17c   : > { %4573 = vmatmul.msk.bf16.gmra.mxu2 %vm7756_vm5, %v5861_v62  ;;  %v5943_v0 = vadd.f32 %v1963_v31, %v1898_v40  ;;  %v5952_v1 = vpack.c.b16 %v1028_v17, %v1027_v61  ;;  %vm7760_vm5 = vmmov %vm7759_vm2 }
 0x17d   : > { %v2100_v3 = vpop.f32.mrf.mxu1 }
 0x17e   : > { %v1971_v16 = vpop.f32.mrf.mxu0 }
 0x17f   : > { %v1708_v53 = vpop.f32.mrf.mxu2 }
 0x180   : > { %v1770_v14 = vadd.f32 %v1708_v53, %v5665_v43  ;;  %4625 = vmatmul.msk.bf16.gmra.mxu1 %vm7757_vm7, %v5945_v18  ;;  %vm7761_vm7 = vmmov %vm7759_vm2 }
 0x181   : > { %4608 = vmatmul.msk.bf16.gmra.mxu0 %vm7758_vm13, %v5947_v23  ;;  %vm7762_vm13 = vmmov %vm7759_vm2 }
 0x182   : > { %v1899_v15 = vadd.f32 %v1837_v29, %v1770_v14  ;;  %v1839_v4 = vpop.f32.mrf.mxu3 }
 0x184   : > { %v2028_v31 = vadd.f32 %v1966_v9, %v1899_v15 }
 0x185   : > { %v5958_v12 = vpop.f32.mrf.mxu1 }
 0x186   : > { %v5956_v56 = vadd.f32 %v2095_v48, %v2028_v31  ;;  %v1973_v43 = vpop.f32.mrf.mxu0 }
 0x187   : > { %v1710_v7 = vpop.f32.mrf.mxu2  ;;  %4591 = vmatmul.msk.bf16.gmra.mxu3 %vm7759_vm2, %v5952_v1 }
 0x188   : > { %v1771_v25 = vadd.f32 %v1710_v7, %v5675_v46 }
 0x18a   : > { %v1900_v50 = vadd.f32 %v1839_v4, %v1771_v25  ;;  %v1842_v29 = vpop.f32.mrf.mxu3 }
 0x18c   : > { %4574 = vmatmul.msk.bf16.gmra.mxu2 %vm7760_vm5, %v5897_v28  ;;  %v5965_v41 = vadd.f32 %v1968_v45, %v1900_v50  ;;  %vm7763_vm5 = vmmov %vm7759_vm2 }
 0x18d   : > { %v2105_v8 = vpop.f32.mrf.mxu1 }
 0x18e   : > { %v1976_v30 = vpop.f32.mrf.mxu0 }
 0x18f   : > { %v1713_v9 = vpop.f32.mrf.mxu2 }
 0x190   : > { %v1772_v48 = vadd.f32 %v1713_v9, %v5700_v39 }
 0x191   : > { %4659 = vmatmul.msk.bf16.vlgmr.msra.gmra.mxu0 %vm7761_vm7, %v5471_v22  ;;  %vm7764_vm7 = vmmov %vm7759_vm2 }
 0x192   : > { %v1901_v40 = vadd.f32 %v1842_v29, %v1772_v48  ;;  %v1844_v59 = vpop.f32.mrf.mxu3  ;;  %v7765_v48 = vld [vmem:[#allocation14_spill] sm:$0xff] }
 0x194   : > { %v2030_v53 = vadd.f32 %v1971_v16, %v1901_v40 }
 0x195   : > { %v5972_v61 = vpop.f32.mrf.mxu1 }
 0x196   : > { %v5970_v46 = vadd.f32 %v2100_v3, %v2030_v53  ;;  %v1978_v14 = vpop.f32.mrf.mxu0 }
 0x197   : > { %v1715_v17 = vpop.f32.mrf.mxu2  ;;  %4643 = vmatmul.msk.bf16.vlgmr.msra.gmra.mxu3 %vm7762_vm13, %v5090_v58  ;;  %vm7766_vm13 = vmmov %vm7759_vm2 }
 0x198   : > { %v1773_v45 = vadd.f32 %v1715_v17, %v5710_v24 }
 0x19a   : > { %v1902_v15 = vadd.f32 %v1844_v59, %v1773_v45  ;;  %v1847_v39 = vpop.f32.mrf.mxu3 }
 0x19c   : > { %4627 = vmatmul.msk.bf16.vlgmr.msra.gmra.mxu2 %vm7759_vm2, %v5096_v63  ;;  %v5979_v4 = vadd.f32 %v1973_v43, %v1902_v15 }
 0x19d   : > { %v2110_v22 = vpop.f32.mrf.mxu1 }
 0x19e   : > { %v1981_v31 = vpop.f32.mrf.mxu0 }
 0x19f   : > { %v1718_v16 = vpop.f32.mrf.mxu2 }
 0x1a0   : > { %v1774_v3 = vadd.f32 %v1718_v16, %v5489_v2  ;;  %v7770_v16 = vld [vmem:[#allocation45_spill] sm:$0xff] }
 0x1a1   : > { %4660 = vmatmul.msk.bf16.gmra.mxu0 %vm7763_vm5, %v5505_v44  ;;  %vm7769_vm5 = vmmov %vm7759_vm2 }
 0x1a2   : > { %v1903_v7 = vadd.f32 %v1847_v39, %v1774_v3  ;;  %v1849_v25 = vpop.f32.mrf.mxu3  ;;  %v7768_v39 = vld [vmem:[#allocation17_spill] sm:$0xff] }
 0x1a4   : > { %v2032_v58 = vadd.f32 %v1976_v30, %v1903_v7 }
 0x1a5   : > { %v5986_v50 = vpop.f32.mrf.mxu1 }
 0x1a6   : > { %v5984_v24 = vadd.f32 %v2105_v8, %v2032_v58  ;;  %v1983_v43 = vpop.f32.mrf.mxu0  ;;  %v7767_v8 = vld [vmem:[#allocation44_spill] sm:$0xff] }
 0x1a7   : > { %v1720_v29 = vpop.f32.mrf.mxu2  ;;  %4644 = vmatmul.msk.bf16.gmra.mxu3 %vm7764_vm7, %v5147_v57  ;;  %vm7772_vm7 = vmmov %vm7759_vm2 }
 0x1a8   : > { %v1775_v63 = vadd.f32 %v1720_v29, %v5499_v5  ;;  %v7771_v29 = vld [vmem:[#allocation18_spill] sm:$0xff] }
 0x1aa   : > { %v1904_v9 = vadd.f32 %v1849_v25, %v1775_v63  ;;  %v1852_v2 = vpop.f32.mrf.mxu3 }
 0x1ac   : > { %4628 = vmatmul.msk.bf16.gmra.mxu2 %vm7766_vm13, %v7765_v48  ;;  %v5993_v40 = vadd.f32 %v1978_v14, %v1904_v9  ;;  %vm7775_vm13 = vmmov %vm7759_vm2 }
 0x1ad   : > { %v2115_v30 = vpop.f32.mrf.mxu1 }
 0x1ae   : > { %v1986_v53 = vpop.f32.mrf.mxu0 }
 0x1af   : > { %v1723_v44 = vpop.f32.mrf.mxu2 }
 0x1b0   : > { %v1776_v59 = vadd.f32 %v1723_v44, %v7767_v8  ;;  %v7774_v44 = vld [vmem:[#allocation49_spill] sm:$0xff] }
 0x1b1   : > { %4661 = vmatmul.msk.bf16.gmra.mxu0 %vm7759_vm2, %v5540_v60 }
 0x1b2   : > { %v1905_v17 = vadd.f32 %v1852_v2, %v1776_v59  ;;  %v1854_v45 = vpop.f32.mrf.mxu3 }
 0x1b4   : > { %v2034_v57 = vadd.f32 %v1981_v31, %v1905_v17  ;;  %v7773_v31 = vld [vmem:[#allocation47_spill] sm:$0xff] }
 0x1b5   : > { %v6003_v7 = vpop.f32.mrf.mxu1 }
 0x1b6   : > { %v5998_v5 = vadd.f32 %v2110_v22, %v2034_v57  ;;  %v1988_v3 = vpop.f32.mrf.mxu0  ;;  %v7776_v57 = vld [vmem:[#allocation21_spill] sm:$0xff] }
 0x1b7   : > { %v1725_v15 = vpop.f32.mrf.mxu2  ;;  %4645 = vmatmul.msk.bf16.gmra.mxu3 %vm7769_vm5, %v7768_v39  ;;  %vm7779_vm5 = vmmov %vm7759_vm2 }
 0x1b8   : > { %v1777_v14 = vadd.f32 %v1725_v15, %v7770_v16  ;;  %v7777_v15 = vld [vmem:[#allocation48_spill] sm:$0xff] }
 0x1ba   : > { %v1906_v25 = vadd.f32 %v1854_v45, %v1777_v14  ;;  %v1857_v58 = vpop.f32.mrf.mxu3 }
 0x1bc   : > { %4629 = vmatmul.msk.bf16.gmra.mxu2 %vm7772_vm7, %v7771_v29  ;;  %v6007_v63 = vadd.f32 %v1983_v43, %v1906_v25  ;;  %v7778_v25 = vld [vmem:[#allocation22_spill] sm:$0xff]  ;;  %vm7783_vm7 = vmmov %vm7759_vm2 }
 0x1bd   : > { %v2120_v8 = vpop.f32.mrf.mxu1 }
 0x1be   : > { %v1991_v9 = vpop.f32.mrf.mxu0 }
 0x1bf   : > { %v1728_v60 = vpop.f32.mrf.mxu2 }
 0x1c0   : > { %v1778_v22 = vadd.f32 %v1728_v60, %v7773_v31 }
 0x1c1   : > { %4662 = vmatmul.msk.bf16.gmra.mxu0 %vm7775_vm13, %v7774_v44  ;;  %v7782_v44 = vld [vmem:[#allocation53_spill] sm:$0xff]  ;;  %vm7785_vm13 = vmmov %vm7759_vm2 }
 0x1c2   : > { %v1907_v2 = vadd.f32 %v1857_v58, %v1778_v22  ;;  %v1859_v48 = vpop.f32.mrf.mxu3 }
 0x1c4   : > { %v2036_v59 = vadd.f32 %v1986_v53, %v1907_v2  ;;  %v7781_v53 = vld [vmem:[#allocation51_spill] sm:$0xff] }
 0x1c5   : > { %v6021_v29 = vpop.f32.mrf.mxu1 }
 0x1c6   : > { %v6012_v17 = vadd.f32 %v2115_v30, %v2036_v59  ;;  %v1993_v39 = vpop.f32.mrf.mxu0  ;;  %7780 = vst [vmem:[#allocation4_spill] sm:$0xff] %v6021_v29 }
 0x1c7   : > { %v1730_v45 = vpop.f32.mrf.mxu2  ;;  %4646 = vmatmul.msk.bf16.gmra.mxu3 %vm7759_vm2, %v7776_v57  ;;  %v7784_v57 = vld [vmem:[#allocation28_spill] sm:$0xff] }
 0x1c8   : > { %v1779_v43 = vadd.f32 %v1730_v45, %v7777_v15  ;;  %v7786_v15 = vld [vmem:[#allocation52_spill] sm:$0xff] }
 0x1ca   : > { %v1908_v16 = vadd.f32 %v1859_v48, %v1779_v43  ;;  %v1862_v14 = vpop.f32.mrf.mxu3 }
 0x1cc   : > { %4630 = vmatmul.msk.bf16.gmra.mxu2 %vm7779_vm5, %v7778_v25  ;;  %v6019_v58 = vadd.f32 %v1988_v3, %v1908_v16  ;;  %vm7792_vm5 = vmmov %vm7759_vm2 }
 0x1cd   : > { %v2125_v3 = vpop.f32.mrf.mxu1 }
 0x1ce   : > { %v1996_v31 = vpop.f32.mrf.mxu0 }
 0x1cf   : > { %v1733_v60 = vpop.f32.mrf.mxu2 }
 0x1d0   : > { %v1780_v30 = vadd.f32 %v1733_v60, %v7781_v53  ;;  %v7787_v60 = vld [vmem:[#allocation29_spill] sm:$0xff] }
 0x1d1   : > { %4663 = vmatmul.msk.bf16.gmra.mxu0 %vm7783_vm7, %v7782_v44  ;;  %vm7794_vm7 = vmmov %vm7759_vm2 }
 0x1d2   : > { %v1909_v22 = vadd.f32 %v1862_v14, %v1780_v30  ;;  %v1864_v2 = vpop.f32.mrf.mxu3  ;;  %v7789_v30 = vld [vmem:[#allocation55_spill] sm:$0xff] }
 0x1d4   : > { %v2038_v59 = vadd.f32 %v1991_v9, %v1909_v22 }
 0x1d5   : > { %v6036_v22 = vpop.f32.mrf.mxu1 }
 0x1d6   : > { %v6026_v45 = vadd.f32 %v2120_v8, %v2038_v59  ;;  %v1998_v16 = vpop.f32.mrf.mxu0  ;;  %7790 = vst [vmem:[#allocation44_spill] sm:$0xff] %v6036_v22 }
 0x1d7   : > { %v1735_v48 = vpop.f32.mrf.mxu2  ;;  %4647 = vmatmul.msk.bf16.gmra.mxu3 %vm7785_vm13, %v7784_v57  ;;  %v7791_v57 = vld [vmem:[#allocation57_spill] sm:$0xff]  ;;  %vm7797_vm13 = vmmov %vm7759_vm2 }
 0x1d8   : > { %v1781_v43 = vadd.f32 %v1735_v48, %v7786_v15 }
 0x1da   : > { %v1910_v25 = vadd.f32 %v1864_v2, %v1781_v43  ;;  %v1867_v19 = vpop.f32.mrf.mxu3  ;;  %v7793_v43 = vld [vmem:[#allocation36_spill] sm:$0xff] }
 0x1dc   : > { %4631 = vmatmul.msk.bf16.gmra.mxu2 %vm7759_vm2, %v7787_v60  ;;  %v6033_v14 = vadd.f32 %v1993_v39, %v1910_v25  ;;  %v7795_v39 = vld [vmem:[#allocation56_spill] sm:$0xff] }
 0x1de   : > { %7788 = vst [vmem:[#allocation14_spill] sm:$0xff] %v6033_v14  ;;  %v2001_v8 = vpop.f32.mrf.mxu0  ;;  %v7796_v14 = vld [vmem:[#allocation37_spill] sm:$0xff] }
 0x1df   : > { %v1738_v53 = vpop.f32.mrf.mxu2 }
 0x1e0   : > { %v1782_v9 = vadd.f32 %v1738_v53, %v7789_v30  ;;  %v2130_v30 = vpop.f32.mrf.mxu1 }
 0x1e1   : > { %4664 = vmatmul.msk.bf16.gmra.mxu0 %vm7792_vm5, %v7791_v57  ;;  %v7798_v57 = vld [vmem:[#allocation59_spill] sm:$0xff]  ;;  %vm7802_vm5 = vmmov %vm7759_vm2 }
 0x1e2   : > { %v1911_v44 = vadd.f32 %v1867_v19, %v1782_v9  ;;  %v1869_v59 = vpop.f32.mrf.mxu3 }
 0x1e4   : > { %v2040_v48 = vadd.f32 %v1996_v31, %v1911_v44 }
 0x1e6   : > { %v6040_v15 = vadd.f32 %v2125_v3, %v2040_v48  ;;  %v2003_v60 = vpop.f32.mrf.mxu0 }
 0x1e7   : > { %v1740_v2 = vpop.f32.mrf.mxu2  ;;  %4648 = vmatmul.msk.bf16.gmra.mxu3 %vm7794_vm7, %v7793_v43  ;;  %vm7468_vm7 = vcmask 1043456  }
 0x1e8   : > { %v1783_v25 = vadd.f32 %v1740_v2, %v7795_v39  ;;  %v6052_v2 = vpop.f32.mrf.mxu1 }
 0x1e9   : > { %7799 = vst [vmem:[#allocation17_spill] sm:$0xff] %v6052_v2 }
 0x1ea   : > { %v1912_v29 = vadd.f32 %v1869_v59, %v1783_v25  ;;  %v1872_v53 = vpop.f32.mrf.mxu3  ;;  %v7801_v25 = vld [vmem:[#allocation3_spill] sm:$0xff] }
 0x1ec   : > { %4632 = vmatmul.msk.bf16.gmra.mxu2 %vm7797_vm13, %v7796_v14  ;;  %v6047_v19 = vadd.f32 %v1998_v16, %v1912_v29  ;;  %v7803_v29 = vld [vmem:[#allocation60_spill] sm:$0xff]  ;;  %vm7805_vm13 = vmmov %vm7759_vm2 }
 0x1ee   : > { %v2006_v3 = vpop.f32.mrf.mxu0 }
 0x1ef   : > { %v1743_v9 = vpop.f32.mrf.mxu2 }
 0x1f0   : > { %v1784_v31 = vadd.f32 %v1743_v9, %v7798_v57 }
 0x1f1   : > { %4665 = vmatmul.msk.bf16.gmra.mxu0 %vm7759_vm2, %v5682_v49 }
 0x1f2   : > { %v1913_v44 = vadd.f32 %v1872_v53, %v1784_v31  ;;  %v1874_v48 = vpop.f32.mrf.mxu3  ;;  %v3119_v53 = vld [vmem:[%s7372_s3] sm:$0xf]  ;;  %v2135_v31 = vpop.f32.mrf.mxu1 }
 0x1f3   : > { %v3170_v49 = vsel %vm7468_vm7, %v3119_v53, 0  ;;  %vm7824_vm7 = vcmp.lt.s32.totalorder %v4938_v6, 7 }
 0x1f4   : > { %v2042_v43 = vadd.f32 %v2001_v8, %v1913_v44  ;;  %v7804_v8 = vld [vmem:[#allocation6_spill] sm:$0xff]  ;;  %3179 = vmatpush.bf16.msra.mxu1 %v3170_v49  ;;  %v7807_v44 = vmov 0  }
 0x1f6   : > { %v6054_v59 = vadd.f32 %v2130_v30, %v2042_v43  ;;  %v2008_v14 = vpop.f32.mrf.mxu0  ;;  %v7808_v43 = vld [vmem:[#allocation62_spill] sm:$0xff] }
 0x1f7   : > { %v1745_v39 = vpop.f32.mrf.mxu2  ;;  %4649 = vmatmul.msk.bf16.gmra.mxu3 %vm7802_vm5, %v7801_v25  ;;  %3180 = vmatmul.bf16.vlgmr.msra.gmra.mxu1 %v7807_v44  ;;  %vm7811_vm5 = vmmov %vm7759_vm2 }
 0x1f8   : > { %7800 = vst [vmem:[#allocation45_spill] sm:$0xff] %v6054_v59  ;;  %v1785_v16 = vadd.f32 %v1745_v39, %v7803_v29 }
 0x1fa   : > { %v1914_v22 = vadd.f32 %v1874_v48, %v1785_v16  ;;  %v1877_v9 = vpop.f32.mrf.mxu3 }
 0x1fc   : > { %4633 = vmatmul.msk.bf16.gmra.mxu2 %vm7805_vm13, %v7804_v8  ;;  %v6065_v30 = vadd.f32 %v2003_v60, %v1914_v22  ;;  %v7810_v8 = vld [vmem:[#allocation8_spill] sm:$0xff]  ;;  %v7812_v22 = vld [vmem:[#allocation63_spill] sm:$0xff]  ;;  %vm7814_vm13 = vmmov %vm7759_vm2 }
 0x1fe   : > { %7806 = vst [vmem:[#allocation18_spill] sm:$0xff] %v6065_v30  ;;  %v2011_v39 = vpop.f32.mrf.mxu0  ;;  %v6076_v30 = vpop.f32.mrf.mxu1 }
 0x1ff   : > { %v1748_v57 = vpop.f32.mrf.mxu2 }
 0x200   : > { %v1786_v48 = vadd.f32 %v1748_v57, %v7808_v43  ;;  %v7813_v43 = vld [vmem:[#allocation10_spill] sm:$0xff] }
 0x201   : > { %4666 = vmatmul.msk.bf16.gmra.mxu0 %vm7759_vm2, %v5717_v35 }
 0x202   : > { %v1915_v25 = vadd.f32 %v1877_v9, %v1786_v48  ;;  %v1879_v29 = vpop.f32.mrf.mxu3 }
 0x204   : > { %v2044_v16 = vadd.f32 %v2006_v3, %v1915_v25  ;;  %v7815_v3 = vld [vmem:[#allocation65_spill] sm:$0xff] }
 0x206   : > { %v6071_v53 = vadd.f32 %v2135_v31, %v2044_v16  ;;  %v2013_v49 = vpop.f32.mrf.mxu0 }
 0x207   : > { %v1750_v2 = vpop.f32.mrf.mxu2  ;;  %4650 = vmatmul.msk.bf16.gmra.mxu3 %vm7811_vm5, %v7810_v8  ;;  %vm7816_vm5 = vmmov %vm7759_vm2 }
 0x208   : > { %7809 = vst [vmem:[#allocation47_spill] sm:$0xff] %v6071_v53  ;;  %v1787_v60 = vadd.f32 %v1750_v2, %v7812_v22  ;;  %v2140_v53 = vpop.f32.mrf.mxu1  ;;  %v7817_v22 = vld [vmem:[#allocation66_spill] sm:$0xff] }
 0x20a   : > { %v1916_v59 = vadd.f32 %v1879_v29, %v1787_v60  ;;  %v1882_v57 = vpop.f32.mrf.mxu3 }
 0x20c   : > { %4634 = vmatmul.msk.bf16.gmra.mxu2 %vm7814_vm13, %v7813_v43  ;;  %v6080_v9 = vadd.f32 %v2008_v14, %v1916_v59  ;;  %vm7818_vm13 = vmmov %vm7759_vm2 }
 0x20e   : > { %v2443_v48 = vpop.f32.mrf.mxu0 }
 0x20f   : > { %v1753_v35 = vpop.f32.mrf.mxu2 }
 0x210   : > { %v1788_v31 = vadd.f32 %v1753_v35, %v7815_v3 }
 0x211   : > { %4667 = vmatmul.msk.bf16.gmra.mxu0 %vm7759_vm2, %v5746_v51 }
 0x212   : > { %v1917_v25 = vadd.f32 %v1882_v57, %v1788_v31  ;;  %v1884_v16 = vpop.f32.mrf.mxu3 }
 0x214   : > { %v2046_v2 = vadd.f32 %v2011_v39, %v1917_v25 }
 0x216   : > { %v6085_v8 = vadd.f32 %v2140_v53, %v2046_v2  ;;  %v2445_v14 = vpop.f32.mrf.mxu0 }
 0x217   : > { %v1755_v29 = vpop.f32.mrf.mxu2  ;;  %4651 = vmatmul.msk.bf16.gmra.mxu3 %vm7816_vm5, %v5108_v10  ;;  %vm7819_vm5 = vmmov %vm7759_vm2 }
 0x218   : > { %v1789_v59 = vadd.f32 %v1755_v29, %v7817_v22 }
 0x21a   : > { %v1918_v60 = vadd.f32 %v1884_v16, %v1789_v59  ;;  %v2317_v43 = vpop.f32.mrf.mxu3 }
 0x21c   : > { %4635 = vmatmul.msk.bf16.gmra.mxu2 %vm7818_vm13, %v5127_v32  ;;  %v6092_v57 = vadd.f32 %v2013_v49, %v1918_v60  ;;  %vm7821_vm13 = vmmov %vm7759_vm2 }
 0x21e   : > { %v2448_v39 = vpop.f32.mrf.mxu0 }
 0x21f   : > { %v2191_v35 = vpop.f32.mrf.mxu2 }
 0x220   : > { %v2271_v51 = vadd.f32 %v2191_v35, %v5763_v36 }
 0x221   : > { %4668 = vmatmul.msk.bf16.gmra.mxu0 %vm7759_vm2, %v5773_v26  ;;  %vm7822_vm2 = vcmp.lt.s32.totalorder %v4938_v6, 1 }
 0x222   : > { %v2397_v53 = vadd.f32 %v2317_v43, %v2271_v51  ;;  %v2319_v3 = vpop.f32.mrf.mxu3 }
 0x224   : > { %v2523_v10 = vadd.f32 %v2443_v48, %v2397_v53 }
 0x226   : > { %v2450_v16 = vpop.f32.mrf.mxu0  ;;  %v6100_v32 = vmax.f32 %v2523_v10, 0.0 }
 0x227   : > { %v2193_v31 = vpop.f32.mrf.mxu2  ;;  %4652 = vmatmul.msk.bf16.gmra.mxu3 %vm7819_vm5, %v5165_v20 }
 0x228   : > { %v2272_v25 = vadd.f32 %v2193_v31, %v5775_v37  ;;  %7820 = vst [vmem:[#allocation49_spill] sm:$0xff] %v6100_v32  ;;  %v2891_v36 = vpack.c.bf16 %v6100_v32, %v6100_v32  ;;  %v7470_v22 = vrot.slane %v6100_v32, 7 }
 0x22a   : > { %v2398_v49 = vadd.f32 %v2319_v3, %v2272_v25  ;;  %v2322_v2 = vpop.f32.mrf.mxu3  ;;  %v2955_v51 = vunpack.c.l.b16 %v2891_v36 }
 0x22c   : > { %v2524_v29 = vadd.f32 %v2445_v14, %v2398_v49  ;;  %4636 = vmatmul.msk.bf16.gmra.mxu2 %vm7821_vm13, %v5186_v47  ;;  %vm7823_vm13 = vmmov %vm7819_vm5 }
 0x22e   : > { %v2556_v26 = vmax.f32 %v2524_v29, 0.0  ;;  %v2453_v37 = vpop.f32.mrf.mxu0 }
 0x22f   : > { %v2196_v48 = vpop.f32.mrf.mxu2 }
 0x230   : > { %v2588_v59 = vrot.slane %v2556_v26, 7  ;;  %v2273_v20 = vadd.f32 %v2196_v48, %v5792_v54  ;;  %v2892_v60 = vpack.c.bf16 %v2556_v26, %v2556_v26  ;;  %v2684_v14 = vrot.slane %v2556_v26, 1 }
 0x231   : > { %4669 = vmatmul.msk.bf16.gmra.mxu0 %vm7819_vm5, %v5802_v21  ;;  %v7469_v54 = vrot.slane %v6100_v32, 1  ;;  %vm7826_vm5 = vcmp.lt.s32.totalorder %v4938_v6, 1 }
 0x232   : > { %v2399_v43 = vadd.f32 %v2322_v2, %v2273_v20  ;;  %v2324_v35 = vpop.f32.mrf.mxu3  ;;  %v2956_v53 = vunpack.c.l.b16 %v2892_v60  ;;  %v6112_v47 = vsel %vm7822_vm2, %v7470_v22, %v2588_v59  ;;  %vm7825_vm2 = vmmov %vm7824_vm7 }
 0x233   : > { %v2745_v49 = vsel %vm7824_vm7, %v7469_v54, %v2684_v14  ;;  %vm7828_vm7 = vmmov %vm7823_vm13 }
 0x234   : > { %v2525_v3 = vadd.f32 %v2448_v39, %v2399_v43  ;;  %v6116_v10 = vpack.c.b16 %v2956_v53, %v2955_v51  ;;  %v3003_v20 = vpack.c.bf16 %v2745_v49, %v2745_v49 }
 0x236   : > { %v2557_v31 = vmax.f32 %v2525_v3, 0.0  ;;  %v2455_v21 = vpop.f32.mrf.mxu0 }
 0x237   : > { %v2198_v25 = vpop.f32.mrf.mxu2  ;;  %4653 = vmatmul.msk.bf16.gmra.mxu3 %vm7823_vm13, %v5227_v55  ;;  %vm7831_vm13 = vmmov %vm7826_vm5 }
 0x238   : > { %v2589_v2 = vrot.slane %v2557_v31, 7  ;;  %v2685_v29 = vrot.slane %v2557_v31, 1  ;;  %v2274_v36 = vadd.f32 %v2198_v25, %v5804_v27  ;;  %v3067_v27 = vunpack.c.l.b16 %v3003_v20 }
 0x239   : > { %v2893_v54 = vpack.c.bf16 %v2557_v31, %v2557_v31 }
 0x23a   : > { %v2400_v39 = vadd.f32 %v2324_v35, %v2274_v36  ;;  %v2327_v26 = vpop.f32.mrf.mxu3  ;;  %v2744_v48 = vsel %vm7825_vm2, %v2684_v14, %v2685_v29  ;;  %v2648_v60 = vsel %vm7826_vm5, %v2588_v59, %v2589_v2 }
 0x23b   : > { %v2748_v43 = vsel %vm5408_vm4, 0.0, %v2744_v48  ;;  %v2653_v36 = vsel %vm5057_vm6, 0.0, %v2648_v60  ;;  %vm7830_vm4 = vmmov %vm7825_vm2  ;;  %v2957_v31 = vunpack.c.l.b16 %v2893_v54 }
 0x23c   : > { %v2526_v51 = vadd.f32 %v2450_v16, %v2400_v39  ;;  %4637 = vmatmul.msk.bf16.gmra.mxu2 %vm7828_vm7, %v5248_v34  ;;  %v3004_v53 = vpack.c.bf16 %v2748_v43, %v2748_v43  ;;  %v2781_v39 = vpack.c.bf16 %v2653_v36, %v2653_v36  ;;  %vm7832_vm6 = vmmov %vm7828_vm7  ;;  %v7836_v36 = vld [vmem:[#allocation25_spill] sm:$0xff] }
 0x23d   : > { %vm7834_vm2 = vmmov %vm7832_vm6 }
 0x23e   : > { %v2558_v3 = vmax.f32 %v2526_v51, 0.0  ;;  %v3068_v25 = vunpack.c.l.b16 %v3004_v53  ;;  %v2458_v32 = vpop.f32.mrf.mxu0  ;;  %vm7837_vm5 = vmmov %vm7830_vm4 }
 0x23f   : > { %v2201_v14 = vpop.f32.mrf.mxu2  ;;  %vm7838_vm7 = vmmov %vm7831_vm13 }
 0x240   : > { %v2590_v49 = vrot.slane %v2558_v3, 7  ;;  %v2686_v22 = vrot.slane %v2558_v3, 1  ;;  %v2275_v59 = vadd.f32 %v2201_v14, %v5821_v38  ;;  %v6137_v55 = vpack.c.b16 %v3068_v25, %v3067_v27 }
 0x241   : > { %v2894_v16 = vpack.c.bf16 %v2558_v3, %v2558_v3  ;;  %4670 = vmatmul.msk.bf16.gmra.mxu0 %vm7832_vm6, %v5831_v52  ;;  %v2845_v27 = vunpack.c.l.b16 %v2781_v39  ;;  %vm7849_vm6 = vmmov %vm7834_vm2 }
 0x242   : > { %v2401_v48 = vadd.f32 %v2327_v26, %v2275_v59  ;;  %v2329_v34 = vpop.f32.mrf.mxu3  ;;  %v2743_v20 = vsel %vm7830_vm4, %v2685_v29, %v2686_v22  ;;  %v2647_v43 = vsel %vm7831_vm13, %v2589_v2, %v2590_v49  ;;  %vm7841_vm4 = vmmov %vm7834_vm2 }
 0x243   : > { %v2958_v60 = vunpack.c.l.b16 %v2894_v16  ;;  %v2782_v51 = vpack.c.bf16 %v2647_v43, %v2647_v43  ;;  %v3005_v16 = vpack.c.bf16 %v2743_v20, %v2743_v20  ;;  %vm7846_vm13 = vmmov %vm7838_vm7 }
 0x244   : > { %v2527_v38 = vadd.f32 %v2453_v37, %v2401_v48 }
 0x245   : > { %v6145_v53 = vpack.c.b16 %v2958_v60, %v2957_v31  ;;  %v2846_v3 = vunpack.c.l.b16 %v2782_v51  ;;  %v7840_v31 = vld [vmem:[#allocation26_spill] sm:$0xff] }
 0x246   : > { %v2559_v25 = vmax.f32 %v2527_v38, 0.0  ;;  %v2460_v52 = vpop.f32.mrf.mxu0  ;;  %v3069_v38 = vunpack.c.l.b16 %v3005_v16 }
 0x247   : > { %7833 = vst [vmem:[#allocation21_spill] sm:$0xff] %v6145_v53  ;;  %v2203_v26 = vpop.f32.mrf.mxu2  ;;  %4654 = vmatmul.msk.bf16.gmra.mxu3 %vm7834_vm2, %v7717_v13  ;;  %v6149_v29 = vpack.c.b16 %v2846_v3, %v2845_v27 }
 0x248   : > { %v2591_v35 = vrot.slane %v2559_v25, 7  ;;  %v2687_v2 = vrot.slane %v2559_v25, 1  ;;  %v2276_v14 = vadd.f32 %v2203_v26, %v7836_v36  ;;  %v2895_v26 = vpack.c.bf16 %v2559_v25, %v2559_v25 }
 0x249   : > { %7835 = vst [vmem:[#allocation48_spill] sm:$0xff] %v6149_v29 }
 0x24a   : > { %v2402_v54 = vadd.f32 %v2329_v34, %v2276_v14  ;;  %v2332_v59 = vpop.f32.mrf.mxu3  ;;  %v2742_v37 = vsel %vm7837_vm5, %v2686_v22, %v2687_v2  ;;  %v2646_v39 = vsel %vm7838_vm7, %v2590_v49, %v2591_v35  ;;  %v7843_v14 = vld [vmem:[#allocation24_spill] sm:$0xff]  ;;  %v2959_v25 = vunpack.c.l.b16 %v2895_v26 }
 0x24b   : > { %v2750_v43 = vsel %vm5451_vm1, 0.0, %v2742_v37  ;;  %v2655_v3 = vsel %vm5101_vm8, 0.0, %v2646_v39  ;;  %vm7845_vm1 = vmmov %vm7837_vm5 }
 0x24c   : > { %v2528_v13 = vadd.f32 %v2455_v21, %v2402_v54  ;;  %4638 = vmatmul.msk.bf16.gmra.mxu2 %vm7841_vm4, %v7840_v31  ;;  %v3006_v60 = vpack.c.bf16 %v2750_v43, %v2750_v43  ;;  %v2783_v54 = vpack.c.bf16 %v2655_v3, %v2655_v3  ;;  %vm7847_vm8 = vmmov %vm7834_vm2 }
 0x24d   : > { %vm7851_vm2 = vmmov %vm7845_vm1 }
 0x24e   : > { %v2560_v51 = vmax.f32 %v2528_v13, 0.0  ;;  %v3070_v27 = vunpack.c.l.b16 %v3006_v60  ;;  %v2463_v29 = vpop.f32.mrf.mxu0  ;;  %vm7852_vm5 = vmmov %vm7838_vm7 }
 0x24f   : > { %v2206_v22 = vpop.f32.mrf.mxu2  ;;  %vm7854_vm7 = vmmov %vm7841_vm4 }
 0x250   : > { %v2592_v20 = vrot.slane %v2560_v51, 7  ;;  %v2688_v36 = vrot.slane %v2560_v51, 1  ;;  %v2277_v49 = vadd.f32 %v2206_v22, %v7843_v14  ;;  %v6163_v48 = vpack.c.b16 %v3070_v27, %v3069_v38  ;;  %v7850_v22 = vld [vmem:[#allocation33_spill] sm:$0xff]  ;;  %vm7858_vm4 = vmmov %vm7852_vm5 }
 0x251   : > { %v2896_v21 = vpack.c.bf16 %v2560_v51, %v2560_v51  ;;  %4671 = vmatmul.msk.bf16.gmra.mxu0 %vm7847_vm8, %v5861_v62  ;;  %v2847_v38 = vunpack.c.l.b16 %v2783_v54  ;;  %vm7867_vm8 = vmmov %vm7858_vm4 }
 0x252   : > { %7844 = vst [vmem:[#allocation22_spill] sm:$0xff] %v6163_v48  ;;  %v2403_v37 = vadd.f32 %v2332_v59, %v2277_v49  ;;  %v2334_v31 = vpop.f32.mrf.mxu3  ;;  %v2741_v16 = vsel %vm7845_vm1, %v2687_v2, %v2688_v36  ;;  %v2645_v43 = vsel %vm7846_vm13, %v2591_v35, %v2592_v20  ;;  %vm7866_vm13 = vmmov %vm7851_vm2 }
 0x253   : > { %v2960_v39 = vunpack.c.l.b16 %v2896_v21  ;;  %v2784_v13 = vpack.c.bf16 %v2645_v43, %v2645_v43  ;;  %v3007_v21 = vpack.c.bf16 %v2741_v16, %v2741_v16 }
 0x254   : > { %v2529_v60 = vadd.f32 %v2458_v32, %v2403_v37 }
 0x255   : > { %v6171_v34 = vpack.c.b16 %v2960_v39, %v2959_v25  ;;  %v2848_v51 = vunpack.c.l.b16 %v2784_v13  ;;  %v3071_v13 = vunpack.c.l.b16 %v3007_v21 }
 0x256   : > { %v2561_v27 = vmax.f32 %v2529_v60, 0.0  ;;  %v2465_v62 = vpop.f32.mrf.mxu0 }
 0x257   : > { %7848 = vst [vmem:[#allocation51_spill] sm:$0xff] %v6171_v34  ;;  %v2208_v59 = vpop.f32.mrf.mxu2  ;;  %4655 = vmatmul.msk.bf16.gmra.mxu3 %vm7849_vm6, %v7732_v11  ;;  %v6175_v2 = vpack.c.b16 %v2848_v51, %v2847_v38 }
 0x258   : > { %v2593_v3 = vrot.slane %v2561_v27, 7  ;;  %v2689_v35 = vrot.slane %v2561_v27, 1  ;;  %v2278_v14 = vadd.f32 %v2208_v59, %v7850_v22  ;;  %v2897_v51 = vpack.c.bf16 %v2561_v27, %v2561_v27 }
 0x25a   : > { %v2404_v26 = vadd.f32 %v2334_v31, %v2278_v14  ;;  %v2337_v49 = vpop.f32.mrf.mxu3  ;;  %v2740_v32 = vsel %vm7851_vm2, %v2688_v36, %v2689_v35  ;;  %v2644_v54 = vsel %vm7852_vm5, %v2592_v20, %v2593_v3  ;;  %v2961_v27 = vunpack.c.l.b16 %v2897_v51 }
 0x25b   : > { %v2752_v43 = vsel %vm5476_vm9, 0.0, %v2740_v32  ;;  %v2657_v38 = vsel %vm5158_vm10, 0.0, %v2644_v54  ;;  %vm7857_vm9 = vmmov %vm7845_vm1  ;;  %vm7876_vm5 = vcmask 1043456  }
 0x25c   : > { %v2530_v11 = vadd.f32 %v2460_v52, %v2404_v26  ;;  %4639 = vmatmul.msk.bf16.gmra.mxu2 %vm7854_vm7, %v7735_v42  ;;  %v3008_v25 = vpack.c.bf16 %v2752_v43, %v2752_v43  ;;  %v2785_v26 = vpack.c.bf16 %v2657_v38, %v2657_v38  ;;  %vm7859_vm10 = vmmov %vm7849_vm6 }
 0x25d   : > { %vm7864_vm1 = vmmov %vm7849_vm6 }
 0x25e   : > { %v2562_v39 = vmax.f32 %v2530_v11, 0.0  ;;  %v3072_v60 = vunpack.c.l.b16 %v3008_v25  ;;  %v2468_v22 = vpop.f32.mrf.mxu0  ;;  %v2849_v25 = vunpack.c.l.b16 %v2785_v26  ;;  %vm7870_vm6 = vmmov %vm7864_vm1 }
 0x25f   : > { %v2211_v36 = vpop.f32.mrf.mxu2  ;;  %vm7879_vm7 = vmmov %vm7864_vm1 }
 0x260   : > { %v2594_v16 = vrot.slane %v2562_v39, 7  ;;  %v2690_v59 = vrot.slane %v2562_v39, 1  ;;  %v2279_v20 = vadd.f32 %v2211_v36, %v5884_v33  ;;  %v6189_v14 = vpack.c.b16 %v3072_v60, %v3071_v13  ;;  %v7861_v13 = vld [vmem:[#allocation34_spill] sm:$0xff] }
 0x261   : > { %v2898_v52 = vpack.c.bf16 %v2562_v39, %v2562_v39  ;;  %4672 = vmatmul.msk.bf16.gmra.mxu0 %vm7859_vm10, %v5897_v28 }
 0x262   : > { %7856 = vst [vmem:[#allocation53_spill] sm:$0xff] %v6189_v14  ;;  %v2405_v32 = vadd.f32 %v2337_v49, %v2279_v20  ;;  %v2339_v42 = vpop.f32.mrf.mxu3  ;;  %v2739_v21 = vsel %vm7857_vm9, %v2689_v35, %v2690_v59  ;;  %v2643_v37 = vsel %vm7858_vm4, %v2593_v3, %v2594_v16  ;;  %v7862_v49 = vld [vmem:[#allocation70_spill] sm:$0xff]  ;;  %v7863_v35 = vld [vmem:[#allocation39_spill] sm:$0xff]  ;;  %vm7880_vm9 = vmmov %vm7876_vm5 }
 0x263   : > { %v2962_v54 = vunpack.c.l.b16 %v2898_v52  ;;  %v2786_v43 = vpack.c.bf16 %v2643_v37, %v2643_v37  ;;  %v2154_v60 = vadd.f32 %v7862_v49, %v7861_v13 }
 0x264   : > { %v2531_v33 = vadd.f32 %v2463_v29, %v2405_v32  ;;  %v3009_v32 = vpack.c.bf16 %v2739_v21, %v2739_v21 }
 0x265   : > { %v6197_v11 = vpack.c.b16 %v2962_v54, %v2961_v27  ;;  %v2850_v39 = vunpack.c.l.b16 %v2786_v43 }
 0x266   : > { %v2563_v31 = vmax.f32 %v2531_v33, 0.0  ;;  %v2470_v20 = vpop.f32.mrf.mxu0  ;;  %v7869_v33 = vld [vmem:[#allocation40_spill] sm:$0xff]  ;;  %v3073_v13 = vunpack.c.l.b16 %v3009_v32 }
 0x267   : > { %7860 = vst [vmem:[#allocation28_spill] sm:$0xff] %v6197_v11  ;;  %v2213_v38 = vpop.f32.mrf.mxu2  ;;  %4656 = vmatmul.msk.bf16.gmra.mxu3 %vm7864_vm1, %v7863_v35  ;;  %v6203_v3 = vpack.c.b16 %v2850_v39, %v2849_v25 }
 0x268   : > { %v2595_v36 = vrot.slane %v2563_v31, 7  ;;  %v2691_v28 = vrot.slane %v2563_v31, 1  ;;  %v2280_v51 = vadd.f32 %v2213_v38, %v2154_v60  ;;  %v2899_v38 = vpack.c.bf16 %v2563_v31, %v2563_v31  ;;  %v4705_v31 = vld [vmem:[%s7372_s3 + $0x8] sm:$0xf] }
 0x269   : > { %7865 = vst [vmem:[#allocation52_spill] sm:$0xff] %v6203_v3 }
 0x26a   : > { %v2406_v52 = vadd.f32 %v2339_v42, %v2280_v51  ;;  %v2342_v29 = vpop.f32.mrf.mxu3  ;;  %v2738_v26 = vsel %vm7866_vm13, %v2690_v59, %v2691_v28  ;;  %v2642_v37 = vsel %vm7867_vm8, %v2594_v16, %v2595_v36  ;;  %v7872_v51 = vld [vmem:[#allocation74_spill] sm:$0xff] }
 0x26b   : > { %v2754_v54 = vsel %vm5510_vm15, 0.0, %v2738_v26  ;;  %v2659_v60 = vsel %vm5220_vm12, 0.0, %v2642_v37  ;;  %vm7873_vm15 = vmmov %vm7851_vm2  ;;  %v2963_v37 = vunpack.c.l.b16 %v2899_v38  ;;  %v4689_v38 = vld [vmem:[%s7372_s3 + $0x4] sm:$0xf] }
 0x26c   : > { %v2532_v43 = vadd.f32 %v2465_v62, %v2406_v52  ;;  %4640 = vmatmul.msk.bf16.gmra.mxu2 %vm7870_vm6, %v7869_v33  ;;  %v3010_v25 = vpack.c.bf16 %v2754_v54, %v2754_v54  ;;  %v2787_v52 = vpack.c.bf16 %v2659_v60, %v2659_v60  ;;  %vm7874_vm2 = vmmov %vm7858_vm4 }
 0x26d   : > { %vm7875_vm12 = vmmov %vm7864_vm1 }
 0x26e   : > { %v2564_v39 = vmax.f32 %v2532_v43, 0.0  ;;  %v3074_v49 = vunpack.c.l.b16 %v3010_v25  ;;  %v2473_v3 = vpop.f32.mrf.mxu0  ;;  %vm7881_vm4 = vmmov %vm7866_vm13 }
 0x26f   : > { %v2216_v59 = vpop.f32.mrf.mxu2  ;;  %vm7882_vm10 = vmmov %vm7874_vm2 }
 0x270   : > { %v2596_v21 = vrot.slane %v2564_v39, 7  ;;  %v2692_v35 = vrot.slane %v2564_v39, 1  ;;  %v2281_v16 = vadd.f32 %v2216_v59, %v7872_v51  ;;  %v6216_v27 = vpack.c.b16 %v3074_v49, %v3073_v13  ;;  %vm7886_vm13 = vmmov %vm7874_vm2 }
 0x271   : > { %v2900_v62 = vpack.c.bf16 %v2564_v39, %v2564_v39  ;;  %4673 = vmatmul.msk.bf16.gmra.mxu0 %vm7875_vm12, %v5945_v18  ;;  %vm7890_vm8 = vmmov %vm7874_vm2 }
 0x272   : > { %v2407_v26 = vadd.f32 %v2342_v29, %v2281_v16  ;;  %v2344_v33 = vpop.f32.mrf.mxu3  ;;  %v2737_v32 = vsel %vm7873_vm15, %v2691_v28, %v2692_v35  ;;  %v2641_v54 = vsel %vm7874_vm2, %v2595_v36, %v2596_v21  ;;  %v3512_v29 = vsel %vm7876_vm5, %v4705_v31, 0  ;;  %v7878_v36 = vld [vmem:[#allocation31_spill] sm:$0xff]  ;;  %vm7896_vm2 = vmmov %vm7881_vm4 }
 0x273   : > { %v2964_v43 = vunpack.c.l.b16 %v2900_v62  ;;  %v2788_v25 = vpack.c.bf16 %v2641_v54, %v2641_v54  ;;  %3521 = vmatpush.bf16.msrb.mxu3 %v3512_v29  ;;  %v2851_v28 = vunpack.c.l.b16 %v2787_v52  ;;  %v2156_v42 = vadd.f32 %v7878_v36, %v5943_v0  ;;  %vm7897_vm12 = vmmov %vm7890_vm8 }
 0x274   : > { %v2533_v39 = vadd.f32 %v2468_v22, %v2407_v26  ;;  %v3341_v52 = vsel %vm7880_vm9, %v4689_v38, 0  ;;  %v3011_v31 = vpack.c.bf16 %v2737_v32, %v2737_v32  ;;  %vm7899_vm5 = vmmov %vm7896_vm2 }
 0x275   : > { %v6228_v13 = vpack.c.b16 %v2964_v43, %v2963_v37  ;;  %v2852_v49 = vunpack.c.l.b16 %v2788_v25  ;;  %3350 = vmatpush.bf16.msrb.mxu2 %v3341_v52 }
 0x276   : > { %v2565_v60 = vmax.f32 %v2533_v39, 0.0  ;;  %v2475_v62 = vpop.f32.mrf.mxu0 }
 0x277   : > { %7877 = vst [vmem:[#allocation29_spill] sm:$0xff] %v6228_v13  ;;  %v2218_v18 = vpop.f32.mrf.mxu2  ;;  %4657 = vmatmul.msk.bf16.gmra.mxu3 %vm7879_vm7, %v5947_v23  ;;  %v6237_v22 = vpack.c.b16 %v2852_v49, %v2851_v28  ;;  %v3075_v28 = vunpack.c.l.b16 %v3011_v31  ;;  %vm7900_vm7 = vmmov %vm7890_vm8 }
 0x278   : > { %v2597_v59 = vrot.slane %v2565_v60, 7  ;;  %v2693_v51 = vrot.slane %v2565_v60, 1  ;;  %v2282_v16 = vadd.f32 %v2218_v18, %v2156_v42  ;;  %v2901_v42 = vpack.c.bf16 %v2565_v60, %v2565_v60 }
 0x27a   : > { %v2408_v26 = vadd.f32 %v2344_v33, %v2282_v16  ;;  %v2347_v54 = vpop.f32.mrf.mxu3  ;;  %v2736_v0 = vsel %vm7881_vm4, %v2692_v35, %v2693_v51  ;;  %v2640_v23 = vsel %vm7882_vm10, %v2596_v21, %v2597_v59  ;;  %v2965_v60 = vunpack.c.l.b16 %v2901_v42  ;;  %vm7906_vm10 = vmmov %vm7896_vm2 }
 0x27b   : > { %v2756_v43 = vsel %vm5545_vm11, 0.0, %v2736_v0  ;;  %v2661_v36 = vsel %vm5282_vm14, 0.0, %v2640_v23  ;;  %vm7885_vm11 = vmmov %vm7881_vm4 }
 0x27c   : > { %v2534_v25 = vadd.f32 %v2470_v20, %v2408_v26  ;;  %4641 = vmatmul.msk.bf16.gmra.mxu2 %vm7864_vm1, %v5952_v1  ;;  %v3012_v39 = vpack.c.bf16 %v2756_v43, %v2756_v43  ;;  %v2789_v52 = vpack.c.bf16 %v2661_v36, %v2661_v36  ;;  %vm7889_vm14 = vmmov %vm7881_vm4 }
 0x27d   : > { %vm7907_vm1 = vmmov %vm7900_vm7 }
 0x27e   : > { %v2566_v29 = vmax.f32 %v2534_v25, 0.0  ;;  %v3076_v33 = vunpack.c.l.b16 %v3012_v39  ;;  %v2478_v38 = vpop.f32.mrf.mxu0  ;;  %v2853_v25 = vunpack.c.l.b16 %v2789_v52 }
 0x27f   : > { %v2221_v35 = vpop.f32.mrf.mxu2 }
 0x280   : > { %v2598_v32 = vrot.slane %v2566_v29, 7  ;;  %v2694_v18 = vrot.slane %v2566_v29, 1  ;;  %v2283_v21 = vadd.f32 %v2221_v35, %v5956_v56  ;;  %v6251_v16 = vpack.c.b16 %v3076_v33, %v3075_v28 }
 0x281   : > { %v2902_v20 = vpack.c.bf16 %v2566_v29, %v2566_v29  ;;  %2517 = vmatmul.bf16.gmra.mxu0 %v7807_v44  ;;  %v7888_v29 = vld [vmem:[#allocation75_spill] sm:$0xff] }
 0x282   : > { %v2409_v26 = vadd.f32 %v2347_v54, %v2283_v21  ;;  %v2349_v1 = vpop.f32.mrf.mxu3  ;;  %v2735_v0 = vsel %vm7885_vm11, %v2693_v51, %v2694_v18  ;;  %v2639_v31 = vsel %vm7886_vm13, %v2597_v59, %v2598_v32  ;;  %v2158_v54 = vadd.f32 %v7888_v29, %v5965_v41  ;;  %v7891_v41 = vld [vmem:[#allocation50_spill] sm:$0xff]  ;;  %vm7909_vm13 = vmmov %vm7896_vm2 }
 0x283   : > { %v2966_v23 = vunpack.c.l.b16 %v2902_v20  ;;  %v2790_v37 = vpack.c.bf16 %v2639_v31, %v2639_v31  ;;  %v3013_v20 = vpack.c.bf16 %v2735_v0, %v2735_v0  ;;  %vm7892_vm6 = vnez %v7891_v41 }
 0x284   : > { %v2535_v43 = vadd.f32 %v2473_v3, %v2409_v26  ;;  %vm3120_vm11 = vcmask 64512  }
 0x285   : > { %v6258_v56 = vpack.c.b16 %v2966_v23, %v2965_v60  ;;  %v2854_v39 = vunpack.c.l.b16 %v2790_v37  ;;  %v3077_v37 = vunpack.c.l.b16 %v3013_v20 }
 0x286   : > { %v2567_v28 = vmax.f32 %v2535_v43, 0.0  ;;  %v2480_v42 = vpop.f32.mrf.mxu0 }
 0x287   : > { %7887 = vst [vmem:[#allocation55_spill] sm:$0xff] %v6258_v56  ;;  %v2223_v33 = vpop.f32.mrf.mxu2  ;;  %2391 = vmatmul.bf16.gmra.mxu3 %v7807_v44  ;;  %v6263_v51 = vpack.c.b16 %v2854_v39, %v2853_v25  ;;  %v7893_v25 = vld [vmem:[#allocation30_spill] sm:$0xff] }
 0x288   : > { %v2599_v59 = vrot.slane %v2567_v28, 7  ;;  %v2695_v49 = vrot.slane %v2567_v28, 1  ;;  %v2284_v36 = vadd.f32 %v2223_v33, %v2158_v54  ;;  %vm7894_vm15 = vnez %v7893_v25 }
 0x289   : > { %v2903_v39 = vpack.c.bf16 %v2567_v28, %v2567_v28 }
 0x28a   : > { %v2410_v35 = vadd.f32 %v2349_v1, %v2284_v36  ;;  %v2352_v21 = vpop.f32.mrf.mxu3  ;;  %v2734_v3 = vsel %vm7889_vm14, %v2694_v18, %v2695_v49  ;;  %v2638_v52 = vsel %vm7890_vm8, %v2598_v32, %v2599_v59  ;;  %vm7910_vm14 = vmmov %vm7907_vm1 }
 0x28b   : > { %v2758_v26 = vsel %vm7892_vm6, 0.0, %v2734_v3  ;;  %v2663_v1 = vsel %vm7894_vm15, 0.0, %v2638_v52  ;;  %v2967_v52 = vunpack.c.l.b16 %v2903_v39  ;;  %vm7916_vm15 = vmmov %vm7896_vm2 }
 0x28c   : > { %v2536_v31 = vadd.f32 %v2475_v62, %v2410_v35  ;;  %2265 = vmatmul.bf16.gmra.mxu2 %v7807_v44  ;;  %v3014_v60 = vpack.c.bf16 %v2758_v26, %v2758_v26  ;;  %v2791_v62 = vpack.c.bf16 %v2663_v1, %v2663_v1 }
 0x28e   : > { %v2568_v23 = vmax.f32 %v2536_v31, 0.0  ;;  %v3078_v43 = vunpack.c.l.b16 %v3014_v60  ;;  %v2483_v32 = vpop.f32.mrf.mxu0 }
 0x28f   : > { %v2226_v29 = vpop.f32.mrf.mxu2 }
 0x290   : > { %v2600_v18 = vrot.slane %v2568_v23, 7  ;;  %v2696_v0 = vrot.slane %v2568_v23, 1  ;;  %v2285_v54 = vadd.f32 %v2226_v29, %v5970_v46  ;;  %v6275_v33 = vpack.c.b16 %v3078_v43, %v3077_v37 }
 0x291   : > { %v2904_v36 = vpack.c.bf16 %v2568_v23, %v2568_v23  ;;  %v2855_v46 = vunpack.c.l.b16 %v2791_v62  ;;  %v2160_v23 = vadd.f32 %v5958_v12, %v5979_v4  ;;  %v7901_v12 = vld [vmem:[#allocation54_spill] sm:$0xff] }
 0x292   : > { %7895 = vst [vmem:[#allocation57_spill] sm:$0xff] %v6275_v33  ;;  %v2411_v35 = vadd.f32 %v2352_v21, %v2285_v54  ;;  %v2354_v3 = vpop.f32.mrf.mxu3  ;;  %v2733_v20 = vsel %vm7896_vm2, %v2695_v49, %v2696_v0  ;;  %v2637_v41 = vsel %vm7897_vm12, %v2599_v59, %v2600_v18  ;;  %vm7902_vm9 = vnez %v7901_v12  ;;  %vm7917_vm2 = vmmov %vm7907_vm1 }
 0x293   : > { %v2968_v28 = vunpack.c.l.b16 %v2904_v36  ;;  %v2792_v26 = vpack.c.bf16 %v2637_v41, %v2637_v41  ;;  %v3015_v36 = vpack.c.bf16 %v2733_v20, %v2733_v20  ;;  %vm7919_vm12 = vmmov %vm7899_vm5 }
 0x294   : > { %v2537_v31 = vadd.f32 %v2478_v38, %v2411_v35 }
 0x295   : > { %v6281_v60 = vpack.c.b16 %v2968_v28, %v2967_v52  ;;  %v2856_v25 = vunpack.c.l.b16 %v2792_v26  ;;  %v3079_v28 = vunpack.c.l.b16 %v3015_v36 }
 0x296   : > { %v2569_v37 = vmax.f32 %v2537_v31, 0.0  ;;  %v2485_v39 = vpop.f32.mrf.mxu0  ;;  %v7903_v31 = vld [vmem:[#allocation2_spill] sm:$0xff] }
 0x297   : > { %7898 = vst [vmem:[#allocation36_spill] sm:$0xff] %v6281_v60  ;;  %v2228_v21 = vpop.f32.mrf.mxu2  ;;  %3522 = vmatmul.bf16.vlgmr.msrb.gmra.mxu3 %v7807_v44  ;;  %v6286_v43 = vpack.c.b16 %v2856_v25, %v2855_v46  ;;  %vm7904_vm4 = vnez %v7903_v31 }
 0x298   : > { %v2601_v49 = vrot.slane %v2569_v37, 7  ;;  %v2697_v1 = vrot.slane %v2569_v37, 1  ;;  %v2286_v59 = vadd.f32 %v2228_v21, %v2160_v23  ;;  %v2905_v46 = vpack.c.bf16 %v2569_v37, %v2569_v37 }
 0x29a   : > { %v2412_v29 = vadd.f32 %v2354_v3, %v2286_v59  ;;  %v2357_v54 = vpop.f32.mrf.mxu3  ;;  %v2732_v38 = vsel %vm7899_vm5, %v2696_v0, %v2697_v1  ;;  %v2636_v62 = vsel %vm7900_vm7, %v2600_v18, %v2601_v49  ;;  %vm7920_vm5 = vmmov %vm7907_vm1 }
 0x29b   : > { %v2760_v4 = vsel %vm7902_vm9, 0.0, %v2732_v38  ;;  %v2665_v3 = vsel %vm7904_vm4, 0.0, %v2636_v62  ;;  %v2969_v62 = vunpack.c.l.b16 %v2905_v46  ;;  %vm7926_vm4 = vmmov %vm7906_vm10 }
 0x29c   : > { %v2538_v35 = vadd.f32 %v2480_v42, %v2412_v29  ;;  %3351 = vmatmul.bf16.vlgmr.msrb.gmra.mxu2 %v7807_v44  ;;  %v3016_v41 = vpack.c.bf16 %v2760_v4, %v2760_v4  ;;  %v2793_v42 = vpack.c.bf16 %v2665_v3, %v2665_v3 }
 0x29e   : > { %v2570_v52 = vmax.f32 %v2538_v35, 0.0  ;;  %v3080_v26 = vunpack.c.l.b16 %v3016_v41  ;;  %v2488_v18 = vpop.f32.mrf.mxu0 }
 0x29f   : > { %v2231_v25 = vpop.f32.mrf.mxu2 }
 0x2a0   : > { %v2602_v0 = vrot.slane %v2570_v52, 7  ;;  %v2698_v20 = vrot.slane %v2570_v52, 1  ;;  %v2287_v23 = vadd.f32 %v2231_v25, %v5984_v24  ;;  %v6298_v21 = vpack.c.b16 %v3080_v26, %v3079_v28 }
 0x2a1   : > { %v2906_v59 = vpack.c.bf16 %v2570_v52, %v2570_v52  ;;  %v2857_v24 = vunpack.c.l.b16 %v2793_v42  ;;  %v2162_v52 = vadd.f32 %v5972_v61, %v5993_v40  ;;  %v7911_v40 = vld [vmem:[#allocation58_spill] sm:$0xff] }
 0x2a2   : > { %7905 = vst [vmem:[#allocation56_spill] sm:$0xff] %v6298_v21  ;;  %v2413_v29 = vadd.f32 %v2357_v54, %v2287_v23  ;;  %v2359_v38 = vpop.f32.mrf.mxu3  ;;  %v2731_v36 = vsel %vm7906_vm10, %v2697_v1, %v2698_v20  ;;  %v2635_v12 = vsel %vm7907_vm1, %v2601_v49, %v2602_v0  ;;  %vm7912_vm8 = vnez %v7911_v40  ;;  %vm7927_vm10 = vmmov %vm7907_vm1 }
 0x2a3   : > { %v2970_v37 = vunpack.c.l.b16 %v2906_v59  ;;  %v2794_v4 = vpack.c.bf16 %v2635_v12, %v2635_v12  ;;  %v3017_v59 = vpack.c.bf16 %v2731_v36, %v2731_v36  ;;  %vm7929_vm1 = vmmov %vm7926_vm4 }
 0x2a4   : > { %v2539_v35 = vadd.f32 %v2483_v32, %v2413_v29 }
 0x2a5   : > { %v6304_v41 = vpack.c.b16 %v2970_v37, %v2969_v62  ;;  %v2858_v28 = vunpack.c.l.b16 %v2794_v4  ;;  %v3081_v37 = vunpack.c.l.b16 %v3017_v59 }
 0x2a6   : > { %v2571_v54 = vmax.f32 %v2539_v35, 0.0  ;;  %v2490_v46 = vpop.f32.mrf.mxu0 }
 0x2a7   : > { %7908 = vst [vmem:[#allocation37_spill] sm:$0xff] %v6304_v41  ;;  %v2233_v26 = vpop.f32.mrf.mxu2  ;;  %4706 = vmatmul.msk.bf16.gmra.mxu3 %vm3120_vm11, %v6137_v55  ;;  %v6310_v1 = vpack.c.b16 %v2858_v28, %v2857_v24 }
 0x2a8   : > { %v2603_v49 = vrot.slane %v2571_v54, 7  ;;  %v2699_v31 = vrot.slane %v2571_v54, 1  ;;  %v2288_v3 = vadd.f32 %v2233_v26, %v2162_v52  ;;  %v2907_v24 = vpack.c.bf16 %v2571_v54, %v2571_v54 }
 0x2aa   : > { %v2414_v32 = vadd.f32 %v2359_v38, %v2288_v3  ;;  %v2362_v25 = vpop.f32.mrf.mxu3  ;;  %v2730_v23 = vsel %vm7909_vm13, %v2698_v20, %v2699_v31  ;;  %v2634_v61 = vsel %vm7910_vm14, %v2602_v0, %v2603_v49  ;;  %v7913_v38 = vld [vmem:[#allocation7_spill] sm:$0xff]  ;;  %vm7930_vm13 = vmmov %vm7917_vm2 }
 0x2ab   : > { %v2762_v42 = vsel %vm7912_vm8, 0.0, %v2730_v23  ;;  %vm7914_vm6 = vnez %v7913_v38 }
 0x2ac   : > { %v2540_v29 = vadd.f32 %v2485_v39, %v2414_v32  ;;  %4690 = vmatmul.msk.bf16.gmra.mxu2 %vm3120_vm11, %v6116_v10  ;;  %v3018_v12 = vpack.c.bf16 %v2762_v42, %v2762_v42  ;;  %v2667_v35 = vsel %vm7914_vm6, 0.0, %v2634_v61  ;;  %v2971_v61 = vunpack.c.l.b16 %v2907_v24  ;;  %vm7936_vm6 = vmmov %vm7929_vm1 }
 0x2ad   : > { %v2795_v3 = vpack.c.bf16 %v2667_v35, %v2667_v35 }
 0x2ae   : > { %v2572_v62 = vmax.f32 %v2540_v29, 0.0  ;;  %v3082_v4 = vunpack.c.l.b16 %v3018_v12  ;;  %v2493_v52 = vpop.f32.mrf.mxu0 }
 0x2af   : > { %v2236_v20 = vpop.f32.mrf.mxu2 }
 0x2b0   : > { %v2604_v36 = vrot.slane %v2572_v62, 7  ;;  %v2700_v28 = vrot.slane %v2572_v62, 1  ;;  %v2289_v0 = vadd.f32 %v2236_v20, %v5998_v5  ;;  %v6323_v26 = vpack.c.b16 %v3082_v4, %v3081_v37 }
 0x2b1   : > { %v2908_v39 = vpack.c.bf16 %v2572_v62, %v2572_v62  ;;  %v2859_v5 = vunpack.c.l.b16 %v2795_v3  ;;  %v2164_v62 = vadd.f32 %v5986_v50, %v6007_v63  ;;  %v7921_v63 = vld [vmem:[#allocation61_spill] sm:$0xff] }
 0x2b2   : > { %7915 = vst [vmem:[#allocation59_spill] sm:$0xff] %v6323_v26  ;;  %v2415_v32 = vadd.f32 %v2362_v25, %v2289_v0  ;;  %v2364_v23 = vpop.f32.mrf.mxu3  ;;  %v2729_v59 = vsel %vm7916_vm15, %v2699_v31, %v2700_v28  ;;  %v2633_v40 = vsel %vm7917_vm2, %v2603_v49, %v2604_v36  ;;  %vm7922_vm7 = vnez %v7921_v63  ;;  %vm7937_vm15 = vmmov %vm7917_vm2 }
 0x2b3   : > { %v2972_v54 = vunpack.c.l.b16 %v2908_v39  ;;  %v2796_v42 = vpack.c.bf16 %v2633_v40, %v2633_v40  ;;  %v3019_v39 = vpack.c.bf16 %v2729_v59, %v2729_v59  ;;  %vm7941_vm2 = vmmov %vm7929_vm1 }
 0x2b4   : > { %v2541_v29 = vadd.f32 %v2488_v18, %v2415_v32 }
 0x2b5   : > { %v6329_v12 = vpack.c.b16 %v2972_v54, %v2971_v61  ;;  %v2860_v38 = vunpack.c.l.b16 %v2796_v42  ;;  %v3083_v54 = vunpack.c.l.b16 %v3019_v39 }
 0x2b6   : > { %v2573_v37 = vmax.f32 %v2541_v29, 0.0  ;;  %v2495_v24 = vpop.f32.mrf.mxu0 }
 0x2b7   : > { %7918 = vst [vmem:[#allocation3_spill] sm:$0xff] %v6329_v12  ;;  %v2238_v25 = vpop.f32.mrf.mxu2  ;;  %4707 = vmatmul.msk.bf16.gmra.mxu3 %vm3120_vm11, %v6163_v48  ;;  %v6335_v31 = vpack.c.b16 %v2860_v38, %v2859_v5 }
 0x2b8   : > { %v2605_v4 = vrot.slane %v2573_v37, 7  ;;  %v2701_v49 = vrot.slane %v2573_v37, 1  ;;  %v2290_v35 = vadd.f32 %v2238_v25, %v2164_v62  ;;  %v2909_v5 = vpack.c.bf16 %v2573_v37, %v2573_v37 }
 0x2ba   : > { %v2416_v20 = vadd.f32 %v2364_v23, %v2290_v35  ;;  %v2367_v18 = vpop.f32.mrf.mxu3  ;;  %v2728_v0 = vsel %vm7919_vm12, %v2700_v28, %v2701_v49  ;;  %v2632_v50 = vsel %vm7920_vm5, %v2604_v36, %v2605_v4  ;;  %v7923_v23 = vld [vmem:[#allocation11_spill] sm:$0xff]  ;;  %vm7942_vm12 = vmmov %vm7920_vm5 }
 0x2bb   : > { %v2764_v3 = vsel %vm7922_vm7, 0.0, %v2728_v0  ;;  %vm7924_vm9 = vnez %v7923_v23 }
 0x2bc   : > { %v2542_v32 = vadd.f32 %v2490_v46, %v2416_v20  ;;  %4691 = vmatmul.msk.bf16.gmra.mxu2 %vm3120_vm11, %v6145_v53  ;;  %v3020_v40 = vpack.c.bf16 %v2764_v3, %v2764_v3  ;;  %v2669_v29 = vsel %vm7924_vm9, 0.0, %v2632_v50  ;;  %v2973_v50 = vunpack.c.l.b16 %v2909_v5  ;;  %vm7948_vm9 = vmmov %vm7929_vm1 }
 0x2bd   : > { %v2797_v35 = vpack.c.bf16 %v2669_v29, %v2669_v29 }
 0x2be   : > { %v2574_v61 = vmax.f32 %v2542_v32, 0.0  ;;  %v3084_v42 = vunpack.c.l.b16 %v3020_v40  ;;  %v2498_v25 = vpop.f32.mrf.mxu0 }
 0x2bf   : > { %v2241_v28 = vpop.f32.mrf.mxu2 }
 0x2c0   : > { %v2606_v59 = vrot.slane %v2574_v61, 7  ;;  %v2702_v38 = vrot.slane %v2574_v61, 1  ;;  %v2291_v36 = vadd.f32 %v2241_v28, %v6012_v17  ;;  %v6348_v62 = vpack.c.b16 %v3084_v42, %v3083_v54 }
 0x2c1   : > { %v2910_v46 = vpack.c.bf16 %v2574_v61, %v2574_v61  ;;  %v2861_v17 = vunpack.c.l.b16 %v2797_v35  ;;  %v2166_v61 = vadd.f32 %v6003_v7, %v6019_v58  ;;  %v7931_v58 = vld [vmem:[#allocation64_spill] sm:$0xff] }
 0x2c2   : > { %7925 = vst [vmem:[#allocation60_spill] sm:$0xff] %v6348_v62  ;;  %v2417_v20 = vadd.f32 %v2367_v18, %v2291_v36  ;;  %v2369_v0 = vpop.f32.mrf.mxu3  ;;  %v2727_v39 = vsel %vm7926_vm4, %v2701_v49, %v2702_v38  ;;  %v2631_v63 = vsel %vm7927_vm10, %v2605_v4, %v2606_v59  ;;  %vm7932_vm14 = vnez %v7931_v58  ;;  %vm7949_vm4 = vmmov %vm7927_vm10 }
 0x2c3   : > { %v2974_v37 = vunpack.c.l.b16 %v2910_v46  ;;  %v2798_v3 = vpack.c.bf16 %v2631_v63, %v2631_v63  ;;  %v3021_v36 = vpack.c.bf16 %v2727_v39, %v2727_v39  ;;  %vm7952_vm10 = vmmov %vm7929_vm1 }
 0x2c4   : > { %v2543_v32 = vadd.f32 %v2493_v52, %v2417_v20 }
 0x2c5   : > { %v6354_v40 = vpack.c.b16 %v2974_v37, %v2973_v50  ;;  %v2862_v54 = vunpack.c.l.b16 %v2798_v3  ;;  %v3085_v37 = vunpack.c.l.b16 %v3021_v36  ;;  %v7933_v3 = vld [vmem:[#allocation13_spill] sm:$0xff] }
 0x2c6   : > { %v2575_v42 = vmax.f32 %v2543_v32, 0.0  ;;  %v2500_v7 = vpop.f32.mrf.mxu0  ;;  %vm7934_vm8 = vnez %v7933_v3 }
 0x2c7   : > { %7928 = vst [vmem:[#allocation6_spill] sm:$0xff] %v6354_v40  ;;  %v2243_v18 = vpop.f32.mrf.mxu2  ;;  %4708 = vmatmul.msk.bf16.gmra.mxu3 %vm3120_vm11, %v6189_v14  ;;  %v6360_v49 = vpack.c.b16 %v2862_v54, %v2861_v17 }
 0x2c8   : > { %v2607_v23 = vrot.slane %v2575_v42, 7  ;;  %v2703_v4 = vrot.slane %v2575_v42, 1  ;;  %v2292_v29 = vadd.f32 %v2243_v18, %v2166_v61 }
 0x2ca   : > { %v2418_v5 = vadd.f32 %v2369_v0, %v2292_v29  ;;  %v2372_v28 = vpop.f32.mrf.mxu3  ;;  %v2726_v52 = vsel %vm7929_vm1, %v2702_v38, %v2703_v4  ;;  %v2630_v46 = vsel %vm7930_vm13, %v2606_v59, %v2607_v23  ;;  %v2911_v38 = vpack.c.bf16 %v2575_v42, %v2575_v42  ;;  %vm7953_vm1 = vmmov %vm7949_vm4 }
 0x2cb   : > { %v2766_v35 = vsel %vm7932_vm14, 0.0, %v2726_v52  ;;  %v2671_v32 = vsel %vm7934_vm8, 0.0, %v2630_v46  ;;  %vm7960_vm8 = vmmov %vm7941_vm2 }
 0x2cc   : > { %v2544_v20 = vadd.f32 %v2495_v24, %v2418_v5  ;;  %4692 = vmatmul.msk.bf16.gmra.mxu2 %vm3120_vm11, %v6171_v34  ;;  %v3022_v63 = vpack.c.bf16 %v2766_v35, %v2766_v35  ;;  %v2799_v24 = vpack.c.bf16 %v2671_v32, %v2671_v32  ;;  %v2975_v58 = vunpack.c.l.b16 %v2911_v38 }
 0x2ce   : > { %v2576_v50 = vmax.f32 %v2544_v20, 0.0  ;;  %v3086_v0 = vunpack.c.l.b16 %v3022_v63  ;;  %v2503_v20 = vpop.f32.mrf.mxu0 }
 0x2cf   : > { %v2246_v39 = vpop.f32.mrf.mxu2 }
 0x2d0   : > { %v2608_v17 = vrot.slane %v2576_v50, 7  ;;  %v2704_v54 = vrot.slane %v2576_v50, 1  ;;  %v2293_v59 = vadd.f32 %v2246_v39, %v6026_v45  ;;  %v6373_v61 = vpack.c.b16 %v3086_v0, %v3085_v37  ;;  %v7939_v0 = vld [vmem:[#allocation14_spill] sm:$0xff] }
 0x2d1   : > { %v2912_v18 = vpack.c.bf16 %v2576_v50, %v2576_v50  ;;  %v2863_v45 = vunpack.c.l.b16 %v2799_v24  ;;  %v7940_v50 = vld [vmem:[#allocation4_spill] sm:$0xff] }
 0x2d2   : > { %7935 = vst [vmem:[#allocation62_spill] sm:$0xff] %v6373_v61  ;;  %v2419_v29 = vadd.f32 %v2372_v28, %v2293_v59  ;;  %v2374_v5 = vpop.f32.mrf.mxu3  ;;  %v2725_v52 = vsel %vm7936_vm6, %v2703_v4, %v2704_v54  ;;  %v2629_v36 = vsel %vm7937_vm15, %v2607_v23, %v2608_v17  ;;  %v2168_v3 = vadd.f32 %v7940_v50, %v7939_v0  ;;  %vm7961_vm6 = vmmov %vm7953_vm1 }
 0x2d3   : > { %v2976_v46 = vunpack.c.l.b16 %v2912_v18  ;;  %v2800_v42 = vpack.c.bf16 %v2629_v36, %v2629_v36  ;;  %v3023_v24 = vpack.c.bf16 %v2725_v52, %v2725_v52  ;;  %v7943_v36 = vld [vmem:[#allocation67_spill] sm:$0xff]  ;;  %vm7965_vm15 = vmmov %vm7941_vm2 }
 0x2d4   : > { %v2545_v35 = vadd.f32 %v2498_v25, %v2419_v29  ;;  %vm7944_vm5 = vnez %v7943_v36 }
 0x2d5   : > { %v6379_v63 = vpack.c.b16 %v2976_v46, %v2975_v58  ;;  %v2864_v37 = vunpack.c.l.b16 %v2800_v42 }
 0x2d6   : > { %v2577_v28 = vmax.f32 %v2545_v35, 0.0  ;;  %v2505_v52 = vpop.f32.mrf.mxu0 }
 0x2d7   : > { %7938 = vst [vmem:[#allocation8_spill] sm:$0xff] %v6379_v63  ;;  %v2248_v32 = vpop.f32.mrf.mxu2  ;;  %4709 = vmatmul.msk.bf16.gmra.mxu3 %vm3120_vm11, %v6216_v27  ;;  %v6385_v4 = vpack.c.b16 %v2864_v37, %v2863_v45  ;;  %v3087_v45 = vunpack.c.l.b16 %v3023_v24 }
 0x2d8   : > { %v2609_v23 = vrot.slane %v2577_v28, 7  ;;  %v2705_v38 = vrot.slane %v2577_v28, 1  ;;  %v2294_v39 = vadd.f32 %v2248_v32, %v2168_v3  ;;  %v2913_v50 = vpack.c.bf16 %v2577_v28, %v2577_v28 }
 0x2da   : > { %v2420_v59 = vadd.f32 %v2374_v5, %v2294_v39  ;;  %v2377_v25 = vpop.f32.mrf.mxu3  ;;  %v2724_v18 = vsel %vm7941_vm2, %v2704_v54, %v2705_v38  ;;  %v2628_v29 = vsel %vm7942_vm12, %v2608_v17, %v2609_v23  ;;  %v7945_v5 = vld [vmem:[#allocation16_spill] sm:$0xff]  ;;  %vm7966_vm2 = vmmov %vm7953_vm1 }
 0x2db   : > { %v2768_v58 = vsel %vm7944_vm5, 0.0, %v2724_v18  ;;  %vm7946_vm7 = vnez %v7945_v5 }
 0x2dc   : > { %v2546_v46 = vadd.f32 %v2500_v7, %v2420_v59  ;;  %4693 = vmatmul.msk.bf16.gmra.mxu2 %vm3120_vm11, %v6197_v11  ;;  %v3024_v42 = vpack.c.bf16 %v2768_v58, %v2768_v58  ;;  %v2673_v0 = vsel %vm7946_vm7, 0.0, %v2628_v29  ;;  %v2977_v29 = vunpack.c.l.b16 %v2913_v50 }
 0x2dd   : > { %v2801_v59 = vpack.c.bf16 %v2673_v0, %v2673_v0  ;;  %vm7973_vm7 = vcmask 1043456  }
 0x2de   : > { %v2578_v35 = vmax.f32 %v2546_v46, 0.0  ;;  %v3088_v37 = vunpack.c.l.b16 %v3024_v42 }
 0x2df   : > { %v2251_v54 = vpop.f32.mrf.mxu2  ;;  %v2865_v44 = vunpack.c.l.b16 %v2801_v59 }
 0x2e0   : > { %v2610_v3 = vrot.slane %v2578_v35, 7  ;;  %v2706_v32 = vrot.slane %v2578_v35, 1  ;;  %v2295_v17 = vadd.f32 %v2251_v54, %v6040_v15  ;;  %v6398_v39 = vpack.c.b16 %v3088_v37, %v3087_v45  ;;  %v7951_v45 = vld [vmem:[#allocation44_spill] sm:$0xff]  ;;  %v2508_v54 = vpop.f32.mrf.mxu0 }
 0x2e1   : > { %v2914_v7 = vpack.c.bf16 %v2578_v35, %v2578_v35  ;;  %v2170_v35 = vadd.f32 %v7951_v45, %v6047_v19 }
 0x2e2   : > { %7947 = vst [vmem:[#allocation63_spill] sm:$0xff] %v6398_v39  ;;  %v2421_v18 = vadd.f32 %v2377_v25, %v2295_v17  ;;  %v2379_v36 = vpop.f32.mrf.mxu3  ;;  %v2723_v24 = vsel %vm7948_vm9, %v2705_v38, %v2706_v32  ;;  %v2627_v58 = vsel %vm7949_vm4, %v2609_v23, %v2610_v3  ;;  %vm7974_vm9 = vmmov %vm7973_vm7 }
 0x2e3   : > { %v2978_v28 = vunpack.c.l.b16 %v2914_v7  ;;  %v2802_v46 = vpack.c.bf16 %v2627_v58, %v2627_v58  ;;  %v3025_v59 = vpack.c.bf16 %v2723_v24, %v2723_v24  ;;  %vm7975_vm4 = vmmov %vm7960_vm8 }
 0x2e4   : > { %v2547_v42 = vadd.f32 %v2503_v20, %v2421_v18  ;;  %v7954_v18 = vld [vmem:[#allocation68_spill] sm:$0xff] }
 0x2e5   : > { %v6404_v5 = vpack.c.b16 %v2978_v28, %v2977_v29  ;;  %v2866_v15 = vunpack.c.l.b16 %v2802_v46  ;;  %vm7955_vm13 = vnez %v7954_v18  ;;  %v3089_v46 = vunpack.c.l.b16 %v3025_v59 }
 0x2e6   : > { %v2579_v37 = vmax.f32 %v2547_v42, 0.0 }
 0x2e7   : > { %7950 = vst [vmem:[#allocation10_spill] sm:$0xff] %v6404_v5  ;;  %v2253_v25 = vpop.f32.mrf.mxu2  ;;  %4710 = vmatmul.msk.bf16.gmra.mxu3 %vm3120_vm11, %v6251_v16  ;;  %v6410_v38 = vpack.c.b16 %v2866_v15, %v2865_v44 }
 0x2e8   : > { %v2611_v0 = vrot.slane %v2579_v37, 7  ;;  %v2707_v23 = vrot.slane %v2579_v37, 1  ;;  %v2296_v50 = vadd.f32 %v2253_v25, %v2170_v35  ;;  %v2915_v45 = vpack.c.bf16 %v2579_v37, %v2579_v37  ;;  %v7958_v25 = vld [vmem:[#allocation45_spill] sm:$0xff] }
 0x2ea   : > { %v2422_v17 = vadd.f32 %v2379_v36, %v2296_v50  ;;  %v2382_v20 = vpop.f32.mrf.mxu3  ;;  %v2722_v7 = vsel %vm7952_vm10, %v2706_v32, %v2707_v23  ;;  %v2626_v19 = vsel %vm7953_vm1, %v2610_v3, %v2611_v0  ;;  %v7956_v36 = vld [vmem:[#allocation20_spill] sm:$0xff]  ;;  %vm7976_vm10 = vmmov %vm7953_vm1 }
 0x2eb   : > { %v2770_v58 = vsel %vm7955_vm13, 0.0, %v2722_v7  ;;  %vm7957_vm14 = vnez %v7956_v36  ;;  %vm7978_vm1 = vmmov %vm7975_vm4 }
 0x2ec   : > { %v2548_v29 = vadd.f32 %v2505_v52, %v2422_v17  ;;  %4694 = vmatmul.msk.bf16.gmra.mxu2 %vm3120_vm11, %v6228_v13  ;;  %v3026_v44 = vpack.c.bf16 %v2770_v58, %v2770_v58  ;;  %v2675_v15 = vsel %vm7957_vm14, 0.0, %v2626_v19  ;;  %v2979_v19 = vunpack.c.l.b16 %v2915_v45  ;;  %vm7979_vm13 = vmmov %vm7966_vm2 }
 0x2ed   : > { %v2803_v52 = vpack.c.bf16 %v2675_v15, %v2675_v15 }
 0x2ee   : > { %v2580_v28 = vmax.f32 %v2548_v29, 0.0  ;;  %v3090_v42 = vunpack.c.l.b16 %v3026_v44  ;;  %v2510_v29 = vpop.f32.mrf.mxu0 }
 0x2ef   : > { %v2256_v32 = vpop.f32.mrf.mxu2 }
 0x2f0   : > { %v2612_v24 = vrot.slane %v2580_v28, 7  ;;  %v2708_v35 = vrot.slane %v2580_v28, 1  ;;  %v2297_v3 = vadd.f32 %v2256_v32, %v7958_v25  ;;  %v6423_v50 = vpack.c.b16 %v3090_v42, %v3089_v46  ;;  %v7963_v42 = vld [vmem:[#allocation18_spill] sm:$0xff] }
 0x2f1   : > { %v2916_v7 = vpack.c.bf16 %v2580_v28, %v2580_v28  ;;  %v2867_v32 = vunpack.c.l.b16 %v2803_v52  ;;  %v7964_v28 = vld [vmem:[#allocation17_spill] sm:$0xff] }
 0x2f2   : > { %7959 = vst [vmem:[#allocation65_spill] sm:$0xff] %v6423_v50  ;;  %v2423_v17 = vadd.f32 %v2382_v20, %v2297_v3  ;;  %v2384_v18 = vpop.f32.mrf.mxu3  ;;  %v2721_v58 = vsel %vm7960_vm8, %v2707_v23, %v2708_v35  ;;  %v2625_v59 = vsel %vm7961_vm6, %v2611_v0, %v2612_v24  ;;  %v2172_v15 = vadd.f32 %v7964_v28, %v7963_v42  ;;  %v7969_v28 = vld [vmem:[#allocation27_spill] sm:$0xff]  ;;  %vm7985_vm6 = vmmov %vm7978_vm1 }
 0x2f3   : > { %v2980_v37 = vunpack.c.l.b16 %v2916_v7  ;;  %v2804_v44 = vpack.c.bf16 %v2625_v59, %v2625_v59  ;;  %v3027_v52 = vpack.c.bf16 %v2721_v58, %v2721_v58  ;;  %vm7970_vm5 = vnez %v7969_v28 }
 0x2f4   : > { %v2549_v36 = vadd.f32 %v2508_v54, %v2423_v17 }
 0x2f5   : > { %v6429_v13 = vpack.c.b16 %v2980_v37, %v2979_v19  ;;  %v2868_v46 = vunpack.c.l.b16 %v2804_v44  ;;  %v7967_v19 = vld [vmem:[#allocation69_spill] sm:$0xff]  ;;  %v3091_v42 = vunpack.c.l.b16 %v3027_v52 }
 0x2f6   : > { %v2581_v20 = vmax.f32 %v2549_v36, 0.0  ;;  %vm7968_vm12 = vnez %v7967_v19 }
 0x2f7   : > { %7962 = vst [vmem:[#allocation66_spill] sm:$0xff] %v6429_v13  ;;  %v2258_v25 = vpop.f32.mrf.mxu2  ;;  %4711 = vmatmul.msk.bf16.gmra.mxu3 %vm3120_vm11, %v6275_v33  ;;  %v6435_v23 = vpack.c.b16 %v2868_v46, %v2867_v32  ;;  %v2513_v32 = vpop.f32.mrf.mxu0 }
 0x2f8   : > { %v2613_v0 = vrot.slane %v2581_v20, 7  ;;  %v2709_v3 = vrot.slane %v2581_v20, 1  ;;  %v2298_v45 = vadd.f32 %v2258_v25, %v2172_v15 }
 0x2fa   : > { %v2424_v7 = vadd.f32 %v2384_v18, %v2298_v45  ;;  %v2387_v59 = vpop.f32.mrf.mxu3  ;;  %v2720_v54 = vsel %vm7965_vm15, %v2708_v35, %v2709_v3  ;;  %v2624_v17 = vsel %vm7966_vm2, %v2612_v24, %v2613_v0  ;;  %v2917_v35 = vpack.c.bf16 %v2581_v20, %v2581_v20  ;;  %v7971_v24 = vld [vmem:[#allocation47_spill] sm:$0xff]  ;;  %vm7986_vm15 = vmmov %vm7966_vm2 }
 0x2fb   : > { %v2772_v37 = vsel %vm7968_vm12, 0.0, %v2720_v54  ;;  %v2677_v15 = vsel %vm7970_vm5, 0.0, %v2624_v17  ;;  %vm7988_vm2 = vmmov %vm7978_vm1 }
 0x2fc   : > { %v2550_v44 = vadd.f32 %v2510_v29, %v2424_v7  ;;  %4695 = vmatmul.msk.bf16.gmra.mxu2 %vm3120_vm11, %v6258_v56  ;;  %v3028_v36 = vpack.c.bf16 %v2772_v37, %v2772_v37  ;;  %v4721_v29 = vld [vmem:[%s7372_s3 + $0xc] sm:$0xf]  ;;  %v4738_v7 = vld [vmem:[%s7372_s3 + $0x10] sm:$0xf]  ;;  %v2805_v19 = vpack.c.bf16 %v2677_v15, %v2677_v15  ;;  %vm7989_vm12 = vmmov %vm7976_vm10 }
 0x2fd   : > { %v3641_v52 = vsel %vm7973_vm7, %v4721_v29, 0  ;;  %v3770_v17 = vsel %vm7974_vm9, %v4738_v7, 0  ;;  %vm7997_vm7 = vmmov %vm7976_vm10 }
 0x2fe   : > { %v2582_v46 = vmax.f32 %v2550_v44, 0.0  ;;  %v3092_v18 = vunpack.c.l.b16 %v3028_v36  ;;  %3650 = vmatpush.bf16.msrb.mxu0 %v3641_v52  ;;  %3779 = vmatpush.bf16.msrb.mxu1 %v3770_v17  ;;  %v2869_v29 = vunpack.c.l.b16 %v2805_v19  ;;  %vm7999_vm9 = vmmov %vm7978_vm1 }
 0x2ff   : > { %v2261_v58 = vpop.f32.mrf.mxu2 }
 0x300   : > { %v2614_v25 = vrot.slane %v2582_v46, 7  ;;  %v2710_v45 = vrot.slane %v2582_v46, 1  ;;  %v2299_v11 = vadd.f32 %v2261_v58, %v7971_v24  ;;  %v6454_v54 = vpack.c.b16 %v3092_v18, %v3091_v42 }
 0x301   : > { %v2918_v20 = vpack.c.bf16 %v2582_v46, %v2582_v46  ;;  %v2981_v58 = vunpack.c.l.b16 %v2917_v35  ;;  %v2515_v46 = vpop.f32.mrf.mxu0 }
 0x302   : > { %7972 = vst [vmem:[#allocation38_spill] sm:$0xff] %v6454_v54  ;;  %v2425_v37 = vadd.f32 %v2387_v59, %v2299_v11  ;;  %v2389_v44 = vpop.f32.mrf.mxu3  ;;  %v2719_v36 = vsel %vm7975_vm4, %v2709_v3, %v2710_v45  ;;  %v2623_v28 = vsel %vm7976_vm10, %v2613_v0, %v2614_v25  ;;  %v2174_v11 = vadd.f32 %v6076_v30, %v6080_v9  ;;  %v7980_v9 = vld [vmem:[#allocation32_spill] sm:$0xff]  ;;  %vm8001_vm4 = vmmov %vm7978_vm1 }
 0x303   : > { %v2982_v24 = vunpack.c.l.b16 %v2918_v20  ;;  %v2806_v42 = vpack.c.bf16 %v2623_v28, %v2623_v28  ;;  %v3029_v19 = vpack.c.bf16 %v2719_v36, %v2719_v36  ;;  %vm7981_vm14 = vnez %v7980_v9 }
 0x304   : > { %v2551_v18 = vadd.f32 %v2513_v32, %v2425_v37 }
 0x305   : > { %v6462_v56 = vpack.c.b16 %v2982_v24, %v2981_v58  ;;  %v2870_v7 = vunpack.c.l.b16 %v2806_v42  ;;  %v3093_v42 = vunpack.c.l.b16 %v3029_v19 }
 0x306   : > { %v2583_v59 = vmax.f32 %v2551_v18, 0.0 }
 0x307   : > { %7977 = vst [vmem:[#allocation9_spill] sm:$0xff] %v6462_v56  ;;  %v2263_v15 = vpop.f32.mrf.mxu2  ;;  %4712 = vmatmul.msk.bf16.gmra.mxu3 %vm3120_vm11, %v6298_v21  ;;  %v6468_v3 = vpack.c.b16 %v2870_v7, %v2869_v29 }
 0x308   : > { %v2615_v0 = vrot.slane %v2583_v59, 7  ;;  %v2711_v35 = vrot.slane %v2583_v59, 1  ;;  %v2300_v52 = vadd.f32 %v2263_v15, %v2174_v11  ;;  %v2919_v7 = vpack.c.bf16 %v2583_v59, %v2583_v59 }
 0x30a   : > { %v2426_v17 = vadd.f32 %v2389_v44, %v2300_v52  ;;  %v2392_v32 = vpop.f32.mrf.mxu3  ;;  %v2718_v20 = vsel %vm7978_vm1, %v2710_v45, %v2711_v35  ;;  %v2622_v30 = vsel %vm7979_vm13, %v2614_v25, %v2615_v0  ;;  %v7982_v44 = vld [vmem:[#allocation35_spill] sm:$0xff]  ;;  %v2518_v52 = vpop.f32.mrf.mxu0  ;;  %v2983_v59 = vunpack.c.l.b16 %v2919_v7 }
 0x30b   : > { %v2774_v37 = vsel %vm7981_vm14, 0.0, %v2718_v20  ;;  %vm7983_vm8 = vnez %v7982_v44 }
 0x30c   : > { %v2552_v28 = vadd.f32 %v2515_v46, %v2426_v17  ;;  %4696 = vmatmul.msk.bf16.gmra.mxu2 %vm3120_vm11, %v6281_v60  ;;  %v3030_v58 = vpack.c.bf16 %v2774_v37, %v2774_v37  ;;  %v2679_v29 = vsel %vm7983_vm8, 0.0, %v2622_v30  ;;  %v2142_v30 = vpop.f32.mrf.mxu1  ;;  %vm8068_vm8 = vcmask 31744  }
 0x30d   : > { %v2807_v17 = vpack.c.bf16 %v2679_v29, %v2679_v29 }
 0x30e   : > { %v2584_v24 = vmax.f32 %v2552_v28, 0.0  ;;  %v3094_v18 = vunpack.c.l.b16 %v3030_v58 }
 0x30f   : > { %v2266_v45 = vpop.f32.mrf.mxu2 }
 0x310   : > { %v2616_v36 = vrot.slane %v2584_v24, 7  ;;  %v2712_v11 = vrot.slane %v2584_v24, 1  ;;  %v2301_v25 = vadd.f32 %v2266_v45, %v6085_v8  ;;  %v6481_v15 = vpack.c.b16 %v3094_v18, %v3093_v42 }
 0x311   : > { %v2920_v46 = vpack.c.bf16 %v2584_v24, %v2584_v24  ;;  %v2871_v8 = vunpack.c.l.b16 %v2807_v17  ;;  %v2176_v24 = vadd.f32 %v2142_v30, %v6092_v57 }
 0x312   : > { %7984 = vst [vmem:[#allocation25_spill] sm:$0xff] %v6481_v15  ;;  %v2427_v20 = vadd.f32 %v2392_v32, %v2301_v25  ;;  %v2394_v9 = vpop.f32.mrf.mxu3  ;;  %v2717_v19 = vsel %vm7985_vm6, %v2711_v35, %v2712_v11  ;;  %v2621_v37 = vsel %vm7986_vm15, %v2615_v0, %v2616_v36  ;;  %v2520_v17 = vpop.f32.mrf.mxu0  ;;  %vm8069_vm6 = vmmov %vm8068_vm8 }
 0x313   : > { %v2984_v28 = vunpack.c.l.b16 %v2920_v46  ;;  %v2808_v58 = vpack.c.bf16 %v2621_v37, %v2621_v37  ;;  %v3031_v46 = vpack.c.bf16 %v2717_v19, %v2717_v19  ;;  %vm8071_vm15 = vmmov %vm8069_vm6 }
 0x314   : > { %v2553_v44 = vadd.f32 %v2518_v52, %v2427_v20  ;;  %v7990_v20 = vld [vmem:[#allocation71_spill] sm:$0xff] }
 0x315   : > { %v6487_v60 = vpack.c.b16 %v2984_v28, %v2983_v59  ;;  %v2872_v42 = vunpack.c.l.b16 %v2808_v58  ;;  %vm7991_vm5 = vnez %v7990_v20 }
 0x316   : > { %v2585_v18 = vmax.f32 %v2553_v44, 0.0 }
 0x317   : > { %7987 = vst [vmem:[#allocation41_spill] sm:$0xff] %v6487_v60  ;;  %v2268_v32 = vpop.f32.mrf.mxu2  ;;  %4713 = vmatmul.msk.bf16.gmra.mxu3 %vm3120_vm11, %v6323_v26  ;;  %v6492_v35 = vpack.c.b16 %v2872_v42, %v2871_v8 }
 0x318   : > { %v2617_v29 = vrot.slane %v2585_v18, 7  ;;  %v2713_v0 = vrot.slane %v2585_v18, 1  ;;  %v2302_v45 = vadd.f32 %v2268_v32, %v2176_v24 }
 0x31a   : > { %v2428_v7 = vadd.f32 %v2394_v9, %v2302_v45  ;;  %v6494_v25 = vpop.f32.mrf.mxu3  ;;  %v2716_v52 = vsel %vm7988_vm2, %v2712_v11, %v2713_v0  ;;  %v2620_v57 = vsel %vm7989_vm12, %v2616_v36, %v2617_v29  ;;  %v3095_v9 = vunpack.c.l.b16 %v3031_v46  ;;  %vm8072_vm2 = vmmov %vm8069_vm6 }
 0x31b   : > { %v2776_v37 = vsel %vm7991_vm5, 0.0, %v2716_v52  ;;  %v2681_v8 = vsel %vm5918_vm3, 0.0, %v2620_v57  ;;  %v2921_v11 = vpack.c.bf16 %v2585_v18, %v2585_v18  ;;  %v2780_v45 = vpack.c.bf16 %v6112_v47, %v6112_v47  ;;  %vm7998_vm3 = vmmov %vm7997_vm7  ;;  %v8002_v47 = vld [vmem:[#allocation5_spill] sm:$0xff] }
 0x31c   : > { %v2554_v30 = vadd.f32 %v2520_v17, %v2428_v7  ;;  %4697 = vmatmul.msk.bf16.gmra.mxu2 %vm3120_vm11, %v6304_v41  ;;  %v3032_v59 = vpack.c.bf16 %v2776_v37, %v2776_v37  ;;  %v2809_v7 = vpack.c.bf16 %v2681_v8, %v2681_v8  ;;  %v7995_v17 = vld [vmem:[#allocation49_spill] sm:$0xff]  ;;  %vm8003_vm10 = vnez %v8002_v47  ;;  %vm8074_vm12 = vmmov %vm8072_vm2 }
 0x31d   : > { %v7996_v46 = vrot.slane %v7995_v17, 7  ;;  %v8000_v37 = vrot.slane %v7995_v17, 1  ;;  %v2844_v17 = vunpack.c.l.b16 %v2780_v45  ;;  %vm8075_vm5 = vmmov %vm8072_vm2 }
 0x31e   : > { %v2586_v28 = vmax.f32 %v2554_v30, 0.0  ;;  %v3096_v58 = vunpack.c.l.b16 %v3032_v59 }
 0x31f   : > { %v6506_v19 = vpop.f32.mrf.mxu2 }
 0x320   : > { %v2618_v42 = vrot.slane %v2586_v28, 7  ;;  %v2714_v36 = vrot.slane %v2586_v28, 1  ;;  %v6508_v24 = vpack.c.b16 %v3096_v58, %v3095_v9  ;;  %v2922_v32 = vpack.c.bf16 %v2586_v28, %v2586_v28  ;;  %v8009_v9 = vld [vmem:[#allocation52_spill] sm:$0xff] }
 0x322   : > { %7993 = vst [vmem:[#allocation26_spill] sm:$0xff] %v6508_v24  ;;  %v6512_v52 = vpop.f32.mrf.mxu3  ;;  %v2650_v20 = vsel %vm7997_vm7, %v2618_v42, %v7996_v46  ;;  %v2619_v18 = vsel %vm7998_vm3, %v2617_v29, %v2618_v42  ;;  %v2715_v57 = vsel %vm7999_vm9, %v2713_v0, %v2714_v36  ;;  %v2746_v30 = vsel %vm8001_vm4, %v2714_v36, %v8000_v37  ;;  %vm8077_vm7 = vmmov %vm8072_vm2 }
 0x323   : > { %7994 = vst [vmem:[#allocation12_spill] sm:$0xff] %v6512_v52  ;;  %v2651_v59 = vsel %vm8003_vm10, 0.0, %v2650_v20  ;;  %v2810_v28 = vpack.c.bf16 %v2619_v18, %v2619_v18  ;;  %v2778_v58 = vsel %vm5901_vm0, 0.0, %v2746_v30  ;;  %v3033_v44 = vpack.c.bf16 %v2715_v57, %v2715_v57  ;;  %vm8078_vm3 = vmmov %vm8072_vm2 }
 0x324   : > { %v2779_v8 = vpack.c.bf16 %v2651_v59, %v2651_v59  ;;  %v3034_v46 = vpack.c.bf16 %v2778_v58, %v2778_v58  ;;  %v2985_v52 = vunpack.c.l.b16 %v2921_v11  ;;  %v2986_v29 = vunpack.c.l.b16 %v2922_v32  ;;  %vm8080_vm9 = vmmov %vm8072_vm2 }
 0x325   : > { %v2873_v42 = vunpack.c.l.b16 %v2809_v7  ;;  %v2874_v41 = vunpack.c.l.b16 %v2810_v28  ;;  %v3097_v0 = vunpack.c.l.b16 %v3033_v44  ;;  %vm8010_vm0 = vcmask 1043456   ;;  %vm8081_vm4 = vmmov %vm8072_vm2 }
 0x326   : > { %v2843_v34 = vunpack.c.l.b16 %v2779_v8  ;;  %v3098_v53 = vunpack.c.l.b16 %v3034_v46  ;;  %v6530_v6 = vpack.c.b16 %v2986_v29, %v2985_v52  ;;  %vm8011_vm1 = vmmov %vm8010_vm0 }
 0x327   : > { %v6532_v36 = vpop.f32.mrf.mxu2  ;;  %4714 = vmatmul.msk.bf16.gmra.mxu3 %vm3120_vm11, %v6348_v62  ;;  %v6536_v20 = vpack.c.b16 %v2874_v41, %v2873_v42  ;;  %vm8018_vm13 = vmmov %vm8010_vm0 }
 0x328   : > { %8005 = vst [vmem:[#allocation24_spill] sm:$0xff] %v6530_v6  ;;  %v2875_v18 = vpack.c.b16 %v2844_v17, %v2843_v34  ;;  %v6538_v57 = vpack.c.b16 %v3098_v53, %v3097_v0  ;;  %v8008_v53 = vld [vmem:[#allocation48_spill] sm:$0xff]  ;;  %v4772_v17 = vld [vmem:[%s7372_s3 + $0x18] sm:$0xf]  ;;  %vm8019_vm14 = vmmov %vm8010_vm0 }
 0x329   : > { %8006 = vst [vmem:[#allocation33_spill] sm:$0xff] %v6532_v36  ;;  %vm8083_vm10 = vmmov %vm8072_vm2 }
 0x32a   : > { %8007 = vst [vmem:[#allocation42_spill] sm:$0xff] %v6538_v57  ;;  %4674 = vmatmul.msk.bf16.gmra.mxu1 %vm3120_vm11, %v2875_v18  ;;  %4722 = vmatmul.msk.bf16.vlgmr.msrb.gmra.mxu0 %vm3120_vm11, %v2875_v18  ;;  %v6542_v11 = vpop.f32.mrf.mxu3  ;;  %v4025_v18 = vsel %vm8010_vm0, %v4772_v17, 0  ;;  %vm8084_vm0 = vmmov %vm8072_vm2 }
 0x32b   : > { %4034 = vmatpush.bf16.msra.mxu3 %v4025_v18 }
 0x32c   : > { %4698 = vmatmul.msk.bf16.gmra.mxu2 %vm3120_vm11, %v6329_v12 }
 0x32f   : > { %v6546_v32 = vpop.f32.mrf.mxu2 }
 0x332   : > { %v6548_v45 = vpop.f32.mrf.mxu3 }
 0x337   : > { %v6550_v7 = vpop.f32.mrf.mxu2  ;;  %4715 = vmatmul.msk.bf16.gmra.mxu3 %vm3120_vm11, %v6373_v61 }
 0x33a   : > { %4675 = vmatmul.msk.bf16.gmra.mxu1 %vm3120_vm11, %v8008_v53  ;;  %4723 = vmatmul.msk.bf16.gmra.mxu0 %vm3120_vm11, %v8008_v53  ;;  %v6558_v34 = vpop.f32.mrf.mxu3 }
 0x33c   : > { %4699 = vmatmul.msk.bf16.gmra.mxu2 %vm3120_vm11, %v6354_v40  ;;  %v3181_v40 = vpop.f32.mrf.mxu1 }
 0x33f   : > { %v6562_v41 = vpop.f32.mrf.mxu2 }
 0x342   : > { %v6564_v52 = vpop.f32.mrf.mxu3 }
 0x347   : > { %v6566_v37 = vpop.f32.mrf.mxu2  ;;  %4716 = vmatmul.msk.bf16.gmra.mxu3 %vm3120_vm11, %v6398_v39 }
 0x34a   : > { %4676 = vmatmul.msk.bf16.gmra.mxu1 %vm3120_vm11, %v6175_v2  ;;  %4724 = vmatmul.msk.bf16.gmra.mxu0 %vm3120_vm11, %v6175_v2  ;;  %v6574_v30 = vpop.f32.mrf.mxu3 }
 0x34c   : > { %4700 = vmatmul.msk.bf16.gmra.mxu2 %vm3120_vm11, %v6379_v63 }
 0x34f   : > { %v6578_v47 = vpop.f32.mrf.mxu2 }
 0x352   : > { %v6580_v59 = vpop.f32.mrf.mxu3 }
 0x357   : > { %v6582_v28 = vpop.f32.mrf.mxu2  ;;  %4717 = vmatmul.msk.bf16.gmra.mxu3 %vm3120_vm11, %v6423_v50 }
 0x35a   : > { %4677 = vmatmul.msk.bf16.gmra.mxu1 %vm3120_vm11, %v8009_v9  ;;  %4725 = vmatmul.msk.bf16.gmra.mxu0 %vm3120_vm11, %v8009_v9  ;;  %v6590_v58 = vpop.f32.mrf.mxu3 }
 0x35c   : > { %4701 = vmatmul.msk.bf16.gmra.mxu2 %vm3120_vm11, %v6404_v5 }
 0x35f   : > { %v6594_v44 = vpop.f32.mrf.mxu2 }
 0x362   : > { %v6596_v8 = vpop.f32.mrf.mxu3 }
 0x367   : > { %v6598_v46 = vpop.f32.mrf.mxu2  ;;  %4718 = vmatmul.msk.bf16.gmra.mxu3 %vm3120_vm11, %v6454_v54 }
 0x36a   : > { %4678 = vmatmul.msk.bf16.gmra.mxu1 %vm3120_vm11, %v6237_v22  ;;  %4726 = vmatmul.msk.bf16.gmra.mxu0 %vm3120_vm11, %v6237_v22  ;;  %v6606_v29 = vpop.f32.mrf.mxu3 }
 0x36c   : > { %4702 = vmatmul.msk.bf16.gmra.mxu2 %vm3120_vm11, %v6429_v13  ;;  %v4755_v13 = vld [vmem:[%s7372_s3 + $0x14] sm:$0xf] }
 0x36d   : > { %v3899_v5 = vsel %vm8011_vm1, %v4755_v13, 0  ;;  %vm8086_vm1 = vmmov %vm8084_vm0 }
 0x36e   : > { %3908 = vmatpush.bf16.msra.mxu2 %v3899_v5 }
 0x36f   : > { %v6610_v42 = vpop.f32.mrf.mxu2 }
 0x372   : > { %v6612_v0 = vpop.f32.mrf.mxu3 }
 0x377   : > { %v6618_v6 = vpop.f32.mrf.mxu2  ;;  %4719 = vmatmul.msk.bf16.gmra.mxu3 %vm3120_vm11, %v6481_v15 }
 0x37a   : > { %4679 = vmatmul.msk.bf16.gmra.mxu1 %vm3120_vm11, %v6263_v51  ;;  %4727 = vmatmul.msk.bf16.gmra.mxu0 %vm3120_vm11, %v6263_v51  ;;  %v6630_v17 = vpop.f32.mrf.mxu3 }
 0x37c   : > { %4703 = vmatmul.msk.bf16.gmra.mxu2 %vm3120_vm11, %v6462_v56 }
 0x37f   : > { %v6634_v18 = vpop.f32.mrf.mxu2 }
 0x382   : > { %v6636_v63 = vpop.f32.mrf.mxu3 }
 0x387   : > { %4720 = vmatmul.msk.bf16.gmra.mxu3 %vm3120_vm11, %v6508_v24  ;;  %v6640_v13 = vpop.f32.mrf.mxu2  ;;  %v6670_v24 = vpop.f32.mrf.mxu1 }
 0x388   : > { %8013 = vst [vmem:[#allocation34_spill] sm:$0xff] %v6670_v24 }
 0x38a   : > { %4680 = vmatmul.msk.bf16.gmra.mxu1 %vm3120_vm11, %v6286_v43  ;;  %4728 = vmatmul.msk.bf16.gmra.mxu0 %vm3120_vm11, %v6286_v43  ;;  %v6648_v5 = vpop.f32.mrf.mxu3 }
 0x38c   : > { %4704 = vmatmul.msk.bf16.gmra.mxu2 %vm3120_vm11, %v6487_v60  ;;  %v6663_v60 = vld [vmem:[%s7373_s4] ss:$0 sm:$0xff] }
 0x38d   : > { %v3261_v57 = vadd.f32 %v6663_v60, %v3181_v40 }
 0x38f   : > { %v6650_v56 = vpop.f32.mrf.mxu2  ;;  %v3432_v15 = vadd.f32 %v6506_v19, %v3261_v57 }
 0x391   : > { %v3603_v39 = vadd.f32 %v6494_v25, %v3432_v15 }
 0x392   : > { %v6652_v12 = vpop.f32.mrf.mxu3 }
 0x393   : > { %8012 = vst [vmem:[#allocation15_spill] sm:$0xff] %v6652_v12 }
 0x397   : > { %4773 = vmatmul.msk.bf16.vlgmr.msra.gmra.mxu3 %vm3120_vm11, %v8008_v53  ;;  %v6665_v36 = vpop.f32.mrf.mxu2 }
 0x39a   : > { %4681 = vmatmul.msk.bf16.gmra.mxu1 %vm3120_vm11, %v6310_v1  ;;  %4729 = vmatmul.msk.bf16.gmra.mxu0 %vm3120_vm11, %v6310_v1  ;;  %v6672_v53 = vpop.f32.mrf.mxu3 }
 0x39c   : > { %4756 = vmatmul.msk.bf16.vlgmr.msra.gmra.mxu2 %vm3120_vm11, %v6137_v55 }
 0x39f   : > { %v6675_v54 = vpop.f32.mrf.mxu2 }
 0x3a2   : > { %v6686_v55 = vpop.f32.mrf.mxu3 }
 0x3a7   : > { %v3186_v50 = vpop.f32.mrf.mxu1  ;;  %4774 = vmatmul.msk.bf16.gmra.mxu3 %vm3120_vm11, %v6175_v2  ;;  %v3652_v61 = vpop.f32.mrf.mxu0 }
 0x3a8   : > { %v6680_v12 = vadd.f32 %v3652_v61, %v3603_v39  ;;  %v3263_v40 = vadd.f32 %v6663_v60, %v3186_v50  ;;  %v6691_v25 = vpop.f32.mrf.mxu2 }
 0x3aa   : > { %8014 = vst [vmem:[#allocation70_spill] sm:$0xff] %v6680_v12  ;;  %4682 = vmatmul.msk.bf16.gmra.mxu1 %vm3120_vm11, %v6335_v31  ;;  %4730 = vmatmul.msk.bf16.gmra.mxu0 %vm3120_vm11, %v6335_v31  ;;  %v3434_v61 = vadd.f32 %v6546_v32, %v3263_v40  ;;  %v6696_v39 = vpop.f32.mrf.mxu3 }
 0x3ac   : > { %4757 = vmatmul.msk.bf16.gmra.mxu2 %vm3120_vm11, %v6163_v48  ;;  %v3605_v12 = vadd.f32 %v6542_v11, %v3434_v61 }
 0x3af   : > { %v3188_v15 = vpop.f32.mrf.mxu1  ;;  %v6693_v2 = vpop.f32.mrf.mxu0 }
 0x3b0   : > { %8015 = vst [vmem:[#allocation39_spill] sm:$0xff] %v6693_v2  ;;  %v3264_v19 = vadd.f32 %v6663_v60, %v3188_v15  ;;  %v6704_v50 = vpop.f32.mrf.mxu2 }
 0x3b2   : > { %v3435_v32 = vadd.f32 %v6550_v7, %v3264_v19  ;;  %v6713_v11 = vpop.f32.mrf.mxu3 }
 0x3b3   : > { %8017 = vst [vmem:[#allocation40_spill] sm:$0xff] %v6713_v11 }
 0x3b7   : > { %v3191_v57 = vpop.f32.mrf.mxu1  ;;  %4775 = vmatmul.msk.bf16.gmra.mxu3 %vm3120_vm11, %v8009_v9  ;;  %v3657_v48 = vpop.f32.mrf.mxu0 }
 0x3b8   : > { %v6702_v24 = vadd.f32 %v3657_v48, %v3605_v12  ;;  %v3265_v9 = vadd.f32 %v6663_v60, %v3191_v57  ;;  %v3606_v48 = vadd.f32 %v6548_v45, %v3435_v32 }
 0x3ba   : > { %8016 = vst [vmem:[#allocation43_spill] sm:$0xff] %v6702_v24  ;;  %4683 = vmatmul.msk.bf16.gmra.mxu1 %vm3120_vm11, %v6360_v49  ;;  %4731 = vmatmul.msk.bf16.gmra.mxu0 %vm3120_vm11, %v6360_v49  ;;  %v3436_v61 = vadd.f32 %v6562_v41, %v3265_v9  ;;  %v6720_v24 = vpop.f32.mrf.mxu2  ;;  %v6726_v57 = vpop.f32.mrf.mxu3 }
 0x3bc   : > { %4758 = vmatmul.msk.bf16.gmra.mxu2 %vm3120_vm11, %v6189_v14  ;;  %v3607_v19 = vadd.f32 %v6558_v34, %v3436_v61 }
 0x3bf   : > { %v3193_v40 = vpop.f32.mrf.mxu1  ;;  %v3659_v12 = vpop.f32.mrf.mxu0 }
 0x3c0   : > { %v6717_v15 = vadd.f32 %v3659_v12, %v3606_v48  ;;  %v3266_v2 = vadd.f32 %v6663_v60, %v3193_v40 }
 0x3c2   : > { %v3437_v45 = vadd.f32 %v6566_v37, %v3266_v2  ;;  %v6737_v34 = vpop.f32.mrf.mxu2  ;;  %v6743_v40 = vpop.f32.mrf.mxu3 }
 0x3c4   : > { %v3608_v32 = vadd.f32 %v6564_v52, %v3437_v45 }
 0x3c7   : > { %v3196_v7 = vpop.f32.mrf.mxu1  ;;  %4776 = vmatmul.msk.bf16.gmra.mxu3 %vm3120_vm11, %v6237_v22  ;;  %v3662_v14 = vpop.f32.mrf.mxu0 }
 0x3c8   : > { %v6728_v11 = vadd.f32 %v3662_v14, %v3607_v19  ;;  %v3267_v22 = vadd.f32 %v6663_v60, %v3196_v7 }
 0x3ca   : > { %4684 = vmatmul.msk.bf16.gmra.mxu1 %vm3120_vm11, %v6385_v4  ;;  %4732 = vmatmul.msk.bf16.gmra.mxu0 %vm3120_vm11, %v6385_v4  ;;  %v3438_v48 = vadd.f32 %v6578_v47, %v3267_v22  ;;  %v6750_v61 = vpop.f32.mrf.mxu2 }
 0x3cc   : > { %4759 = vmatmul.msk.bf16.gmra.mxu2 %vm3120_vm11, %v6216_v27  ;;  %v3609_v2 = vadd.f32 %v6574_v30, %v3438_v48  ;;  %v6761_v30 = vpop.f32.mrf.mxu3 }
 0x3cf   : > { %v3198_v41 = vpop.f32.mrf.mxu1  ;;  %v3664_v14 = vpop.f32.mrf.mxu0 }
 0x3d0   : > { %v6741_v9 = vadd.f32 %v3664_v14, %v3608_v32  ;;  %v3268_v12 = vadd.f32 %v6663_v60, %v3198_v41 }
 0x3d2   : > { %v3439_v52 = vadd.f32 %v6582_v28, %v3268_v12  ;;  %v6767_v32 = vpop.f32.mrf.mxu2 }
 0x3d4   : > { %v3610_v45 = vadd.f32 %v6580_v59, %v3439_v52  ;;  %v6770_v48 = vpop.f32.mrf.mxu3 }
 0x3d7   : > { %v3201_v37 = vpop.f32.mrf.mxu1  ;;  %4777 = vmatmul.msk.bf16.gmra.mxu3 %vm3120_vm11, %v6263_v51  ;;  %v3667_v7 = vpop.f32.mrf.mxu0 }
 0x3d8   : > { %v6752_v19 = vadd.f32 %v3667_v7, %v3609_v2  ;;  %v3269_v51 = vadd.f32 %v6663_v60, %v3201_v37 }
 0x3da   : > { %4685 = vmatmul.msk.bf16.gmra.mxu1 %vm3120_vm11, %v6410_v38  ;;  %4733 = vmatmul.msk.bf16.gmra.mxu0 %vm3120_vm11, %v6410_v38  ;;  %v3440_v14 = vadd.f32 %v6594_v44, %v3269_v51  ;;  %v6783_v44 = vpop.f32.mrf.mxu2 }
 0x3dc   : > { %4760 = vmatmul.msk.bf16.gmra.mxu2 %vm3120_vm11, %v6251_v16  ;;  %v3611_v2 = vadd.f32 %v6590_v58, %v3440_v14 }
 0x3df   : > { %v3203_v47 = vpop.f32.mrf.mxu1  ;;  %v3669_v22 = vpop.f32.mrf.mxu0 }
 0x3e0   : > { %v6765_v41 = vadd.f32 %v3669_v22, %v3610_v45  ;;  %v3270_v28 = vadd.f32 %v6663_v60, %v3203_v47  ;;  %v6789_v47 = vpop.f32.mrf.mxu3 }
 0x3e2   : > { %v3441_v59 = vadd.f32 %v6598_v46, %v3270_v28  ;;  %v6794_v14 = vpop.f32.mrf.mxu2 }
 0x3e7   : > { %v3206_v12 = vpop.f32.mrf.mxu1  ;;  %4778 = vmatmul.msk.bf16.gmra.mxu3 %vm3120_vm11, %v6286_v43  ;;  %v3672_v37 = vpop.f32.mrf.mxu0  ;;  %v3612_v43 = vadd.f32 %v6596_v8, %v3441_v59  ;;  %v4788_v8 = vld [vmem:[%s7372_s3 + $0x1c] sm:$0xf] }
 0x3e8   : > { %v6776_v7 = vadd.f32 %v3672_v37, %v3611_v2  ;;  %v3271_v58 = vadd.f32 %v6663_v60, %v3206_v12  ;;  %v4151_v59 = vsel %vm8018_vm13, %v4788_v8, 0  ;;  %vm8087_vm13 = vmmov %vm8084_vm0 }
 0x3e9   : > { %4160 = vmatpush.bf16.msra.mxu0 %v4151_v59 }
 0x3ea   : > { %4686 = vmatmul.msk.bf16.gmra.mxu1 %vm3120_vm11, %v6435_v23  ;;  %4734 = vmatmul.msk.bf16.gmra.mxu0 %vm3120_vm11, %v6435_v23  ;;  %v3442_v22 = vadd.f32 %v6610_v42, %v3271_v58  ;;  %v6812_v42 = vpop.f32.mrf.mxu3 }
 0x3ec   : > { %4761 = vmatmul.msk.bf16.gmra.mxu2 %vm3120_vm11, %v6275_v33  ;;  %v3613_v2 = vadd.f32 %v6606_v29, %v3442_v22  ;;  %v4804_v29 = vld [vmem:[%s7372_s3 + $0x20] sm:$0xf]  ;;  %v6821_v22 = vpop.f32.mrf.mxu2 }
 0x3ed   : > { %v4277_v58 = vsel %vm8019_vm14, %v4804_v29, 0  ;;  %vm8089_vm14 = vmmov %vm8084_vm0 }
 0x3ee   : > { %4286 = vmatpush.bf16.msra.mxu1 %v4277_v58 }
 0x3ef   : > { %v3208_v52 = vpop.f32.mrf.mxu1  ;;  %v3674_v51 = vpop.f32.mrf.mxu0 }
 0x3f0   : > { %v6791_v45 = vadd.f32 %v3674_v51, %v3612_v43  ;;  %v3272_v46 = vadd.f32 %v6663_v60, %v3208_v52 }
 0x3f7   : > { %v3211_v28 = vpop.f32.mrf.mxu1  ;;  %4779 = vmatmul.msk.bf16.gmra.mxu3 %vm3120_vm11, %v6310_v1  ;;  %v3677_v12 = vpop.f32.mrf.mxu0  ;;  %v3443_v1 = vadd.f32 %v6618_v6, %v3272_v46 }
 0x3f8   : > { %v6800_v37 = vadd.f32 %v3677_v12, %v3613_v2  ;;  %v3273_v52 = vadd.f32 %v6663_v60, %v3211_v28  ;;  %v6826_v46 = vpop.f32.mrf.mxu3 }
 0x3f9   : > { %v3614_v51 = vadd.f32 %v6612_v0, %v3443_v1  ;;  %v6834_v0 = vpop.f32.mrf.mxu2 }
 0x3fa   : > { %4687 = vmatmul.msk.bf16.gmra.mxu1 %vm3120_vm11, %v6468_v3  ;;  %4735 = vmatmul.msk.bf16.gmra.mxu0 %vm3120_vm11, %v6468_v3  ;;  %v3444_v6 = vadd.f32 %v6634_v18, %v3273_v52 }
 0x3fc   : > { %4762 = vmatmul.msk.bf16.gmra.mxu2 %vm3120_vm11, %v6298_v21  ;;  %v3615_v59 = vadd.f32 %v6630_v17, %v3444_v6 }
 0x3ff   : > { %v3213_v43 = vpop.f32.mrf.mxu1  ;;  %v3679_v2 = vpop.f32.mrf.mxu0 }
 0x400   : > { %v6823_v12 = vadd.f32 %v3679_v2, %v3614_v51  ;;  %v3274_v8 = vadd.f32 %v6663_v60, %v3213_v43  ;;  %v6843_v17 = vpop.f32.mrf.mxu3 }
 0x401   : > { %v6850_v6 = vpop.f32.mrf.mxu2 }
 0x402   : > { %v3445_v18 = vadd.f32 %v6640_v13, %v3274_v8 }
 0x404   : > { %v3616_v52 = vadd.f32 %v6636_v63, %v3445_v18  ;;  %v8020_v18 = vld [vmem:[#allocation15_spill] sm:$0xff] }
 0x407   : > { %v3216_v29 = vpop.f32.mrf.mxu1  ;;  %4780 = vmatmul.msk.bf16.gmra.mxu3 %vm3120_vm11, %v6335_v31  ;;  %v3682_v28 = vpop.f32.mrf.mxu0 }
 0x408   : > { %v6832_v58 = vadd.f32 %v3682_v28, %v3615_v59  ;;  %v3275_v31 = vadd.f32 %v6663_v60, %v3216_v29  ;;  %v6856_v29 = vpop.f32.mrf.mxu3 }
 0x409   : > { %v6867_v63 = vpop.f32.mrf.mxu2 }
 0x40a   : > { %4688 = vmatmul.msk.bf16.gmra.mxu1 %vm3120_vm11, %v6492_v35  ;;  %4736 = vmatmul.msk.bf16.gmra.mxu0 %vm3120_vm11, %v6492_v35  ;;  %v3446_v2 = vadd.f32 %v6650_v56, %v3275_v31 }
 0x40c   : > { %4763 = vmatmul.msk.bf16.gmra.mxu2 %vm3120_vm11, %v6323_v26  ;;  %v3617_v8 = vadd.f32 %v6648_v5, %v3446_v2 }
 0x40f   : > { %v3218_v1 = vpop.f32.mrf.mxu1  ;;  %v3684_v43 = vpop.f32.mrf.mxu0 }
 0x410   : > { %v6847_v51 = vadd.f32 %v3684_v43, %v3616_v52  ;;  %v3276_v59 = vadd.f32 %v6663_v60, %v3218_v1  ;;  %v6873_v43 = vpop.f32.mrf.mxu3 }
 0x412   : > { %v3447_v56 = vadd.f32 %v6665_v36, %v3276_v59 }
 0x414   : > { %v3618_v31 = vadd.f32 %v8020_v18, %v3447_v56  ;;  %v8021_v56 = vld [vmem:[#allocation21_spill] sm:$0xff] }
 0x417   : > { %v3221_v13 = vpop.f32.mrf.mxu1  ;;  %4781 = vmatmul.msk.bf16.gmra.mxu3 %vm3120_vm11, %v6360_v49  ;;  %v3687_v28 = vpop.f32.mrf.mxu0 }
 0x418   : > { %v6858_v26 = vadd.f32 %v3687_v28, %v3617_v8  ;;  %v3277_v49 = vadd.f32 %v6663_v60, %v3221_v13  ;;  %v6880_v8 = vpop.f32.mrf.mxu2 }
 0x41a   : > { %4737 = vmatmul.msk.bf16.gmra.mxu0 %vm3120_vm11, %v6536_v20  ;;  %4739 = vmatmul.msk.bf16.vlgmr.msrb.gmra.mxu1 %vm3120_vm11, %v6116_v10  ;;  %v3448_v2 = vadd.f32 %v6675_v54, %v3277_v49  ;;  %v8022_v49 = vld [vmem:[#allocation62_spill] sm:$0xff] }
 0x41c   : > { %4764 = vmatmul.msk.bf16.gmra.mxu2 %vm3120_vm11, %v6348_v62  ;;  %v3619_v59 = vadd.f32 %v6672_v53, %v3448_v2  ;;  %v6891_v53 = vpop.f32.mrf.mxu3 }
 0x41f   : > { %v3223_v5 = vpop.f32.mrf.mxu1  ;;  %v3689_v1 = vpop.f32.mrf.mxu0 }
 0x420   : > { %v6871_v52 = vadd.f32 %v3689_v1, %v3618_v31  ;;  %v3278_v10 = vadd.f32 %v6663_v60, %v3223_v5  ;;  %v6897_v2 = vpop.f32.mrf.mxu2 }
 0x422   : > { %v3449_v54 = vadd.f32 %v6691_v25, %v3278_v10 }
 0x424   : > { %v3620_v18 = vadd.f32 %v6686_v55, %v3449_v54  ;;  %v8023_v55 = vld [vmem:[#allocation51_spill] sm:$0xff] }
 0x427   : > { %v3226_v36 = vpop.f32.mrf.mxu1  ;;  %4782 = vmatmul.msk.bf16.gmra.mxu3 %vm3120_vm11, %v6385_v4  ;;  %v3692_v13 = vpop.f32.mrf.mxu0 }
 0x428   : > { %v6882_v28 = vadd.f32 %v3692_v13, %v3619_v59  ;;  %v3279_v4 = vadd.f32 %v6663_v60, %v3226_v36  ;;  %v6900_v13 = vpop.f32.mrf.mxu3  ;;  %v6913_v54 = vpop.f32.mrf.mxu2 }
 0x42a   : > { %4740 = vmatmul.msk.bf16.gmra.mxu1 %vm3120_vm11, %v8021_v56  ;;  %4789 = vmatmul.msk.bf16.vlgmr.msra.gmra.mxu0 %vm3120_vm11, %v8021_v56  ;;  %v3450_v59 = vadd.f32 %v6704_v50, %v3279_v4  ;;  %v8024_v4 = vld [vmem:[#allocation63_spill] sm:$0xff] }
 0x42c   : > { %4765 = vmatmul.msk.bf16.gmra.mxu2 %vm3120_vm11, %v8022_v49  ;;  %v3621_v56 = vadd.f32 %v6696_v39, %v3450_v59 }
 0x42f   : > { %v3228_v5 = vpop.f32.mrf.mxu1  ;;  %v3694_v31 = vpop.f32.mrf.mxu0 }
 0x430   : > { %v6895_v1 = vadd.f32 %v3694_v31, %v3620_v18  ;;  %v3280_v25 = vadd.f32 %v6663_v60, %v3228_v5  ;;  %v6919_v59 = vpop.f32.mrf.mxu3 }
 0x432   : > { %v3451_v50 = vadd.f32 %v6720_v24, %v3280_v25 }
 0x437   : > { %v3231_v10 = vpop.f32.mrf.mxu1  ;;  %4783 = vmatmul.msk.bf16.gmra.mxu3 %vm3120_vm11, %v6410_v38  ;;  %v3697_v36 = vpop.f32.mrf.mxu0  ;;  %v8025_v38 = vld [vmem:[#allocation40_spill] sm:$0xff] }
 0x438   : > { %v6906_v49 = vadd.f32 %v3697_v36, %v3621_v56  ;;  %v3281_v39 = vadd.f32 %v6663_v60, %v3231_v10  ;;  %v3622_v18 = vadd.f32 %v8025_v38, %v3451_v50  ;;  %v8026_v50 = vld [vmem:[#allocation28_spill] sm:$0xff] }
 0x43a   : > { %4741 = vmatmul.msk.bf16.gmra.mxu1 %vm3120_vm11, %v8023_v55  ;;  %4790 = vmatmul.msk.bf16.gmra.mxu0 %vm3120_vm11, %v8023_v55  ;;  %v3452_v36 = vadd.f32 %v6737_v34, %v3281_v39  ;;  %v6924_v55 = vpop.f32.mrf.mxu2  ;;  %v6936_v34 = vpop.f32.mrf.mxu3 }
 0x43c   : > { %4766 = vmatmul.msk.bf16.gmra.mxu2 %vm3120_vm11, %v8024_v4  ;;  %v3623_v62 = vadd.f32 %v6726_v57, %v3452_v36 }
 0x43f   : > { %v3233_v5 = vpop.f32.mrf.mxu1  ;;  %v3699_v31 = vpop.f32.mrf.mxu0 }
 0x440   : > { %v6921_v56 = vadd.f32 %v3699_v31, %v3622_v18  ;;  %v3282_v24 = vadd.f32 %v6663_v60, %v3233_v5  ;;  %v8027_v5 = vld [vmem:[#allocation65_spill] sm:$0xff] }
 0x442   : > { %v3453_v39 = vadd.f32 %v6750_v61, %v3282_v24 }
 0x447   : > { %v3236_v25 = vpop.f32.mrf.mxu1  ;;  %4784 = vmatmul.msk.bf16.gmra.mxu3 %vm3120_vm11, %v6435_v23  ;;  %v3702_v10 = vpop.f32.mrf.mxu0  ;;  %v3624_v23 = vadd.f32 %v6743_v40, %v3453_v39  ;;  %v8028_v39 = vld [vmem:[#allocation29_spill] sm:$0xff] }
 0x448   : > { %v6930_v4 = vadd.f32 %v3702_v10, %v3623_v62  ;;  %v3283_v57 = vadd.f32 %v6663_v60, %v3236_v25  ;;  %v6943_v62 = vpop.f32.mrf.mxu2  ;;  %v6948_v10 = vpop.f32.mrf.mxu3 }
 0x44a   : > { %4742 = vmatmul.msk.bf16.gmra.mxu1 %vm3120_vm11, %v8026_v50  ;;  %4791 = vmatmul.msk.bf16.gmra.mxu0 %vm3120_vm11, %v8026_v50  ;;  %v3454_v36 = vadd.f32 %v6767_v32, %v3283_v57  ;;  %v8029_v57 = vld [vmem:[#allocation38_spill] sm:$0xff] }
 0x44c   : > { %4767 = vmatmul.msk.bf16.gmra.mxu2 %vm3120_vm11, %v8027_v5  ;;  %v3625_v24 = vadd.f32 %v6761_v30, %v3454_v36 }
 0x44f   : > { %v3238_v38 = vpop.f32.mrf.mxu1  ;;  %v3704_v18 = vpop.f32.mrf.mxu0 }
 0x450   : > { %v6945_v31 = vadd.f32 %v3704_v18, %v3624_v23  ;;  %v3284_v50 = vadd.f32 %v6663_v60, %v3238_v38  ;;  %v6956_v40 = vpop.f32.mrf.mxu2  ;;  %v6965_v30 = vpop.f32.mrf.mxu3 }
 0x452   : > { %v3455_v32 = vadd.f32 %v6783_v44, %v3284_v50 }
 0x454   : > { %v3626_v23 = vadd.f32 %v6770_v48, %v3455_v32  ;;  %v8031_v48 = vld [vmem:[#allocation55_spill] sm:$0xff]  ;;  %v8032_v32 = vld [vmem:[#allocation25_spill] sm:$0xff] }
 0x457   : > { %v3241_v61 = vpop.f32.mrf.mxu1  ;;  %4785 = vmatmul.msk.bf16.gmra.mxu3 %vm3120_vm11, %v6468_v3  ;;  %v3707_v25 = vpop.f32.mrf.mxu0 }
 0x458   : > { %v6954_v5 = vadd.f32 %v3707_v25, %v3625_v24  ;;  %v3285_v3 = vadd.f32 %v6663_v60, %v3241_v61  ;;  %v6972_v25 = vpop.f32.mrf.mxu2  ;;  %v6978_v61 = vpop.f32.mrf.mxu3 }
 0x45a   : > { %4743 = vmatmul.msk.bf16.gmra.mxu1 %vm3120_vm11, %v8028_v39  ;;  %4792 = vmatmul.msk.bf16.gmra.mxu0 %vm3120_vm11, %v8028_v39  ;;  %v3456_v24 = vadd.f32 %v6794_v14, %v3285_v3 }
 0x45c   : > { %4768 = vmatmul.msk.bf16.gmra.mxu2 %vm3120_vm11, %v8029_v57  ;;  %v3627_v50 = vadd.f32 %v6789_v47, %v3456_v24 }
 0x45f   : > { %v3243_v38 = vpop.f32.mrf.mxu1  ;;  %v3709_v18 = vpop.f32.mrf.mxu0 }
 0x460   : > { %v6969_v36 = vadd.f32 %v3709_v18, %v3626_v23  ;;  %v3286_v39 = vadd.f32 %v6663_v60, %v3243_v38  ;;  %v6989_v47 = vpop.f32.mrf.mxu2  ;;  %v6995_v18 = vpop.f32.mrf.mxu3 }
 0x462   : > { %v3457_v14 = vadd.f32 %v6821_v22, %v3286_v39 }
 0x464   : > { %v3628_v38 = vadd.f32 %v6812_v42, %v3457_v14  ;;  %v8035_v42 = vld [vmem:[#allocation36_spill] sm:$0xff]  ;;  %v8036_v14 = vld [vmem:[#allocation26_spill] sm:$0xff] }
 0x467   : > { %v3246_v44 = vpop.f32.mrf.mxu1  ;;  %4786 = vmatmul.msk.bf16.gmra.mxu3 %vm3120_vm11, %v6492_v35  ;;  %v3712_v57 = vpop.f32.mrf.mxu0 }
 0x468   : > { %v6980_v21 = vadd.f32 %v3712_v57, %v3627_v50  ;;  %v3287_v35 = vadd.f32 %v6663_v60, %v3246_v44 }
 0x46a   : > { %8030 = vst [vmem:[#allocation19_spill] sm:$0xff] %v6980_v21  ;;  %4744 = vmatmul.msk.bf16.gmra.mxu1 %vm3120_vm11, %v8031_v48  ;;  %4793 = vmatmul.msk.bf16.gmra.mxu0 %vm3120_vm11, %v8031_v48  ;;  %v3458_v24 = vadd.f32 %v6834_v0, %v3287_v35  ;;  %v7002_v48 = vpop.f32.mrf.mxu2 }
 0x46c   : > { %4769 = vmatmul.msk.bf16.gmra.mxu2 %vm3120_vm11, %v8032_v32  ;;  %v3629_v39 = vadd.f32 %v6826_v46, %v3458_v24  ;;  %v7013_v46 = vpop.f32.mrf.mxu3 }
 0x46f   : > { %v3248_v3 = vpop.f32.mrf.mxu1  ;;  %v3714_v57 = vpop.f32.mrf.mxu0 }
 0x470   : > { %v6993_v23 = vadd.f32 %v3714_v57, %v3628_v38  ;;  %v3288_v50 = vadd.f32 %v6663_v60, %v3248_v3 }
 0x472   : > { %8033 = vst [vmem:[#allocation74_spill] sm:$0xff] %v6993_v23  ;;  %v3459_v0 = vadd.f32 %v6850_v6, %v3288_v50  ;;  %v7019_v24 = vpop.f32.mrf.mxu2 }
 0x474   : > { %v3630_v3 = vadd.f32 %v6843_v17, %v3459_v0  ;;  %v8040_v17 = vld [vmem:[#allocation37_spill] sm:$0xff] }
 0x477   : > { %v3251_v22 = vpop.f32.mrf.mxu1  ;;  %4787 = vmatmul.msk.bf16.gmra.mxu3 %vm3120_vm11, %v6536_v20  ;;  %v3717_v44 = vpop.f32.mrf.mxu0 }
 0x478   : > { %v7004_v32 = vadd.f32 %v3717_v44, %v3629_v39  ;;  %v3289_v20 = vadd.f32 %v6663_v60, %v3251_v22  ;;  %v7022_v44 = vpop.f32.mrf.mxu3 }
 0x47a   : > { %8034 = vst [vmem:[#allocation31_spill] sm:$0xff] %v7004_v32  ;;  %4745 = vmatmul.msk.bf16.gmra.mxu1 %vm3120_vm11, %v8035_v42  ;;  %4794 = vmatmul.msk.bf16.gmra.mxu0 %vm3120_vm11, %v8035_v42  ;;  %v3460_v39 = vadd.f32 %v6867_v63, %v3289_v20  ;;  %v7034_v0 = vpop.f32.mrf.mxu2  ;;  %v8041_v20 = vld [vmem:[#allocation42_spill] sm:$0xff] }
 0x47c   : > { %4770 = vmatmul.msk.bf16.gmra.mxu2 %vm3120_vm11, %v8036_v14  ;;  %v3631_v42 = vadd.f32 %v6856_v29, %v3460_v39  ;;  %v8038_v14 = vmov 0  }
 0x47f   : > { %v3253_v35 = vpop.f32.mrf.mxu1  ;;  %v3719_v38 = vpop.f32.mrf.mxu0 }
 0x480   : > { %v7017_v57 = vadd.f32 %v3719_v38, %v3630_v3  ;;  %v3290_v6 = vadd.f32 %v6663_v60, %v3253_v35 }
 0x482   : > { %8037 = vst [vmem:[#allocation46_spill] sm:$0xff] %v7017_v57  ;;  %v3461_v63 = vadd.f32 %v6880_v8, %v3290_v6  ;;  %v8043_v57 = vld [vmem:[#allocation33_spill] sm:$0xff] }
 0x484   : > { %v3632_v3 = vadd.f32 %v6873_v43, %v3461_v63  ;;  %v8045_v43 = vld [vmem:[#allocation3_spill] sm:$0xff]  ;;  %v8046_v63 = vld [vmem:[#allocation12_spill] sm:$0xff] }
 0x487   : > { %v3256_v50 = vpop.f32.mrf.mxu1  ;;  %4110 = vmatmul.bf16.gmra.mxu3 %v8038_v14  ;;  %v3722_v22 = vpop.f32.mrf.mxu0 }
 0x488   : > { %v7027_v32 = vadd.f32 %v3722_v22, %v3631_v42  ;;  %v3291_v29 = vadd.f32 %v6663_v60, %v3256_v50  ;;  %v8042_v22 = vld [vmem:[#allocation34_spill] sm:$0xff] }
 0x489   : > { %v8044_v50 = vld [vmem:[#allocation70_spill] sm:$0xff] }
 0x48a   : > { %8039 = vst [vmem:[#allocation23_spill] sm:$0xff] %v7027_v32  ;;  %4746 = vmatmul.msk.bf16.gmra.mxu1 %vm3120_vm11, %v8040_v17  ;;  %4795 = vmatmul.msk.bf16.gmra.mxu0 %vm3120_vm11, %v8040_v17  ;;  %v3462_v42 = vadd.f32 %v6897_v2, %v3291_v29  ;;  %v3262_v17 = vadd.f32 %v6663_v60, %v8042_v22  ;;  %v8047_v29 = vld [vmem:[#allocation39_spill] sm:$0xff] }
 0x48c   : > { %4771 = vmatmul.msk.bf16.gmra.mxu2 %vm3120_vm11, %v8041_v20  ;;  %v3633_v6 = vadd.f32 %v6891_v53, %v3462_v42  ;;  %v3433_v20 = vadd.f32 %v8043_v57, %v3262_v17  ;;  %v8048_v17 = vld [vmem:[#allocation43_spill] sm:$0xff] }
 0x48f   : > { %v3258_v35 = vpop.f32.mrf.mxu1  ;;  %v3724_v38 = vpop.f32.mrf.mxu0 }
 0x490   : > { %v7040_v39 = vadd.f32 %v3724_v38, %v3632_v3  ;;  %v3292_v8 = vadd.f32 %v6663_v60, %v3258_v35  ;;  %v3604_v60 = vadd.f32 %v8046_v63, %v3433_v20  ;;  %v8049_v20 = vld [vmem:[#allocation6_spill] sm:$0xff] }
 0x492   : > { %v3463_v2 = vadd.f32 %v6913_v54, %v3292_v8  ;;  %v3733_v53 = vadd.f32 %v8047_v29, %v3604_v60 }
 0x494   : > { %v3634_v35 = vadd.f32 %v6900_v13, %v3463_v2 }
 0x497   : > { %v3781_v32 = vpop.f32.mrf.mxu1  ;;  %v3727_v23 = vpop.f32.mrf.mxu0 }
 0x498   : > { %v3861_v33 = vadd.f32 %v3781_v32, %v8044_v50  ;;  %v7049_v21 = vadd.f32 %v3727_v23, %v3633_v6 }
 0x49a   : > { %4747 = vmatmul.msk.bf16.gmra.mxu1 %vm3120_vm11, %v8045_v43  ;;  %4796 = vmatmul.msk.bf16.gmra.mxu0 %vm3120_vm11, %v8045_v43  ;;  %v3990_v23 = vadd.f32 %v6924_v55, %v3861_v33 }
 0x49c   : > { %v4116_v22 = vadd.f32 %v6919_v59, %v3990_v23 }
 0x49f   : > { %v3783_v57 = vpop.f32.mrf.mxu1  ;;  %v3729_v3 = vpop.f32.mrf.mxu0 }
 0x4a0   : > { %v3862_v38 = vadd.f32 %v3783_v57, %v3733_v53  ;;  %v7059_v32 = vadd.f32 %v3729_v3, %v3634_v35  ;;  %v8050_v57 = vld [vmem:[#allocation8_spill] sm:$0xff] }
 0x4a2   : > { %v3991_v13 = vadd.f32 %v6943_v62, %v3862_v38 }
 0x4a4   : > { %v4117_v43 = vadd.f32 %v6936_v34, %v3991_v13 }
 0x4a7   : > { %v3786_v42 = vpop.f32.mrf.mxu1  ;;  %v4162_v50 = vpop.f32.mrf.mxu0 }
 0x4a8   : > { %v3863_v6 = vadd.f32 %v3786_v42, %v8048_v17  ;;  %v7064_v54 = vadd.f32 %v4162_v50, %v4116_v22 }
 0x4aa   : > { %4748 = vmatmul.msk.bf16.gmra.mxu1 %vm3120_vm11, %v8049_v20  ;;  %4797 = vmatmul.msk.bf16.gmra.mxu0 %vm3120_vm11, %v8049_v20  ;;  %v3992_v2 = vadd.f32 %v6956_v40, %v3863_v6  ;;  %v8051_v6 = vld [vmem:[#allocation10_spill] sm:$0xff] }
 0x4ac   : > { %v4118_v60 = vadd.f32 %v6948_v10, %v3992_v2 }
 0x4af   : > { %v3788_v8 = vpop.f32.mrf.mxu1  ;;  %v4164_v55 = vpop.f32.mrf.mxu0 }
 0x4b0   : > { %v3864_v33 = vadd.f32 %v3788_v8, %v6717_v15  ;;  %v7073_v59 = vadd.f32 %v4164_v55, %v4117_v43 }
 0x4b2   : > { %v3993_v15 = vadd.f32 %v6972_v25, %v3864_v33 }
 0x4b4   : > { %v4119_v62 = vadd.f32 %v6965_v30, %v3993_v15 }
 0x4b7   : > { %v3791_v63 = vpop.f32.mrf.mxu1  ;;  %v4167_v53 = vpop.f32.mrf.mxu0 }
 0x4b8   : > { %v3865_v29 = vadd.f32 %v3791_v63, %v6728_v11  ;;  %v7078_v35 = vadd.f32 %v4167_v53, %v4118_v60  ;;  %v8053_v60 = vld [vmem:[#allocation9_spill] sm:$0xff] }
 0x4b9   : > { %v8054_v53 = vld [vmem:[#allocation41_spill] sm:$0xff] }
 0x4ba   : > { %4749 = vmatmul.msk.bf16.gmra.mxu1 %vm3120_vm11, %v8050_v57  ;;  %4798 = vmatmul.msk.bf16.gmra.mxu0 %vm3120_vm11, %v8050_v57  ;;  %v3994_v11 = vadd.f32 %v6989_v47, %v3865_v29 }
 0x4bc   : > { %v4120_v23 = vadd.f32 %v6978_v61, %v3994_v11 }
 0x4bf   : > { %v3793_v34 = vpop.f32.mrf.mxu1  ;;  %v4169_v3 = vpop.f32.mrf.mxu0 }
 0x4c0   : > { %v3866_v40 = vadd.f32 %v3793_v34, %v6741_v9  ;;  %v7087_v10 = vadd.f32 %v4169_v3, %v4119_v62 }
 0x4c2   : > { %v3995_v9 = vadd.f32 %v7002_v48, %v3866_v40  ;;  %v8052_v48 = vld [vmem:[#allocation66_spill] sm:$0xff] }
 0x4c4   : > { %v4121_v25 = vadd.f32 %v6995_v18, %v3995_v9 }
 0x4c7   : > { %v3796_v38 = vpop.f32.mrf.mxu1  ;;  %v4172_v22 = vpop.f32.mrf.mxu0 }
 0x4c8   : > { %v3867_v42 = vadd.f32 %v3796_v38, %v6752_v19  ;;  %v7092_v17 = vadd.f32 %v4172_v22, %v4120_v23 }
 0x4ca   : > { %4750 = vmatmul.msk.bf16.gmra.mxu1 %vm3120_vm11, %v8051_v6  ;;  %4799 = vmatmul.msk.bf16.gmra.mxu0 %vm3120_vm11, %v8051_v6  ;;  %v3996_v19 = vadd.f32 %v7019_v24, %v3867_v42  ;;  %v8057_v42 = vld [vmem:[#allocation53_spill] sm:$0xff] }
 0x4cc   : > { %v4122_v13 = vadd.f32 %v7013_v46, %v3996_v19  ;;  %v8060_v19 = vld [vmem:[#allocation74_spill] sm:$0xff] }
 0x4cf   : > { %v3798_v30 = vpop.f32.mrf.mxu1  ;;  %v4174_v50 = vpop.f32.mrf.mxu0 }
 0x4d0   : > { %v3868_v47 = vadd.f32 %v3798_v30, %v6765_v41  ;;  %v7101_v61 = vadd.f32 %v4174_v50, %v4121_v25 }
 0x4d2   : > { %v3997_v41 = vadd.f32 %v7034_v0, %v3868_v47  ;;  %v8058_v47 = vld [vmem:[#allocation19_spill] sm:$0xff] }
 0x4d4   : > { %v4123_v24 = vadd.f32 %v7022_v44, %v3997_v41 }
 0x4d7   : > { %v3801_v20 = vpop.f32.mrf.mxu1  ;;  %v4177_v43 = vpop.f32.mrf.mxu0 }
 0x4d8   : > { %v7106_v8 = vadd.f32 %v3801_v20, %v6776_v7  ;;  %v7108_v33 = vadd.f32 %v4177_v43, %v4122_v13  ;;  %v8061_v13 = vld [vmem:[#allocation31_spill] sm:$0xff] }
 0x4da   : > { %4751 = vmatmul.msk.bf16.gmra.mxu1 %vm3120_vm11, %v8052_v48  ;;  %4800 = vmatmul.msk.bf16.gmra.mxu0 %vm3120_vm11, %v8052_v48  ;;  %v8063_v48 = vld [vmem:[#allocation46_spill] sm:$0xff] }
 0x4df   : > { %v3803_v18 = vpop.f32.mrf.mxu1  ;;  %v4179_v46 = vpop.f32.mrf.mxu0 }
 0x4e0   : > { %v7117_v55 = vadd.f32 %v3803_v18, %v6791_v45  ;;  %v7119_v7 = vadd.f32 %v4179_v46, %v4123_v24  ;;  %v8064_v24 = vld [vmem:[#allocation23_spill] sm:$0xff] }
 0x4e7   : > { %v3806_v2 = vpop.f32.mrf.mxu1 }
 0x4e8   : > { %v7122_v63 = vadd.f32 %v3806_v2, %v6800_v37  ;;  %v8065_v2 = vld [vmem:[#allocation59_spill] sm:$0xff] }
 0x4ea   : > { %4752 = vmatmul.msk.bf16.gmra.mxu1 %vm3120_vm11, %v8053_v60  ;;  %4801 = vmatmul.msk.bf16.gmra.mxu0 %vm3120_vm11, %v8053_v60 }
 0x4ef   : > { %v3808_v0 = vpop.f32.mrf.mxu1 }
 0x4f0   : > { %v7129_v29 = vadd.f32 %v3808_v0, %v6823_v12  ;;  %v8055_v12 = vld [vmem:[#allocation24_spill] sm:$0xff] }
 0x4f7   : > { %v3811_v44 = vpop.f32.mrf.mxu1 }
 0x4f8   : > { %v7132_v45 = vadd.f32 %v3811_v44, %v6832_v58 }
 0x4fa   : > { %4753 = vmatmul.msk.bf16.gmra.mxu1 %vm3120_vm11, %v8054_v53  ;;  %4802 = vmatmul.msk.bf16.gmra.mxu0 %vm3120_vm11, %v8054_v53 }
 0x4ff   : > { %v3813_v37 = vpop.f32.mrf.mxu1 }
 0x500   : > { %v7139_v57 = vadd.f32 %v3813_v37, %v6847_v51  ;;  %v8056_v51 = vld [vmem:[#allocation22_spill] sm:$0xff]  ;;  %v8066_v37 = vld [vmem:[#allocation60_spill] sm:$0xff] }
 0x507   : > { %v3816_v15 = vpop.f32.mrf.mxu1 }
 0x508   : > { %v7142_v34 = vadd.f32 %v3816_v15, %v6858_v26 }
 0x50a   : > { %4754 = vmatmul.msk.bf16.gmra.mxu1 %vm3120_vm11, %v8055_v12  ;;  %4803 = vmatmul.msk.bf16.gmra.mxu0 %vm3120_vm11, %v8055_v12 }
 0x50f   : > { %v3818_v58 = vpop.f32.mrf.mxu1 }
 0x510   : > { %v7149_v62 = vadd.f32 %v3818_v58, %v6871_v52 }
 0x517   : > { %v3821_v40 = vpop.f32.mrf.mxu1 }
 0x518   : > { %v7152_v3 = vadd.f32 %v3821_v40, %v6882_v28 }
 0x51a   : > { %4236 = vmatmul.bf16.gmra.mxu0 %v8038_v14  ;;  %4805 = vmatmul.msk.bf16.vlgmr.msra.gmra.mxu1 %vm3120_vm11, %v8056_v51  ;;  %v8067_v51 = vld [vmem:[#allocation62_spill] sm:$0xff] }
 0x51f   : > { %v3823_v26 = vpop.f32.mrf.mxu1 }
 0x520   : > { %v7158_v11 = vadd.f32 %v3823_v26, %v6895_v1  ;;  %v3930_v26 = vpop.f32.mrf.mxu2 }
 0x527   : > { %v3826_v38 = vpop.f32.mrf.mxu1 }
 0x528   : > { %v7161_v23 = vadd.f32 %v3826_v38, %v6906_v49  ;;  %v4847_v38 = vld [vmem:[%s4956_s8 + $0x8] sm:$0xff] }
 0x52a   : > { %4806 = vmatmul.msk.bf16.gmra.mxu1 %vm3120_vm11, %v8057_v42 }
 0x52f   : > { %v3828_v52 = vpop.f32.mrf.mxu1 }
 0x530   : > { %v7166_v28 = vadd.f32 %v3828_v52, %v6921_v56  ;;  %v4056_v52 = vpop.f32.mrf.mxu3 }
 0x537   : > { %v3831_v22 = vpop.f32.mrf.mxu1 }
 0x538   : > { %v7169_v6 = vadd.f32 %v3831_v22, %v6930_v4  ;;  %v4182_v22 = vpop.f32.mrf.mxu0 }
 0x53a   : > { %4807 = vmatmul.msk.bf16.gmra.mxu1 %vm3120_vm11, %v6216_v27  ;;  %v8059_v27 = vld [vmem:[#allocation57_spill] sm:$0xff] }
 0x53f   : > { %v3833_v1 = vpop.f32.mrf.mxu1 }
 0x540   : > { %v7174_v9 = vadd.f32 %v3833_v1, %v6945_v31 }
 0x547   : > { %v3836_v49 = vpop.f32.mrf.mxu1 }
 0x548   : > { %v7177_v30 = vadd.f32 %v3836_v49, %v6954_v5 }
 0x54a   : > { %4808 = vmatmul.msk.bf16.gmra.mxu1 %vm3120_vm11, %v6251_v16  ;;  %v8062_v16 = vld [vmem:[#allocation56_spill] sm:$0xff] }
 0x54f   : > { %v3838_v56 = vpop.f32.mrf.mxu1 }
 0x550   : > { %v7182_v25 = vadd.f32 %v3838_v56, %v6969_v36  ;;  %v4848_v56 = vld [vmem:[%s4956_s8 + $0x10] sm:$0xff] }
 0x557   : > { %v3841_v4 = vpop.f32.mrf.mxu1 }
 0x558   : > { %v7185_v50 = vadd.f32 %v3841_v4, %v8058_v47  ;;  %v8070_v47 = vld [vmem:[#allocation63_spill] sm:$0xff] }
 0x55a   : > { %4809 = vmatmul.msk.bf16.gmra.mxu1 %vm3120_vm11, %v8059_v27  ;;  %v3932_v27 = vpop.f32.mrf.mxu2 }
 0x55f   : > { %v3843_v31 = vpop.f32.mrf.mxu1 }
 0x560   : > { %v7190_v20 = vadd.f32 %v3843_v31, %v8060_v19  ;;  %v4184_v31 = vpop.f32.mrf.mxu0 }
 0x567   : > { %v3846_v5 = vpop.f32.mrf.mxu1 }
 0x568   : > { %v7193_v43 = vadd.f32 %v3846_v5, %v8061_v13  ;;  %v4849_v13 = vld [vmem:[%s4956_s8 + $0x18] sm:$0xff] }
 0x56a   : > { %4810 = vmatmul.msk.bf16.gmra.mxu1 %vm3120_vm11, %v8062_v16 }
 0x56f   : > { %v3848_v36 = vpop.f32.mrf.mxu1 }
 0x570   : > { %v7198_v41 = vadd.f32 %v3848_v36, %v8063_v48 }
 0x577   : > { %v3851_v18 = vpop.f32.mrf.mxu1 }
 0x578   : > { %v7201_v46 = vadd.f32 %v3851_v18, %v8064_v24  ;;  %v4187_v24 = vpop.f32.mrf.mxu0 }
 0x57a   : > { %4811 = vmatmul.msk.bf16.gmra.mxu1 %vm3120_vm11, %v8065_v2  ;;  %v4850_v2 = vld [vmem:[%s4956_s8 + $0x20] sm:$0xff] }
 0x57f   : > { %v3853_v60 = vpop.f32.mrf.mxu1 }
 0x580   : > { %v7206_v0 = vadd.f32 %v3853_v60, %v7040_v39 }
 0x587   : > { %v3856_v44 = vpop.f32.mrf.mxu1 }
 0x588   : > { %v7209_v53 = vadd.f32 %v3856_v44, %v7049_v21  ;;  %v4846_v21 = vld [vmem:[%s4956_s8] sm:$0xff]  ;;  %v8073_v44 = vld [vmem:[#allocation65_spill] sm:$0xff] }
 0x58a   : > { %4812 = vmatmul.msk.bf16.gmra.mxu1 %vm3120_vm11, %v8066_v37 }
 0x58f   : > { %v3858_v15 = vpop.f32.mrf.mxu1 }
 0x590   : > { %v7214_v12 = vadd.f32 %v3858_v15, %v7059_v32 }
 0x597   : > { %v4288_v58 = vpop.f32.mrf.mxu1 }
 0x598   : > { %v4368_v40 = vadd.f32 %v4288_v58, %v7064_v54 }
 0x59a   : > { %v4400_v39 = vadd.f32 %v4846_v21, %v4368_v40  ;;  %4813 = vmatmul.msk.bf16.gmra.mxu1 %vm3120_vm11, %v8067_v51  ;;  %v4851_v40 = vld [vmem:[%s4956_s8 + $0x28] sm:$0xff] }
 0x59c   : > { %4432 = vst.msk [vmem:[%s7222_s22] sm:$0xff] %vm8068_vm8, %v4400_v39  ;;  %v4189_v39 = vpop.f32.mrf.mxu0  ;;  %vm8090_vm8 = vmmov %vm8084_vm0 }
 0x59f   : > { %v4290_v32 = vpop.f32.mrf.mxu1 }
 0x5a0   : > { %v4369_v54 = vadd.f32 %v4290_v32, %v7073_v59  ;;  %v4058_v59 = vpop.f32.mrf.mxu3 }
 0x5a2   : > { %v4401_v42 = vadd.f32 %v4847_v38, %v4369_v54  ;;  %v4852_v54 = vld [vmem:[%s4956_s8 + $0x30] sm:$0xff] }
 0x5a4   : > { %4433 = vst.msk [vmem:[%s7222_s22 + $0x8] sm:$0xff] %vm8069_vm6, %v4401_v42  ;;  %v8076_v42 = vld [vmem:[#allocation38_spill] sm:$0xff]  ;;  %vm8091_vm6 = vmmov %vm8084_vm0 }
 0x5a7   : > { %v4293_v1 = vpop.f32.mrf.mxu1 }
 0x5a8   : > { %v4370_v49 = vadd.f32 %v4293_v1, %v7078_v35  ;;  %v3935_v35 = vpop.f32.mrf.mxu2  ;;  %v4061_v48 = vpop.f32.mrf.mxu3 }
 0x5aa   : > { %v4402_v4 = vadd.f32 %v4848_v56, %v4370_v49  ;;  %4814 = vmatmul.msk.bf16.gmra.mxu1 %vm3120_vm11, %v8070_v47  ;;  %v3998_v56 = vadd.f32 %v3930_v26, %v7106_v8  ;;  %v4853_v47 = vld [vmem:[%s4956_s8 + $0x38] sm:$0xff] }
 0x5ab   : > { %v8079_v26 = vld [vmem:[#allocation25_spill] sm:$0xff] }
 0x5ac   : > { %4434 = vst.msk [vmem:[%s7222_s22 + $0x10] sm:$0xff] %vm8071_vm15, %v4402_v4  ;;  %vm8092_vm15 = vmmov %vm8084_vm0 }
 0x5af   : > { %v4295_v19 = vpop.f32.mrf.mxu1 }
 0x5b0   : > { %v4371_v5 = vadd.f32 %v4295_v19, %v7087_v10  ;;  %v3937_v10 = vpop.f32.mrf.mxu2  ;;  %v4063_v58 = vpop.f32.mrf.mxu3 }
 0x5b2   : > { %v4403_v16 = vadd.f32 %v4849_v13, %v4371_v5  ;;  %v4124_v5 = vadd.f32 %v4056_v52, %v3998_v56  ;;  %v4856_v56 = vld [vmem:[%s4956_s8 + $0x50] sm:$0xff] }
 0x5b4   : > { %4435 = vst.msk [vmem:[%s7222_s22 + $0x18] sm:$0xff] %vm8072_vm2, %v4403_v16  ;;  %v4250_v16 = vadd.f32 %v4182_v22, %v4124_v5  ;;  %vm8093_vm2 = vmmov %vm8084_vm0 }
 0x5b7   : > { %v4298_v36 = vpop.f32.mrf.mxu1 }
 0x5b8   : > { %v4372_v18 = vadd.f32 %v4298_v36, %v7092_v17  ;;  %v3940_v32 = vpop.f32.mrf.mxu2  ;;  %v4066_v1 = vpop.f32.mrf.mxu3 }
 0x5ba   : > { %v4404_v60 = vadd.f32 %v4850_v2, %v4372_v18  ;;  %4815 = vmatmul.msk.bf16.gmra.mxu1 %vm3120_vm11, %v8073_v44  ;;  %v3999_v2 = vadd.f32 %v3932_v27, %v7117_v55  ;;  %v4854_v44 = vld [vmem:[%s4956_s8 + $0x40] sm:$0xff]  ;;  %v4855_v55 = vld [vmem:[%s4956_s8 + $0x48] sm:$0xff] }
 0x5bc   : > { %4436 = vst.msk [vmem:[%s7222_s22 + $0x20] sm:$0xff] %vm8074_vm12, %v4404_v60  ;;  %vm8094_vm12 = vmmov %vm8084_vm0 }
 0x5bf   : > { %v4300_v37 = vpop.f32.mrf.mxu1 }
 0x5c0   : > { %v4373_v15 = vadd.f32 %v4300_v37, %v7101_v61  ;;  %v4192_v61 = vpop.f32.mrf.mxu0  ;;  %v4068_v13 = vpop.f32.mrf.mxu3 }
 0x5c2   : > { %v4405_v21 = vadd.f32 %v4851_v40, %v4373_v15  ;;  %v4000_v40 = vadd.f32 %v3935_v35, %v7122_v63  ;;  %v8082_v63 = vld [vmem:[#allocation26_spill] sm:$0xff] }
 0x5c4   : > { %4437 = vst.msk [vmem:[%s7222_s22 + $0x28] sm:$0xff] %vm8075_vm5, %v4405_v21  ;;  %vm8095_vm5 = vmmov %vm8084_vm0 }
 0x5c7   : > { %v4303_v17 = vpop.f32.mrf.mxu1 }
 0x5c8   : > { %v4374_v51 = vadd.f32 %v4303_v17, %v7108_v33  ;;  %v3942_v33 = vpop.f32.mrf.mxu2  ;;  %v4194_v36 = vpop.f32.mrf.mxu0 }
 0x5c9   : > { %v4071_v22 = vpop.f32.mrf.mxu3 }
 0x5ca   : > { %v4406_v38 = vadd.f32 %v4852_v54, %v4374_v51  ;;  %4816 = vmatmul.msk.bf16.gmra.mxu1 %vm3120_vm11, %v8076_v42  ;;  %v4126_v51 = vadd.f32 %v4061_v48, %v4000_v40  ;;  %v4001_v42 = vadd.f32 %v3937_v10, %v7129_v29  ;;  %v4857_v29 = vld [vmem:[%s4956_s8 + $0x58] sm:$0xff] }
 0x5cc   : > { %4438 = vst.msk [vmem:[%s7222_s22 + $0x30] sm:$0xff] %vm8077_vm7, %v4406_v38  ;;  %v4252_v54 = vadd.f32 %v4187_v24, %v4126_v51  ;;  %vm8096_vm7 = vmmov %vm8084_vm0 }
 0x5cf   : > { %v4305_v49 = vpop.f32.mrf.mxu1 }
 0x5d0   : > { %v4375_v4 = vadd.f32 %v4305_v49, %v7119_v7  ;;  %v4125_v7 = vadd.f32 %v4058_v59, %v3999_v2  ;;  %v3945_v52 = vpop.f32.mrf.mxu2  ;;  %v4197_v17 = vpop.f32.mrf.mxu0 }
 0x5d1   : > { %v4073_v49 = vpop.f32.mrf.mxu3 }
 0x5d2   : > { %v4407_v19 = vadd.f32 %v4853_v47, %v4375_v4  ;;  %v4251_v37 = vadd.f32 %v4184_v31, %v4125_v7  ;;  %v4127_v47 = vadd.f32 %v4063_v58, %v4001_v42 }
 0x5d4   : > { %4439 = vst.msk [vmem:[%s7222_s22 + $0x38] sm:$0xff] %vm8078_vm3, %v4407_v19  ;;  %v4253_v48 = vadd.f32 %v4189_v39, %v4127_v47  ;;  %v4002_v19 = vadd.f32 %v3940_v32, %v7132_v45  ;;  %v4858_v39 = vld [vmem:[%s4956_s8 + $0x60] sm:$0xff]  ;;  %vm8097_vm3 = vmmov %vm8084_vm0 }
 0x5d5   : > { %v8085_v45 = vld [vmem:[#allocation42_spill] sm:$0xff] }
 0x5d6   : > { %v4128_v2 = vadd.f32 %v4066_v1, %v4002_v19 }
 0x5d7   : > { %v4308_v18 = vpop.f32.mrf.mxu1 }
 0x5d8   : > { %v4376_v60 = vadd.f32 %v4308_v18, %v4250_v16  ;;  %v3947_v38 = vpop.f32.mrf.mxu2  ;;  %v4199_v35 = vpop.f32.mrf.mxu0 }
 0x5d9   : > { %v4076_v18 = vpop.f32.mrf.mxu3  ;;  %v4005_v42 = vadd.f32 %v3947_v38, %v7149_v62  ;;  %v4861_v62 = vld [vmem:[%s4956_s8 + $0x78] sm:$0xff] }
 0x5da   : > { %v4408_v8 = vadd.f32 %v4854_v44, %v4376_v60  ;;  %4817 = vmatmul.msk.bf16.gmra.mxu1 %vm3120_vm11, %v8079_v26  ;;  %v4254_v44 = vadd.f32 %v4192_v61, %v4128_v2 }
 0x5dc   : > { %4440 = vst.msk [vmem:[%s7222_s22 + $0x40] sm:$0xff] %vm8080_vm9, %v4408_v8  ;;  %v4003_v8 = vadd.f32 %v3942_v33, %v7139_v57  ;;  %v4859_v57 = vld [vmem:[%s4956_s8 + $0x68] sm:$0xff]  ;;  %vm8098_vm9 = vmmov %vm8084_vm0 }
 0x5df   : > { %v4310_v15 = vpop.f32.mrf.mxu1 }
 0x5e0   : > { %v4377_v21 = vadd.f32 %v4310_v15, %v4251_v37  ;;  %v3950_v16 = vpop.f32.mrf.mxu2  ;;  %v4202_v60 = vpop.f32.mrf.mxu0  ;;  %v4129_v37 = vadd.f32 %v4068_v13, %v4003_v8 }
 0x5e1   : > { %v4078_v1 = vpop.f32.mrf.mxu3 }
 0x5e2   : > { %v4409_v27 = vadd.f32 %v4855_v55, %v4377_v21  ;;  %v4255_v15 = vadd.f32 %v4194_v36, %v4129_v37  ;;  %v4004_v21 = vadd.f32 %v3945_v52, %v7142_v34  ;;  %v4131_v34 = vadd.f32 %v4073_v49, %v4005_v42 }
 0x5e4   : > { %4441 = vst.msk [vmem:[%s7222_s22 + $0x48] sm:$0xff] %vm8081_vm4, %v4409_v27  ;;  %v4130_v27 = vadd.f32 %v4071_v22, %v4004_v21  ;;  %v4257_v52 = vadd.f32 %v4199_v35, %v4131_v34  ;;  %vm8099_vm4 = vmmov %vm8084_vm0 }
 0x5e7   : > { %v4313_v59 = vpop.f32.mrf.mxu1 }
 0x5e8   : > { %v4378_v31 = vadd.f32 %v4313_v59, %v4252_v54  ;;  %v3952_v32 = vpop.f32.mrf.mxu2  ;;  %v4204_v40 = vpop.f32.mrf.mxu0  ;;  %v4256_v54 = vadd.f32 %v4197_v17, %v4130_v27  ;;  %v4006_v17 = vadd.f32 %v3950_v16, %v7152_v3 }
 0x5e9   : > { %v4081_v13 = vpop.f32.mrf.mxu3 }
 0x5ea   : > { %v4410_v4 = vadd.f32 %v4856_v56, %v4378_v31  ;;  %4818 = vmatmul.msk.bf16.gmra.mxu1 %vm3120_vm11, %v8082_v63  ;;  %v4860_v56 = vld [vmem:[%s4956_s8 + $0x70] sm:$0xff]  ;;  %v4132_v19 = vadd.f32 %v4076_v18, %v4006_v17 }
 0x5ec   : > { %4442 = vst.msk [vmem:[%s7222_s22 + $0x50] sm:$0xff] %vm8083_vm10, %v4410_v4  ;;  %vm8100_vm10 = vmmov %vm8084_vm0 }
 0x5ef   : > { %v4315_v24 = vpop.f32.mrf.mxu1 }
 0x5f0   : > { %v4379_v5 = vadd.f32 %v4315_v24, %v4253_v48  ;;  %v3955_v51 = vpop.f32.mrf.mxu2  ;;  %v4207_v31 = vpop.f32.mrf.mxu0 }
 0x5f1   : > { %v4083_v48 = vpop.f32.mrf.mxu3  ;;  %v4008_v8 = vadd.f32 %v3955_v51, %v7161_v23 }
 0x5f2   : > { %v4411_v10 = vadd.f32 %v4857_v29, %v4379_v5  ;;  %v4007_v5 = vadd.f32 %v3952_v32, %v7158_v11 }
 0x5f4   : > { %4443 = vst.msk [vmem:[%s7222_s22 + $0x58] sm:$0xff] %vm8084_vm0, %v4411_v10  ;;  %v4862_v10 = vld [vmem:[%s4956_s8 + $0x80] sm:$0xff]  ;;  %v4133_v16 = vadd.f32 %v4078_v1, %v4007_v5 }
 0x5f7   : > { %v4318_v58 = vpop.f32.mrf.mxu1 }
 0x5f8   : > { %v4380_v26 = vadd.f32 %v4318_v58, %v4254_v44  ;;  %v3957_v22 = vpop.f32.mrf.mxu2  ;;  %v4209_v24 = vpop.f32.mrf.mxu0  ;;  %v4259_v58 = vadd.f32 %v4204_v40, %v4133_v16 }
 0x5f9   : > { %v4086_v3 = vpop.f32.mrf.mxu3 }
 0x5fa   : > { %v4412_v7 = vadd.f32 %v4858_v39, %v4380_v26  ;;  %4819 = vmatmul.msk.bf16.gmra.mxu1 %vm3120_vm11, %v8085_v45  ;;  %vm8088_vm11 = vmmov %vm8084_vm0  ;;  %v4863_v26 = vld [vmem:[%s4956_s8 + $0x88] sm:$0xff] }
 0x5fc   : > { %4444 = vst.msk [vmem:[%s7222_s22 + $0x60] sm:$0xff] %vm8086_vm1, %v4412_v7  ;;  %v4134_v7 = vadd.f32 %v4081_v13, %v4008_v8  ;;  %v4865_v13 = vld [vmem:[%s4956_s8 + $0x98] sm:$0xff]  ;;  %vm8101_vm1 = vmmov %vm8084_vm0 }
 0x5fe   : > { %v4260_v32 = vadd.f32 %v4207_v31, %v4134_v7 }
 0x5ff   : > { %v4320_v61 = vpop.f32.mrf.mxu1 }
 0x600   : > { %v4381_v55 = vadd.f32 %v4320_v61, %v4255_v15  ;;  %v3960_v29 = vpop.f32.mrf.mxu2  ;;  %v4212_v44 = vpop.f32.mrf.mxu0  ;;  %v4009_v15 = vadd.f32 %v3957_v22, %v7166_v28  ;;  %v4864_v61 = vld [vmem:[%s4956_s8 + $0x90] sm:$0xff]  ;;  %v4866_v22 = vld [vmem:[%s4956_s8 + $0xa0] sm:$0xff] }
 0x601   : > { %v4088_v45 = vpop.f32.mrf.mxu3  ;;  %v4010_v51 = vadd.f32 %v3960_v29, %v7169_v6 }
 0x602   : > { %v4413_v33 = vadd.f32 %v4859_v57, %v4381_v55  ;;  %v4135_v23 = vadd.f32 %v4083_v48, %v4009_v15 }
 0x603   : > { %v4136_v28 = vadd.f32 %v4086_v3, %v4010_v51  ;;  %v4868_v3 = vld [vmem:[%s4956_s8 + $0xb0] sm:$0xff] }
 0x604   : > { %4445 = vst.msk [vmem:[%s7222_s22 + $0x68] sm:$0xff] %vm8087_vm13, %v4413_v33  ;;  %v4261_v57 = vadd.f32 %v4209_v24, %v4135_v23  ;;  %vm8102_vm13 = vmmov %vm8084_vm0 }
 0x607   : > { %v4323_v59 = vpop.f32.mrf.mxu1 }
 0x608   : > { %v4382_v36 = vadd.f32 %v4323_v59, %v4256_v54  ;;  %v3962_v11 = vpop.f32.mrf.mxu2  ;;  %v4214_v37 = vpop.f32.mrf.mxu0 }
 0x609   : > { %v4091_v27 = vpop.f32.mrf.mxu3 }
 0x60a   : > { %v4414_v4 = vadd.f32 %v4860_v56, %v4382_v36  ;;  %4362 = vmatmul.bf16.gmra.mxu1 %v8038_v14  ;;  %v4258_v14 = vadd.f32 %v4202_v60, %v4132_v19  ;;  %v4262_v36 = vadd.f32 %v4212_v44, %v4136_v28  ;;  %v4867_v19 = vld [vmem:[%s4956_s8 + $0xa8] sm:$0xff] }
 0x60c   : > { %4446 = vst.msk [vmem:[%s7222_s22 + $0x70] sm:$0xff] %vm8088_vm11, %v4414_v4  ;;  %v4011_v4 = vadd.f32 %v3962_v11, %v7174_v9  ;;  %v4869_v11 = vld [vmem:[%s4956_s8 + $0xb8] sm:$0xff]  ;;  %vm8103_vm11 = vmmov %vm8084_vm0 }
 0x60e   : > { %v4137_v17 = vadd.f32 %v4088_v45, %v4011_v4 }
 0x60f   : > { %v4325_v63 = vpop.f32.mrf.mxu1 }
 0x610   : > { %v4383_v47 = vadd.f32 %v4325_v63, %v4257_v52  ;;  %v3965_v55 = vpop.f32.mrf.mxu2  ;;  %v4217_v59 = vpop.f32.mrf.mxu0 }
 0x611   : > { %v4093_v52 = vpop.f32.mrf.mxu3 }
 0x612   : > { %v4415_v38 = vadd.f32 %v4861_v62, %v4383_v47  ;;  %v4263_v47 = vadd.f32 %v4214_v37, %v4137_v17  ;;  %v4012_v62 = vadd.f32 %v3965_v55, %v7177_v30 }
 0x614   : > { %4447 = vst.msk [vmem:[%s7222_s22 + $0x78] sm:$0xff] %vm8089_vm14, %v4415_v38  ;;  %vm8104_vm14 = vmmov %vm8084_vm0 }
 0x617   : > { %v4328_v49 = vpop.f32.mrf.mxu1 }
 0x618   : > { %v4384_v35 = vadd.f32 %v4328_v49, %v4258_v14  ;;  %v3967_v31 = vpop.f32.mrf.mxu2  ;;  %v4219_v6 = vpop.f32.mrf.mxu0  ;;  %v4138_v49 = vadd.f32 %v4091_v27, %v4012_v62  ;;  %v4873_v62 = vld [vmem:[%s4956_s8 + $0xd8] sm:$0xff] }
 0x619   : > { %v4096_v9 = vpop.f32.mrf.mxu3 }
 0x61a   : > { %v4416_v2 = vadd.f32 %v4862_v10, %v4384_v35  ;;  %v4264_v35 = vadd.f32 %v4217_v59, %v4138_v49  ;;  %v4013_v10 = vadd.f32 %v3967_v31, %v7182_v25  ;;  %v4871_v59 = vld [vmem:[%s4956_s8 + $0xc8] sm:$0xff] }
 0x61c   : > { %4448 = vst.msk [vmem:[%s7222_s22 + $0x80] sm:$0xff] %vm8090_vm8, %v4416_v2  ;;  %v4139_v44 = vadd.f32 %v4093_v52, %v4013_v10 }
 0x61f   : > { %v4330_v18 = vpop.f32.mrf.mxu1 }
 0x620   : > { %v4385_v60 = vadd.f32 %v4330_v18, %v4259_v58  ;;  %v3970_v24 = vpop.f32.mrf.mxu2  ;;  %v4222_v5 = vpop.f32.mrf.mxu0  ;;  %v4265_v18 = vadd.f32 %v4219_v6, %v4139_v44 }
 0x621   : > { %v4098_v58 = vpop.f32.mrf.mxu3 }
 0x622   : > { %v4417_v39 = vadd.f32 %v4863_v26, %v4385_v60  ;;  %v4014_v26 = vadd.f32 %v3970_v24, %v7185_v50 }
 0x624   : > { %4449 = vst.msk [vmem:[%s7222_s22 + $0x88] sm:$0xff] %vm8091_vm6, %v4417_v39  ;;  %v4140_v25 = vadd.f32 %v4096_v9, %v4014_v26 }
 0x627   : > { %v4333_v1 = vpop.f32.mrf.mxu1 }
 0x628   : > { %v4386_v40 = vadd.f32 %v4333_v1, %v4260_v32  ;;  %v3972_v30 = vpop.f32.mrf.mxu2  ;;  %v4224_v8 = vpop.f32.mrf.mxu0  ;;  %v4266_v32 = vadd.f32 %v4222_v5, %v4140_v25 }
 0x629   : > { %v4101_v1 = vpop.f32.mrf.mxu3  ;;  %v4015_v15 = vadd.f32 %v3972_v30, %v7190_v20 }
 0x62a   : > { %v4418_v21 = vadd.f32 %v4864_v61, %v4386_v40 }
 0x62b   : > { %v4141_v50 = vadd.f32 %v4098_v58, %v4015_v15 }
 0x62c   : > { %4450 = vst.msk [vmem:[%s7222_s22 + $0x90] sm:$0xff] %vm8092_vm15, %v4418_v21  ;;  %v4870_v21 = vld [vmem:[%s4956_s8 + $0xc0] sm:$0xff] }
 0x62d   : > { %v4267_v55 = vadd.f32 %v4224_v8, %v4141_v50  ;;  %v4875_v8 = vld [vmem:[%s4956_s8 + $0xe8] sm:$0xff] }
 0x62f   : > { %v4335_v33 = vpop.f32.mrf.mxu1 }
 0x630   : > { %v4387_v54 = vadd.f32 %v4335_v33, %v4261_v57  ;;  %v3975_v45 = vpop.f32.mrf.mxu2  ;;  %v4227_v61 = vpop.f32.mrf.mxu0 }
 0x631   : > { %v4016_v27 = vadd.f32 %v3975_v45, %v7193_v43 }
 0x632   : > { %v4419_v42 = vadd.f32 %v4865_v13, %v4387_v54  ;;  %v4103_v54 = vpop.f32.mrf.mxu3 }
 0x634   : > { %4451 = vst.msk [vmem:[%s7222_s22 + $0x98] sm:$0xff] %vm8093_vm2, %v4419_v42  ;;  %v4142_v42 = vadd.f32 %v4101_v1, %v4016_v27 }
 0x636   : > { %v4268_v28 = vadd.f32 %v4227_v61, %v4142_v42 }
 0x637   : > { %v4338_v56 = vpop.f32.mrf.mxu1 }
 0x638   : > { %v4388_v34 = vadd.f32 %v4338_v56, %v4262_v36  ;;  %v3977_v57 = vpop.f32.mrf.mxu2  ;;  %v4229_v20 = vpop.f32.mrf.mxu0 }
 0x639   : > { %v4017_v31 = vadd.f32 %v3977_v57, %v7198_v41 }
 0x63a   : > { %v4420_v63 = vadd.f32 %v4866_v22, %v4388_v34  ;;  %v4872_v34 = vld [vmem:[%s4956_s8 + $0xd0] sm:$0xff]  ;;  %v4106_v43 = vpop.f32.mrf.mxu3 }
 0x63b   : > { %v4143_v22 = vadd.f32 %v4103_v54, %v4017_v31 }
 0x63c   : > { %4452 = vst.msk [vmem:[%s7222_s22 + $0xa0] sm:$0xff] %vm8094_vm12, %v4420_v63 }
 0x63d   : > { %v4269_v6 = vadd.f32 %v4229_v20, %v4143_v22 }
 0x63f   : > { %v4340_v48 = vpop.f32.mrf.mxu1 }
 0x640   : > { %v4389_v38 = vadd.f32 %v4340_v48, %v4263_v47  ;;  %v3980_v4 = vpop.f32.mrf.mxu2  ;;  %v4232_v63 = vpop.f32.mrf.mxu0 }
 0x641   : > { %v4018_v47 = vadd.f32 %v3980_v4, %v7201_v46 }
 0x642   : > { %v4421_v14 = vadd.f32 %v4867_v19, %v4389_v38  ;;  %v4108_v19 = vpop.f32.mrf.mxu3 }
 0x643   : > { %v4144_v24 = vadd.f32 %v4106_v43, %v4018_v47 }
 0x644   : > { %4453 = vst.msk [vmem:[%s7222_s22 + $0xa8] sm:$0xff] %vm8095_vm5, %v4421_v14 }
 0x645   : > { %v4270_v14 = vadd.f32 %v4232_v63, %v4144_v24 }
 0x647   : > { %v4343_v29 = vpop.f32.mrf.mxu1 }
 0x648   : > { %v4390_v2 = vadd.f32 %v4343_v29, %v4264_v35  ;;  %v3982_v41 = vpop.f32.mrf.mxu2  ;;  %v4234_v9 = vpop.f32.mrf.mxu0  ;;  %v4874_v29 = vld [vmem:[%s4956_s8 + $0xe0] sm:$0xff] }
 0x649   : > { %v4019_v5 = vadd.f32 %v3982_v41, %v7206_v0 }
 0x64a   : > { %v4422_v16 = vadd.f32 %v4868_v3, %v4390_v2 }
 0x64b   : > { %v4145_v46 = vadd.f32 %v4108_v19, %v4019_v5 }
 0x64c   : > { %4454 = vst.msk [vmem:[%s7222_s22 + $0xb0] sm:$0xff] %vm8096_vm7, %v4422_v16  ;;  %v4111_v16 = vpop.f32.mrf.mxu3 }
 0x64d   : > { %v4271_v3 = vadd.f32 %v4234_v9, %v4145_v46 }
 0x64f   : > { %v4345_v60 = vpop.f32.mrf.mxu1 }
 0x650   : > { %v4391_v39 = vadd.f32 %v4345_v60, %v4265_v18  ;;  %v3985_v2 = vpop.f32.mrf.mxu2  ;;  %v4237_v18 = vpop.f32.mrf.mxu0 }
 0x651   : > { %v4020_v44 = vadd.f32 %v3985_v2, %v7209_v53 }
 0x652   : > { %v4423_v7 = vadd.f32 %v4869_v11, %v4391_v39 }
 0x653   : > { %v4146_v0 = vadd.f32 %v4111_v16, %v4020_v44 }
 0x654   : > { %4455 = vst.msk [vmem:[%s7222_s22 + $0xb8] sm:$0xff] %vm8097_vm3, %v4423_v7  ;;  %v4113_v45 = vpop.f32.mrf.mxu3 }
 0x655   : > { %v4272_v26 = vadd.f32 %v4237_v18, %v4146_v0 }
 0x657   : > { %v4348_v37 = vpop.f32.mrf.mxu1 }
 0x658   : > { %v4392_v40 = vadd.f32 %v4348_v37, %v4266_v32  ;;  %v3987_v39 = vpop.f32.mrf.mxu2  ;;  %v4876_v32 = vld [vmem:[%s4956_s8 + $0xf0] sm:$0xff]  ;;  %v4239_v53 = vpop.f32.mrf.mxu0 }
 0x659   : > { %v4021_v7 = vadd.f32 %v3987_v39, %v7214_v12 }
 0x65a   : > { %v4424_v23 = vadd.f32 %v4870_v21, %v4392_v40  ;;  %v4877_v21 = vld [vmem:[%s4956_s8 + $0xf8] sm:$0xff] }
 0x65b   : > { %v4147_v1 = vadd.f32 %v4113_v45, %v4021_v7 }
 0x65c   : > { %4456 = vst.msk [vmem:[%s7222_s22 + $0xc0] sm:$0xff] %vm8098_vm9, %v4424_v23 }
 0x65d   : > { %v4273_v15 = vadd.f32 %v4239_v53, %v4147_v1 }
 0x65f   : > { %v4350_v33 = vpop.f32.mrf.mxu1 }
 0x660   : > { %v4393_v51 = vadd.f32 %v4350_v33, %v4267_v55 }
 0x662   : > { %v4425_v13 = vadd.f32 %v4871_v59, %v4393_v51 }
 0x664   : > { %4457 = vst.msk [vmem:[%s7222_s22 + $0xc8] sm:$0xff] %vm8099_vm4, %v4425_v13 }
 0x667   : > { %v4353_v36 = vpop.f32.mrf.mxu1 }
 0x668   : > { %v4394_v56 = vadd.f32 %v4353_v36, %v4268_v28 }
 0x66a   : > { %v4426_v52 = vadd.f32 %v4872_v34, %v4394_v56 }
 0x66c   : > { %4458 = vst.msk [vmem:[%s7222_s22 + $0xd0] sm:$0xff] %vm8100_vm10, %v4426_v52 }
 0x66f   : > { %v4355_v17 = vpop.f32.mrf.mxu1 }
 0x670   : > { %v4395_v48 = vadd.f32 %v4355_v17, %v4269_v6 }
 0x672   : > { %v4427_v38 = vadd.f32 %v4873_v62, %v4395_v48 }
 0x674   : > { %4459 = vst.msk [vmem:[%s7222_s22 + $0xd8] sm:$0xff] %vm8084_vm0, %v4427_v38 }
 0x677   : > { %v4358_v49 = vpop.f32.mrf.mxu1 }
 0x678   : > { %v4396_v35 = vadd.f32 %v4358_v49, %v4270_v14 }
 0x67a   : > { %v4428_v10 = vadd.f32 %v4874_v29, %v4396_v35 }
 0x67c   : > { %4460 = vst.msk [vmem:[%s7222_s22 + $0xe0] sm:$0xff] %vm8101_vm1, %v4428_v10 }
 0x67f   : > { %v4360_v30 = vpop.f32.mrf.mxu1 }
 0x680   : > { %v4397_v58 = vadd.f32 %v4360_v30, %v4271_v3 }
 0x682   : > { %v4429_v60 = vadd.f32 %v4875_v8, %v4397_v58 }
 0x684   : > { %4461 = vst.msk [vmem:[%s7222_s22 + $0xe8] sm:$0xff] %vm8102_vm13, %v4429_v60 }
 0x687   : > { %v4363_v11 = vpop.f32.mrf.mxu1 }
 0x688   : > { %v4398_v25 = vadd.f32 %v4363_v11, %v4272_v26 }
 0x68a   : > { %v4430_v37 = vadd.f32 %v4876_v32, %v4398_v25 }
 0x68c   : > { %4462 = vst.msk [vmem:[%s7222_s22 + $0xf0] sm:$0xff] %vm8103_vm11, %v4430_v37 }
 0x68f   : > { %v4365_v40 = vpop.f32.mrf.mxu1 }
 0x690   : > { %v4399_v61 = vadd.f32 %v4365_v40, %v4273_v15 }
 0x692   : > { %v4431_v23 = vadd.f32 %v4877_v21, %v4399_v61 }
 0x694   : > { %4463 = vst.msk [vmem:[%s7222_s22 + $0xf8] sm:$0xff] %vm8104_vm14, %v4431_v23 }
 0x695 PF: > { %s15_s18 = sadd.s32 1, %s4884_s18  }
 0x696   : > { %p12_p4 = scmp.ge.s32.totalorder %s15_s18, 4  }
 0x698   :  { %14 = sbr.rel (!%p12_p4) target bundleno = 1 (0x1), region = 86 }

</bundles_post_ra>
